<compile_context>
chip_gen: v6e
topology: v6e:2x2x1
jax: 0.10.0
libtpu: 0.0.40
codegen_flags: <defaults>
</compile_context>

<pallas_src>
import functools

import jax
import jax.numpy as jnp
from jax.experimental import pallas as pl
from jax.experimental.pallas import tpu as pltpu


# --------------------------- in-kernel helpers --------------------------------

def _conv3x3(x, w, masks, H, W):
    """3x3 'same' conv on a channels-major, lane-flat (Cin, H*W) f32 slab.

    Taps are built with 4 lane rolls (2 row shifts, then 2 column shifts of the
    stacked row bands); the factored validity masks implement the zero padding.
      w:     (Cout, 9*Cin) bf16, columns ordered (kx, ky, cin)
             == torch_w.permute(0, 3, 2, 1).reshape(Cout, -1)
      masks: (4, H*W) f32 rows [y-1 valid, y+1 valid, x-1 valid, x+1 valid].
    """
    HW = H * W
    up = pltpu.roll(x, W, axis=1) * masks[0:1]             # needs x[:, p - W]  (ky = 0)
    dn = pltpu.roll(x, HW - W, axis=1) * masks[1:2]         # needs x[:, p + W]  (ky = 2)
    mid = jnp.concatenate([up, x, dn], axis=0)              # (3*Cin, HW), ky-major bands
    left = pltpu.roll(mid, 1, axis=1) * masks[2:3]           # kx = 0 taps
    right = pltpu.roll(mid, HW - 1, axis=1) * masks[3:4]     # kx = 2 taps
    pat = jnp.concatenate([left, mid, right], axis=0).astype(jnp.bfloat16)  # (9*Cin, HW)
    return jnp.dot(w, pat, preferred_element_type=jnp.float32)              # (Cout, HW)


def _axial_attn_grouped(ag, w_big, gamma, cq, H):
    """CaraNet self_attn on a row-grouped (c*H, W) slab (rows ordered (y, ci)).

    w_big = [kron(I_H, Wq); kron(I_H, Wk); kron(I_H, Wv)] (block-diagonal over
    image rows), so the three 1x1 projections are a single MXU matmul and no
    per-row regrouping is needed inside the attention.  For square maps torch's
    'h' and 'w' modes share this grouping; the grouped dim is only contracted /
    mapped elementwise, so its ordering cancels out.
    """
    qkv = jnp.dot(w_big, ag.astype(jnp.bfloat16), preferred_element_type=jnp.float32)
    nq = cq * H
    q2, k2, v2 = qkv[:nq], qkv[nq:2 * nq], qkv[2 * nq:]
    s = jax.lax.dot_general(q2, k2, (((0,), (0,)), ((), ())),
                            preferred_element_type=jnp.float32)          # (W, W)
    s = s - jnp.max(s, axis=-1, keepdims=True)
    e = jnp.exp(s)
    attn = e / jnp.sum(e, axis=-1, keepdims=True)
    o2 = jax.lax.dot_general(v2, attn, (((1,), (1,)), ((), ())),
                             preferred_element_type=jnp.float32)          # (c*H, W)
    return gamma * o2 + ag


# --------------------------- fused Pallas kernel -------------------------------

def _up_block_kernel(xe_ref, xd_ref, const_ref, vecs_ref, w1_ref, w3_ref,
                     wlin_ref, wattn_ref, out_ref, ra_ref, *,
                     H, W, hw_small, out_ch, out_ch_p, in_ch_p, c_cat_p,
                     red_p, cq_p):
    """One image per grid step: whole conv_block(SEBasicBlock) + ReverseAxialAttention.

    vecs columns: 0 bn1_scale | 1 bn1_bias | 2 sc_bn_scale | 3 sc_bn_bias |
      4 bn2_bias | 5 se_b1 | 6 se_b2 | 7/8 ra1 bias/slope | 9/10 ra2 | 11/12 ra3 |
      13 out_conv_b (row 0) | 14 h_gamma (row 0) | 15 w_gamma (row 0).
    """
    masks = const_ref[0:4, :]                      # (4, HW) edge-validity rows
    U = const_ref[8:8 + hw_small, :]               # (h*w, HW) nearest-2x 0/1 matrix
    vecs = vecs_ref[...]                           # (c_cat_p, 16) packed per-channel params
    wlin = wlin_ref[...]                           # packed 1x1 weights (bf16)

    # packed 1x1 weight row bands
    o_sc = 0
    o_se1 = o_sc + out_ch_p
    o_se2 = o_se1 + red_p
    o_aa0 = o_se2 + out_ch_p
    o_oc = o_aa0 + out_ch_p

    # fused nearest 2x upsample of the decoder feature (exact: U is 0/1)
    xd_up = jnp.dot(xd_ref[0], U, preferred_element_type=jnp.float32)   # (in_ch_p, HW)
    xe = xe_ref[0]                                                       # (out_ch_p, HW)
    # channel concat([x_enc, upsampled x_dec]) built in VMEM, never stored in HBM
    cat = jnp.concatenate([xe, xd_up], axis=0)                           # (c_cat_p, HW)

    # ---------------- conv_block / SEBasicBlock --------------------------------
    a1 = jnp.maximum(cat * vecs[:, 0:1] + vecs[:, 1:2], 0.0)     # bn1 + relu
    h = _conv3x3(a1, w1_ref[...], masks, H, W)                   # conv1 (bn2 scale folded)
    h = jnp.maximum(h + vecs[:out_ch_p, 4:5], 0.0)               # bn2 bias + relu
    h = _conv3x3(h, w3_ref[0], masks, H, W)                      # conv2

    # SE gate: GAP -> 1x1 -> ReLU -> 1x1 -> sigmoid -> per-channel scale
    pooled = jnp.mean(h, axis=1, keepdims=True).astype(jnp.bfloat16)     # (out_ch_p, 1)
    se1 = jnp.maximum(
        jnp.dot(wlin[o_se1:o_se2, 0:out_ch_p], pooled,
                preferred_element_type=jnp.float32) + vecs[:red_p, 5:6], 0.0)
    gate = jax.nn.sigmoid(
        jnp.dot(wlin[o_se2:o_aa0, 0:red_p], se1.astype(jnp.bfloat16),
                preferred_element_type=jnp.float32) + vecs[:out_ch_p, 6:7])
    h = h * gate

    # shortcut: BN + ReLU + 1x1 conv on the same VMEM-resident concat
    asc = jnp.maximum(cat * vecs[:, 2:3] + vecs[:, 3:4], 0.0)
    sc = jnp.dot(wlin[o_sc:o_se1, 0:c_cat_p], asc.astype(jnp.bfloat16),
                 preferred_element_type=jnp.float32)
    out_ref[0] = (h + sc)[:out_ch]

    # ---------------- ReverseAxialAttention ------------------------------------
    # out_conv: 1x1 conv (with bias) on the upsampled decoder feature
    p = jnp.dot(wlin[o_oc:o_oc + 8, 0:in_ch_p], xd_up.astype(jnp.bfloat16),
                preferred_element_type=jnp.float32)[0:1] + vecs[0:1, 13:14]   # (1, HW)
    p_ra = jax.nn.sigmoid(-p)                                   # == 1 - sigmoid(p)

    # AA_kernel: 1x1 conv -> 3x3 conv -> H attention -> W attention
    # TODO(synk): AA_kernel / Conv / self_attn are not defined in model/net.py;
    # reimplemented from the CaraNet reference (bias-free convs, no BN inside).
    aa = jnp.dot(wlin[o_aa0:o_oc, 0:out_ch_p], xe.astype(jnp.bfloat16),
                 preferred_element_type=jnp.float32)
    aa = _conv3x3(aa, w3_ref[1], masks, H, W)

    # regroup (c, H*W) -> (c*H, W) once; both axial attentions stay grouped.
    ag = jnp.concatenate([aa[:, y * W:(y + 1) * W] for y in range(H)], axis=0)
    ag = _axial_attn_grouped(ag, wattn_ref[0], vecs[0:1, 14:15], cq_p, H)
    ag = _axial_attn_grouped(ag, wattn_ref[1], vecs[0:1, 15:16], cq_p, H)
    aa = jnp.concatenate([ag[y * out_ch_p:(y + 1) * out_ch_p, :] for y in range(H)],
                         axis=1)

    ra = p_ra * aa                          # expand(-1, out_ch, -1, -1).mul(aa)
    # ra_conv1..3: 3x3 conv (BN scale folded) -> BN(eps=1e-3) bias -> PReLU
    for i, (bcol, scol) in enumerate(((7, 8), (9, 10), (11, 12))):
        ra = _conv3x3(ra, w3_ref[2 + i], masks, H, W)
        ra = ra + vecs[:out_ch_p, bcol:bcol + 1]
        ra = jnp.where(ra >= 0.0, ra, ra * vecs[:out_ch_p, scol:scol + 1])
    ra_ref[0] = ra[0:1] + p


# --------------------------- wrapper -------------------------------------------

def up_block_forward(params, x_dec_nchw, x_enc_nchw):
    eps_bn, eps_cara = 1e-5, 1e-3
    B, in_ch, sh, sw = x_dec_nchw.shape
    out_ch = params["conv1_w"].shape[0]
    red = params["se_w1"].shape[0]
    cq = params["h_wq"].shape[0]
    H, W = 2 * sh, 2 * sw
    HW = H * W
    assert H == W, "axial-attention path assumes square feature maps (as in CaraNet)"
    assert x_enc_nchw.shape == (B, out_ch, H, W)

    pad8 = lambda n: ((n + 7) // 8) * 8
    out_ch_p, in_ch_p, red_p, cq_p = pad8(out_ch), pad8(in_ch), pad8(red), pad8(cq)
    c_cat_p = out_ch_p + in_ch_p

    # ---- activations: NCHW -> channel-padded, lane-flat ------------------------
    xe = jnp.pad(x_enc_nchw.astype(jnp.float32).reshape(B, out_ch, HW),
                 ((0, 0), (0, out_ch_p - out_ch), (0, 0)))
    xd = jnp.pad(x_dec_nchw.astype(jnp.float32).reshape(B, in_ch, sh * sw),
                 ((0, 0), (0, in_ch_p - in_ch), (0, 0)))

    # ---- constants: 3x3 edge masks + nearest-2x upsample matrix ----------------
    yy = jnp.arange(HW, dtype=jnp.int32) // W
    xx = jnp.arange(HW, dtype=jnp.int32) % W
    masks = jnp.stack([yy >= 1, yy <= H - 2, xx >= 1, xx <= W - 2]).astype(jnp.float32)
    src = (yy // 2) * sw + (xx // 2)
    U = (jnp.arange(sh * sw, dtype=jnp.int32)[:, None] == src[None, :]).astype(jnp.float32)
    consts = jnp.zeros((8 + sh * sw, HW), jnp.float32).at[0:4].set(masks).at[8:].set(U)

    # ---- fold eval-mode BN, pack small per-channel params ----------------------
    def fold_bn(bn, eps):
        s = bn["gamma"] * jax.lax.rsqrt(bn["var"] + eps)
        return s, bn["beta"] - bn["mean"] * s

    def cat_pad(v):   # scatter a (c_cat,) vector into the padded [enc | dec] slots
        o = jnp.zeros((c_cat_p,), v.dtype)
        return o.at[:out_ch].set(v[:out_ch]).at[out_ch_p:out_ch_p + in_ch].set(v[out_ch:])

    def rpad(v):
        return jnp.zeros((c_cat_p,), v.dtype).at[:v.shape[0]].set(v)

    bn1_s, bn1_b = fold_bn(params["bn1"], eps_bn)
    bn2_s, bn2_b = fold_bn(params["bn2"], eps_bn)
    sc_s, sc_b = fold_bn(params["sc_bn"], eps_bn)
    ra_bn = [fold_bn(params["ra%d_bn" % i], eps_cara) for i in (1, 2, 3)]

    vecs = jnp.stack([
        cat_pad(bn1_s), cat_pad(bn1_b), cat_pad(sc_s), cat_pad(sc_b),
        rpad(bn2_b), rpad(params["se_b1"]), rpad(params["se_b2"]),
        rpad(ra_bn[0][1]), rpad(params["ra1_prelu"]),
        rpad(ra_bn[1][1]), rpad(params["ra2_prelu"]),
        rpad(ra_bn[2][1]), rpad(params["ra3_prelu"]),
        rpad(params["out_conv_b"]), rpad(params["h_gamma"]), rpad(params["w_gamma"]),
    ], axis=1)                                                    # (c_cat_p, 16) f32

    # ---- conv / 1x1 / attention weights (padded, BN scales folded, bf16) -------
    def flat3x3(wt, cout_p, cin_p, scale=None):
        if scale is not None:
            wt = wt * scale[:, None, None, None]
        wt = jnp.pad(wt, ((0, cout_p - wt.shape[0]), (0, cin_p - wt.shape[1]),
                          (0, 0), (0, 0)))
        return wt.transpose(0, 3, 2, 1).reshape(cout_p, -1).astype(jnp.bfloat16)

    # conv1 sees the [enc | dec] concat -> scatter its input channels into the
    # padded slots; BN2's scale folds into conv1's output rows.
    w1t = params["conv1_w"] * bn2_s[:, None, None, None]
    w1p = jnp.zeros((out_ch_p, c_cat_p, 3, 3), jnp.float32)
    w1p = w1p.at[:out_ch, :out_ch].set(w1t[:, :out_ch])
    w1p = w1p.at[:out_ch, out_ch_p:out_ch_p + in_ch].set(w1t[:, out_ch:])
    w1 = w1p.transpose(0, 3, 2, 1).reshape(out_ch_p, -1).astype(jnp.bfloat16)

    w3 = jnp.stack([
        flat3x3(params["conv2_w"], out_ch_p, out_ch_p),
        flat3x3(params["aa_w1"], out_ch_p, out_ch_p),
        flat3x3(params["ra1_w"], out_ch_p, out_ch_p, ra_bn[0][0]),
        flat3x3(params["ra2_w"], out_ch_p, out_ch_p, ra_bn[1][0]),
        flat3x3(params["ra3_w"], out_ch_p, out_ch_p, ra_bn[2][0]),
    ])                                                            # (5, out_ch_p, 9*out_ch_p)

    def pad2(wt, r, c):
        return jnp.pad(wt, ((0, r - wt.shape[0]), (0, c - wt.shape[1])))

    scw = jnp.zeros((out_ch_p, c_cat_p), jnp.float32)
    scw = scw.at[:out_ch, :out_ch].set(params["sc_w"][:, :out_ch])
    scw = scw.at[:out_ch, out_ch_p:out_ch_p + in_ch].set(params["sc_w"][:, out_ch:])

    nlc = c_cat_p
    wlin = jnp.concatenate([
        pad2(scw, out_ch_p, nlc),                 # shortcut 1x1
        pad2(params["se_w1"], red_p, nlc),        # SE squeeze
        pad2(params["se_w2"], out_ch_p, nlc),     # SE excite
        pad2(params["aa_w0"], out_ch_p, nlc),     # AA 1x1
        pad2(params["out_conv_w"], 8, nlc),       # out_conv (row 0 real)
    ], axis=0).astype(jnp.bfloat16)

    eye_h = jnp.eye(H, dtype=jnp.float32)
    def attn_big(wq, wk, wv):
        return jnp.concatenate(
            [jnp.kron(eye_h, pad2(wq, cq_p, out_ch_p)),
             jnp.kron(eye_h, pad2(wk, cq_p, out_ch_p)),
             jnp.kron(eye_h, pad2(wv, out_ch_p, out_ch_p))], axis=0)

    wattn = jnp.stack([
        attn_big(params["h_wq"], params["h_wk"], params["h_wv"]),
        attn_big(params["w_wq"], params["w_wk"], params["w_wv"]),
    ]).astype(jnp.bfloat16)                       # (2, (2*cq_p+out_ch_p)*H, out_ch_p*H)

    # ---- one fused pallas_call --------------------------------------------------
    kernel = functools.partial(
        _up_block_kernel, H=H, W=W, hw_small=sh * sw, out_ch=out_ch,
        out_ch_p=out_ch_p, in_ch_p=in_ch_p, c_cat_p=c_cat_p, red_p=red_p, cq_p=cq_p)

    act = lambda c, n: pl.BlockSpec((1, c, n), lambda i: (i, 0, 0))
    cst2 = lambda s: pl.BlockSpec(s, lambda i: (0, 0))
    cst3 = lambda s: pl.BlockSpec(s, lambda i: (0, 0, 0))
    # TODO(synk): constant-index weight inputs could use pipeline_mode=pl.Buffered(1)
    # to drop their second VMEM buffer; left at the default for compatibility.
    # TODO(synk): one image per grid step (2 parallel steps feed both v7x TCs); for
    # larger batches / production resolutions fold pairs of images onto the lane
    # axis per step and tile the spatial axis with a halo against per-gen VMEM.

    out_flat, ra_flat = pl.pallas_call(
        kernel,
        out_shape=(jax.ShapeDtypeStruct((B, out_ch, HW), jnp.float32),
                   jax.ShapeDtypeStruct((B, 1, HW), jnp.float32)),
        grid=(B,),
        in_specs=[
            act(out_ch_p, HW),                      # x_enc (channel padded)
            act(in_ch_p, sh * sw),                  # x_dec (low-res; upsampled in VMEM)
            cst2((8 + sh * sw, HW)),                # tap masks + upsample matrix
            cst2((c_cat_p, 16)),                    # packed per-channel params / scalars
            cst2((out_ch_p, 9 * c_cat_p)),          # conv1 weight
            cst3((5, out_ch_p, 9 * out_ch_p)),      # conv2 / aa conv1 / ra_conv1..3
            cst2((wlin.shape[0], nlc)),             # packed 1x1 weights
            cst3(wattn.shape),                      # block-diag axial-attention weights
        ],
        out_specs=(act(out_ch, HW), act(1, HW)),
        compiler_params=pltpu.CompilerParams(
            dimension_semantics=("parallel",),
            vmem_limit_bytes=32 * 1024 * 1024),
    )(xe, xd, consts, vecs, w1, w3, wlin, wattn)

    return out_flat.reshape(B, out_ch, H, W), ra_flat.reshape(B, 1, H, W)


# --------------------------- parameters ----------------------------------------

def init_params(key, in_ch, out_ch, reduction=2):
    c_cat = in_ch + out_ch
    cq = max(out_ch // 8, 1)   # TODO(synk): CaraNet uses C//8 which is 0 here; clamp to 1.
    red = max(out_ch // reduction, 1)
    keys = iter(jax.random.split(key, 64))
    nk = lambda: next(keys)
    w = lambda shape: 0.2 * jax.random.normal(nk(), shape, jnp.float32)

    def bn(c):
        return dict(gamma=1.0 + 0.1 * jax.random.normal(nk(), (c,), jnp.float32),
                    beta=0.1 * jax.random.normal(nk(), (c,), jnp.float32),
                    mean=0.1 * jax.random.normal(nk(), (c,), jnp.float32),
                    var=1.0 + 0.1 * jnp.abs(jax.random.normal(nk(), (c,), jnp.float32)))

    return dict(
        # SEBasicBlock(in_ch+out_ch -> out_ch); conv weights kept in torch layout
        bn1=bn(c_cat), conv1_w=w((out_ch, c_cat, 3, 3)),
        bn2=bn(out_ch), conv2_w=w((out_ch, out_ch, 3, 3)),
        se_w1=w((red, out_ch)), se_b1=w((red,)),
        se_w2=w((out_ch, red)), se_b2=w((out_ch,)),
        sc_bn=bn(c_cat), sc_w=w((out_ch, c_cat)),
        # ReverseAxialAttention(in_ch, out_ch)
        out_conv_w=w((1, in_ch)), out_conv_b=w((1,)),
        aa_w0=w((out_ch, out_ch)), aa_w1=w((out_ch, out_ch, 3, 3)),
        h_wq=w((cq, out_ch)), h_wk=w((cq, out_ch)), h_wv=w((out_ch, out_ch)),
        h_gamma=jnp.full((1,), 0.1, jnp.float32),  # torch inits 0; nonzero keeps path live
        w_wq=w((cq, out_ch)), w_wk=w((cq, out_ch)), w_wv=w((out_ch, out_ch)),
        w_gamma=jnp.full((1,), 0.1, jnp.float32),
        ra1_w=w((out_ch, out_ch, 3, 3)), ra1_bn=bn(out_ch),
        ra1_prelu=0.25 * jnp.ones((out_ch,), jnp.float32),
        ra2_w=w((out_ch, out_ch, 3, 3)), ra2_bn=bn(out_ch),
        ra2_prelu=0.25 * jnp.ones((out_ch,), jnp.float32),
        ra3_w=w((1, out_ch, 3, 3)), ra3_bn=bn(1),
        ra3_prelu=0.25 * jnp.ones((1,), jnp.float32),
    )


# --------------------------- main -----------------------------------------------

if __name__ == "__main__":
    in_ch, out_ch = 8, 4
    B, sh, sw = 2, 8, 8
    key = jax.random.PRNGKey(0)
    kp, kd, ke = jax.random.split(key, 3)
    params = init_params(kp, in_ch, out_ch)
    x_dec = jax.random.normal(kd, (B, in_ch, sh, sw), jnp.float32)           # decoder feature
    x_enc = jax.random.normal(ke, (B, out_ch, 2 * sh, 2 * sw), jnp.float32)  # encoder skip

    fwd = jax.jit(up_block_forward)
    out, ra_out = fwd(params, x_dec, x_enc)
    out = jax.block_until_ready(out)
    ra_out = jax.block_until_ready(ra_out)

    assert out.shape == (B, out_ch, 2 * sh, 2 * sw), out.shape
    assert ra_out.shape == (B, 1, 2 * sh, 2 * sw), ra_out.shape
    assert bool(jnp.all(jnp.isfinite(out))) and bool(jnp.all(jnp.isfinite(ra_out)))
    print("KERNEL_OK")
</pallas_src>

<mosaic_0001>
module attributes {stable_mosaic.version = 11 : i64} {
  func.func @_up_block_kernel(%arg0: i32, %arg1: memref<1x8x256xf32, #tpu.memory_space<vmem>>, %arg2: memref<1x8x64xf32, #tpu.memory_space<vmem>>, %arg3: memref<72x256xf32, #tpu.memory_space<vmem>>, %arg4: memref<16x16xf32, #tpu.memory_space<vmem>>, %arg5: memref<8x144xbf16, #tpu.memory_space<vmem>>, %arg6: memref<5x8x72xbf16, #tpu.memory_space<vmem>>, %arg7: memref<40x16xbf16, #tpu.memory_space<vmem>>, %arg8: memref<2x384x128xbf16, #tpu.memory_space<vmem>>, %arg9: memref<1x4x256xf32, #tpu.memory_space<vmem>>, %arg10: memref<1x1x256xf32, #tpu.memory_space<vmem>>) attributes {dimension_semantics = [#tpu.dimension_semantics<parallel>], iteration_bounds = array<i64: 2>, scalar_prefetch = 0 : i64, scratch_operands = 0 : i64, tpu.core_type = #tpu.core_type<tc>, window_params = [{transform_indices = @transform_0, window_bounds = array<i64: 1, 8, 256>}, {transform_indices = @transform_1, window_bounds = array<i64: 1, 8, 64>}, {pipeline_mode = #tpu.pipeline_mode<synchronous>, transform_indices = @transform_2, window_bounds = array<i64: 72, 256>}, {pipeline_mode = #tpu.pipeline_mode<synchronous>, transform_indices = @transform_3, window_bounds = array<i64: 16, 16>}, {pipeline_mode = #tpu.pipeline_mode<synchronous>, transform_indices = @transform_4, window_bounds = array<i64: 8, 144>}, {pipeline_mode = #tpu.pipeline_mode<synchronous>, transform_indices = @transform_5, window_bounds = array<i64: 5, 8, 72>}, {pipeline_mode = #tpu.pipeline_mode<synchronous>, transform_indices = @transform_6, window_bounds = array<i64: 40, 16>}, {pipeline_mode = #tpu.pipeline_mode<synchronous>, transform_indices = @transform_7, window_bounds = array<i64: 2, 384, 128>}, {transform_indices = @transform_8, window_bounds = array<i64: 1, 4, 256>}, {transform_indices = @transform_9, window_bounds = array<i64: 1, 1, 256>}]} {
    %c0 = arith.constant 0 : index
    %c0_0 = arith.constant 0 : index
    %0 = vector.load %arg3[%c0, %c0_0] : memref<72x256xf32, #tpu.memory_space<vmem>>, vector<4x256xf32>
    %c8 = arith.constant 8 : index
    %c0_1 = arith.constant 0 : index
    %1 = vector.load %arg3[%c8, %c0_1] : memref<72x256xf32, #tpu.memory_space<vmem>>, vector<64x256xf32>
    %c0_2 = arith.constant 0 : index
    %c0_3 = arith.constant 0 : index
    %2 = vector.load %arg4[%c0_2, %c0_3] : memref<16x16xf32, #tpu.memory_space<vmem>>, vector<16x16xf32>
    %c0_4 = arith.constant 0 : index
    %c0_5 = arith.constant 0 : index
    %3 = vector.load %arg7[%c0_4, %c0_5] : memref<40x16xbf16, #tpu.memory_space<vmem>>, vector<40x16xbf16>
    %c0_6 = arith.constant 0 : index
    %c0_7 = arith.constant 0 : index
    %c0_8 = arith.constant 0 : index
    %4 = vector.load %arg2[%c0_6, %c0_7, %c0_8] : memref<1x8x64xf32, #tpu.memory_space<vmem>>, vector<1x8x64xf32>
    %5 = vector.shape_cast %4 : vector<1x8x64xf32> to vector<8x64xf32>
    %cst = arith.constant dense<0.000000e+00> : vector<8x256xf32>
    %6 = tpu.matmul %5, %1, %cst {dimension_numbers = #tpu.dot_dimension_numbers<[1], [0], [0], [1], [0, 0, 1, 1], [], []>} : vector<8x64xf32>, vector<64x256xf32>, vector<8x256xf32> -> vector<8x256xf32>
    %c0_9 = arith.constant 0 : index
    %c0_10 = arith.constant 0 : index
    %c0_11 = arith.constant 0 : index
    %7 = vector.load %arg1[%c0_9, %c0_10, %c0_11] : memref<1x8x256xf32, #tpu.memory_space<vmem>>, vector<1x8x256xf32>
    %8 = vector.shape_cast %7 : vector<1x8x256xf32> to vector<8x256xf32>
    %9 = tpu.concatenate %8, %6 in 0 : vector<8x256xf32>, vector<8x256xf32> -> vector<16x256xf32>
    %10 = vector.extract_strided_slice %2 {offsets = [0, 0], sizes = [16, 1], strides = [1, 1]} : vector<16x16xf32> to vector<16x1xf32>
    %11 = vector.broadcast %10 : vector<16x1xf32> to vector<16x256xf32>
    %12 = arith.mulf %9, %11 : vector<16x256xf32>
    %13 = vector.extract_strided_slice %2 {offsets = [0, 1], sizes = [16, 1], strides = [1, 1]} : vector<16x16xf32> to vector<16x1xf32>
    %14 = vector.broadcast %13 : vector<16x1xf32> to vector<16x256xf32>
    %15 = arith.addf %12, %14 : vector<16x256xf32>
    %cst_12 = arith.constant 0.000000e+00 : f32
    %16 = vector.broadcast %cst_12 : f32 to vector<16x256xf32>
    %17 = arith.maximumf %15, %16 : vector<16x256xf32>
    %c0_13 = arith.constant 0 : index
    %c0_14 = arith.constant 0 : index
    %18 = vector.load %arg5[%c0_13, %c0_14] : memref<8x144xbf16, #tpu.memory_space<vmem>>, vector<8x144xbf16>
    %c16_i32 = arith.constant 16 : i32
    %19 = tpu.dynamic_rotate %17 by %c16_i32 dim 1 : vector<16x256xf32>, i32 -> vector<16x256xf32>
    %20 = vector.extract_strided_slice %0 {offsets = [0, 0], sizes = [1, 256], strides = [1, 1]} : vector<4x256xf32> to vector<1x256xf32>
    %21 = vector.broadcast %20 : vector<1x256xf32> to vector<16x256xf32>
    %22 = arith.mulf %19, %21 : vector<16x256xf32>
    %c240_i32 = arith.constant 240 : i32
    %23 = tpu.dynamic_rotate %17 by %c240_i32 dim 1 : vector<16x256xf32>, i32 -> vector<16x256xf32>
    %24 = vector.extract_strided_slice %0 {offsets = [1, 0], sizes = [1, 256], strides = [1, 1]} : vector<4x256xf32> to vector<1x256xf32>
    %25 = vector.broadcast %24 : vector<1x256xf32> to vector<16x256xf32>
    %26 = arith.mulf %23, %25 : vector<16x256xf32>
    %27 = tpu.concatenate %22, %17, %26 in 0 : vector<16x256xf32>, vector<16x256xf32>, vector<16x256xf32> -> vector<48x256xf32>
    %c1_i32 = arith.constant 1 : i32
    %28 = tpu.dynamic_rotate %27 by %c1_i32 dim 1 : vector<48x256xf32>, i32 -> vector<48x256xf32>
    %29 = vector.extract_strided_slice %0 {offsets = [2, 0], sizes = [1, 256], strides = [1, 1]} : vector<4x256xf32> to vector<1x256xf32>
    %30 = vector.broadcast %29 : vector<1x256xf32> to vector<48x256xf32>
    %31 = arith.mulf %28, %30 : vector<48x256xf32>
    %c255_i32 = arith.constant 255 : i32
    %32 = tpu.dynamic_rotate %27 by %c255_i32 dim 1 : vector<48x256xf32>, i32 -> vector<48x256xf32>
    %33 = vector.extract_strided_slice %0 {offsets = [3, 0], sizes = [1, 256], strides = [1, 1]} : vector<4x256xf32> to vector<1x256xf32>
    %34 = vector.broadcast %33 : vector<1x256xf32> to vector<48x256xf32>
    %35 = arith.mulf %32, %34 : vector<48x256xf32>
    %36 = tpu.concatenate %31, %27, %35 in 0 : vector<48x256xf32>, vector<48x256xf32>, vector<48x256xf32> -> vector<144x256xf32>
    %37 = arith.truncf %36 : vector<144x256xf32> to vector<144x256xbf16>
    %cst_15 = arith.constant dense<0.000000e+00> : vector<8x256xf32>
    %38 = tpu.matmul %18, %37, %cst_15 {dimension_numbers = #tpu.dot_dimension_numbers<[1], [0], [0], [1], [0, 0, 1, 1], [], []>} : vector<8x144xbf16>, vector<144x256xbf16>, vector<8x256xf32> -> vector<8x256xf32>
    %39 = vector.extract_strided_slice %2 {offsets = [0, 4], sizes = [8, 1], strides = [1, 1]} : vector<16x16xf32> to vector<8x1xf32>
    %40 = vector.broadcast %39 : vector<8x1xf32> to vector<8x256xf32>
    %41 = arith.addf %38, %40 : vector<8x256xf32>
    %cst_16 = arith.constant 0.000000e+00 : f32
    %42 = vector.broadcast %cst_16 : f32 to vector<8x256xf32>
    %43 = arith.maximumf %41, %42 : vector<8x256xf32>
    %c0_17 = arith.constant 0 : index
    %c0_18 = arith.constant 0 : index
    %c0_19 = arith.constant 0 : index
    %44 = vector.load %arg6[%c0_17, %c0_18, %c0_19] : memref<5x8x72xbf16, #tpu.memory_space<vmem>>, vector<1x8x72xbf16>
    %45 = vector.shape_cast %44 : vector<1x8x72xbf16> to vector<8x72xbf16>
    %c16_i32_20 = arith.constant 16 : i32
    %46 = tpu.dynamic_rotate %43 by %c16_i32_20 dim 1 : vector<8x256xf32>, i32 -> vector<8x256xf32>
    %47 = vector.extract_strided_slice %0 {offsets = [0, 0], sizes = [1, 256], strides = [1, 1]} : vector<4x256xf32> to vector<1x256xf32>
    %48 = vector.broadcast %47 : vector<1x256xf32> to vector<8x256xf32>
    %49 = arith.mulf %46, %48 : vector<8x256xf32>
    %c240_i32_21 = arith.constant 240 : i32
    %50 = tpu.dynamic_rotate %43 by %c240_i32_21 dim 1 : vector<8x256xf32>, i32 -> vector<8x256xf32>
    %51 = vector.extract_strided_slice %0 {offsets = [1, 0], sizes = [1, 256], strides = [1, 1]} : vector<4x256xf32> to vector<1x256xf32>
    %52 = vector.broadcast %51 : vector<1x256xf32> to vector<8x256xf32>
    %53 = arith.mulf %50, %52 : vector<8x256xf32>
    %54 = tpu.concatenate %49, %43, %53 in 0 : vector<8x256xf32>, vector<8x256xf32>, vector<8x256xf32> -> vector<24x256xf32>
    %c1_i32_22 = arith.constant 1 : i32
    %55 = tpu.dynamic_rotate %54 by %c1_i32_22 dim 1 : vector<24x256xf32>, i32 -> vector<24x256xf32>
    %56 = vector.extract_strided_slice %0 {offsets = [2, 0], sizes = [1, 256], strides = [1, 1]} : vector<4x256xf32> to vector<1x256xf32>
    %57 = vector.broadcast %56 : vector<1x256xf32> to vector<24x256xf32>
    %58 = arith.mulf %55, %57 : vector<24x256xf32>
    %c255_i32_23 = arith.constant 255 : i32
    %59 = tpu.dynamic_rotate %54 by %c255_i32_23 dim 1 : vector<24x256xf32>, i32 -> vector<24x256xf32>
    %60 = vector.extract_strided_slice %0 {offsets = [3, 0], sizes = [1, 256], strides = [1, 1]} : vector<4x256xf32> to vector<1x256xf32>
    %61 = vector.broadcast %60 : vector<1x256xf32> to vector<24x256xf32>
    %62 = arith.mulf %59, %61 : vector<24x256xf32>
    %63 = tpu.concatenate %58, %54, %62 in 0 : vector<24x256xf32>, vector<24x256xf32>, vector<24x256xf32> -> vector<72x256xf32>
    %64 = arith.truncf %63 : vector<72x256xf32> to vector<72x256xbf16>
    %cst_24 = arith.constant dense<0.000000e+00> : vector<8x256xf32>
    %65 = tpu.matmul %45, %64, %cst_24 {dimension_numbers = #tpu.dot_dimension_numbers<[1], [0], [0], [1], [0, 0, 1, 1], [], []>} : vector<8x72xbf16>, vector<72x256xbf16>, vector<8x256xf32> -> vector<8x256xf32>
    %cst_25 = arith.constant dense<0.000000e+00> : vector<8xf32>
    %66 = vector.multi_reduction <add>, %65, %cst_25 [1] : vector<8x256xf32> to vector<8xf32>
    %67 = vector.shape_cast %66 : vector<8xf32> to vector<8x1xf32>
    %cst_26 = arith.constant 2.560000e+02 : f32
    %68 = vector.broadcast %cst_26 : f32 to vector<8x1xf32>
    %69 = arith.divf %67, %68 : vector<8x1xf32>
    %70 = arith.truncf %69 : vector<8x1xf32> to vector<8x1xbf16>
    %71 = vector.extract_strided_slice %3 {offsets = [8, 0], sizes = [8, 8], strides = [1, 1]} : vector<40x16xbf16> to vector<8x8xbf16>
    %cst_27 = arith.constant dense<0.000000e+00> : vector<8x1xf32>
    %72 = tpu.matmul %71, %70, %cst_27 {dimension_numbers = #tpu.dot_dimension_numbers<[1], [0], [0], [1], [0, 0, 1, 1], [], []>} : vector<8x8xbf16>, vector<8x1xbf16>, vector<8x1xf32> -> vector<8x1xf32>
    %73 = vector.extract_strided_slice %2 {offsets = [0, 5], sizes = [8, 1], strides = [1, 1]} : vector<16x16xf32> to vector<8x1xf32>
    %74 = arith.addf %72, %73 : vector<8x1xf32>
    %cst_28 = arith.constant 0.000000e+00 : f32
    %75 = vector.broadcast %cst_28 : f32 to vector<8x1xf32>
    %76 = arith.maximumf %74, %75 : vector<8x1xf32>
    %77 = vector.extract_strided_slice %3 {offsets = [16, 0], sizes = [8, 8], strides = [1, 1]} : vector<40x16xbf16> to vector<8x8xbf16>
    %78 = arith.truncf %76 : vector<8x1xf32> to vector<8x1xbf16>
    %cst_29 = arith.constant dense<0.000000e+00> : vector<8x1xf32>
    %79 = tpu.matmul %77, %78, %cst_29 {dimension_numbers = #tpu.dot_dimension_numbers<[1], [0], [0], [1], [0, 0, 1, 1], [], []>} : vector<8x8xbf16>, vector<8x1xbf16>, vector<8x1xf32> -> vector<8x1xf32>
    %80 = vector.extract_strided_slice %2 {offsets = [0, 6], sizes = [8, 1], strides = [1, 1]} : vector<16x16xf32> to vector<8x1xf32>
    %81 = arith.addf %79, %80 : vector<8x1xf32>
    %82 = arith.negf %81 : vector<8x1xf32>
    %83 = math.exp %82 : vector<8x1xf32>
    %cst_30 = arith.constant 1.000000e+00 : f32
    %84 = vector.broadcast %cst_30 : f32 to vector<8x1xf32>
    %85 = arith.addf %84, %83 : vector<8x1xf32>
    %86 = arith.divf %84, %85 : vector<8x1xf32>
    %87 = vector.broadcast %86 : vector<8x1xf32> to vector<8x256xf32>
    %88 = arith.mulf %65, %87 : vector<8x256xf32>
    %89 = vector.extract_strided_slice %2 {offsets = [0, 2], sizes = [16, 1], strides = [1, 1]} : vector<16x16xf32> to vector<16x1xf32>
    %90 = vector.broadcast %89 : vector<16x1xf32> to vector<16x256xf32>
    %91 = arith.mulf %9, %90 : vector<16x256xf32>
    %92 = vector.extract_strided_slice %2 {offsets = [0, 3], sizes = [16, 1], strides = [1, 1]} : vector<16x16xf32> to vector<16x1xf32>
    %93 = vector.broadcast %92 : vector<16x1xf32> to vector<16x256xf32>
    %94 = arith.addf %91, %93 : vector<16x256xf32>
    %cst_31 = arith.constant 0.000000e+00 : f32
    %95 = vector.broadcast %cst_31 : f32 to vector<16x256xf32>
    %96 = arith.maximumf %94, %95 : vector<16x256xf32>
    %97 = vector.extract_strided_slice %3 {offsets = [0, 0], sizes = [8, 16], strides = [1, 1]} : vector<40x16xbf16> to vector<8x16xbf16>
    %98 = arith.truncf %96 : vector<16x256xf32> to vector<16x256xbf16>
    %cst_32 = arith.constant dense<0.000000e+00> : vector<8x256xf32>
    %99 = tpu.matmul %97, %98, %cst_32 {dimension_numbers = #tpu.dot_dimension_numbers<[1], [0], [0], [1], [0, 0, 1, 1], [], []>} : vector<8x16xbf16>, vector<16x256xbf16>, vector<8x256xf32> -> vector<8x256xf32>
    %100 = arith.addf %88, %99 : vector<8x256xf32>
    %101 = vector.extract_strided_slice %100 {offsets = [0, 0], sizes = [4, 256], strides = [1, 1]} : vector<8x256xf32> to vector<4x256xf32>
    %c0_33 = arith.constant 0 : index
    %c0_34 = arith.constant 0 : index
    %c0_35 = arith.constant 0 : index
    %102 = vector.load %arg9[%c0_33, %c0_34, %c0_35] : memref<1x4x256xf32, #tpu.memory_space<vmem>>, vector<1x4x256xf32>
    %103 = vector.shape_cast %102 : vector<1x4x256xf32> to vector<4x256xf32>
    %104 = vector.shape_cast %101 : vector<4x256xf32> to vector<1x4x256xf32>
    tpu.vector_store %arg9[%c0_33, %c0_34, %c0_35], %104 {strides = array<i32>} : memref<1x4x256xf32, #tpu.memory_space<vmem>>, vector<1x4x256xf32>,
    %105 = vector.extract_strided_slice %3 {offsets = [32, 0], sizes = [8, 8], strides = [1, 1]} : vector<40x16xbf16> to vector<8x8xbf16>
    %106 = arith.truncf %6 : vector<8x256xf32> to vector<8x256xbf16>
    %cst_36 = arith.constant dense<0.000000e+00> : vector<8x256xf32>
    %107 = tpu.matmul %105, %106, %cst_36 {dimension_numbers = #tpu.dot_dimension_numbers<[1], [0], [0], [1], [0, 0, 1, 1], [], []>} : vector<8x8xbf16>, vector<8x256xbf16>, vector<8x256xf32> -> vector<8x256xf32>
    %108 = vector.extract_strided_slice %107 {offsets = [0, 0], sizes = [1, 256], strides = [1, 1]} : vector<8x256xf32> to vector<1x256xf32>
    %109 = vector.extract_strided_slice %2 {offsets = [0, 13], sizes = [1, 1], strides = [1, 1]} : vector<16x16xf32> to vector<1x1xf32>
    %110 = vector.broadcast %109 : vector<1x1xf32> to vector<1x256xf32>
    %111 = arith.addf %108, %110 : vector<1x256xf32>
    %cst_37 = arith.constant 0.000000e+00 : f32
    %112 = vector.broadcast %cst_37 : f32 to vector<1x256xf32>
    %113 = arith.subf %112, %111 : vector<1x256xf32>
    %114 = arith.negf %113 : vector<1x256xf32>
    %115 = math.exp %114 : vector<1x256xf32>
    %cst_38 = arith.constant 1.000000e+00 : f32
    %116 = vector.broadcast %cst_38 : f32 to vector<1x256xf32>
    %117 = arith.addf %116, %115 : vector<1x256xf32>
    %118 = arith.divf %116, %117 : vector<1x256xf32>
    %119 = vector.extract_strided_slice %3 {offsets = [24, 0], sizes = [8, 8], strides = [1, 1]} : vector<40x16xbf16> to vector<8x8xbf16>
    %120 = arith.truncf %8 : vector<8x256xf32> to vector<8x256xbf16>
    %cst_39 = arith.constant dense<0.000000e+00> : vector<8x256xf32>
    %121 = tpu.matmul %119, %120, %cst_39 {dimension_numbers = #tpu.dot_dimension_numbers<[1], [0], [0], [1], [0, 0, 1, 1], [], []>} : vector<8x8xbf16>, vector<8x256xbf16>, vector<8x256xf32> -> vector<8x256xf32>
    %c1 = arith.constant 1 : index
    %c0_40 = arith.constant 0 : index
    %c0_41 = arith.constant 0 : index
    %122 = vector.load %arg6[%c1, %c0_40, %c0_41] : memref<5x8x72xbf16, #tpu.memory_space<vmem>>, vector<1x8x72xbf16>
    %123 = vector.shape_cast %122 : vector<1x8x72xbf16> to vector<8x72xbf16>
    %c16_i32_42 = arith.constant 16 : i32
    %124 = tpu.dynamic_rotate %121 by %c16_i32_42 dim 1 : vector<8x256xf32>, i32 -> vector<8x256xf32>
    %125 = vector.extract_strided_slice %0 {offsets = [0, 0], sizes = [1, 256], strides = [1, 1]} : vector<4x256xf32> to vector<1x256xf32>
    %126 = vector.broadcast %125 : vector<1x256xf32> to vector<8x256xf32>
    %127 = arith.mulf %124, %126 : vector<8x256xf32>
    %c240_i32_43 = arith.constant 240 : i32
    %128 = tpu.dynamic_rotate %121 by %c240_i32_43 dim 1 : vector<8x256xf32>, i32 -> vector<8x256xf32>
    %129 = vector.extract_strided_slice %0 {offsets = [1, 0], sizes = [1, 256], strides = [1, 1]} : vector<4x256xf32> to vector<1x256xf32>
    %130 = vector.broadcast %129 : vector<1x256xf32> to vector<8x256xf32>
    %131 = arith.mulf %128, %130 : vector<8x256xf32>
    %132 = tpu.concatenate %127, %121, %131 in 0 : vector<8x256xf32>, vector<8x256xf32>, vector<8x256xf32> -> vector<24x256xf32>
    %c1_i32_44 = arith.constant 1 : i32
    %133 = tpu.dynamic_rotate %132 by %c1_i32_44 dim 1 : vector<24x256xf32>, i32 -> vector<24x256xf32>
    %134 = vector.extract_strided_slice %0 {offsets = [2, 0], sizes = [1, 256], strides = [1, 1]} : vector<4x256xf32> to vector<1x256xf32>
    %135 = vector.broadcast %134 : vector<1x256xf32> to vector<24x256xf32>
    %136 = arith.mulf %133, %135 : vector<24x256xf32>
    %c255_i32_45 = arith.constant 255 : i32
    %137 = tpu.dynamic_rotate %132 by %c255_i32_45 dim 1 : vector<24x256xf32>, i32 -> vector<24x256xf32>
    %138 = vector.extract_strided_slice %0 {offsets = [3, 0], sizes = [1, 256], strides = [1, 1]} : vector<4x256xf32> to vector<1x256xf32>
    %139 = vector.broadcast %138 : vector<1x256xf32> to vector<24x256xf32>
    %140 = arith.mulf %137, %139 : vector<24x256xf32>
    %141 = tpu.concatenate %136, %132, %140 in 0 : vector<24x256xf32>, vector<24x256xf32>, vector<24x256xf32> -> vector<72x256xf32>
    %142 = arith.truncf %141 : vector<72x256xf32> to vector<72x256xbf16>
    %cst_46 = arith.constant dense<0.000000e+00> : vector<8x256xf32>
    %143 = tpu.matmul %123, %142, %cst_46 {dimension_numbers = #tpu.dot_dimension_numbers<[1], [0], [0], [1], [0, 0, 1, 1], [], []>} : vector<8x72xbf16>, vector<72x256xbf16>, vector<8x256xf32> -> vector<8x256xf32>
    %144 = vector.extract_strided_slice %143 {offsets = [0, 0], sizes = [8, 16], strides = [1, 1]} : vector<8x256xf32> to vector<8x16xf32>
    %145 = vector.extract_strided_slice %143 {offsets = [0, 16], sizes = [8, 16], strides = [1, 1]} : vector<8x256xf32> to vector<8x16xf32>
    %146 = vector.extract_strided_slice %143 {offsets = [0, 32], sizes = [8, 16], strides = [1, 1]} : vector<8x256xf32> to vector<8x16xf32>
    %147 = vector.extract_strided_slice %143 {offsets = [0, 48], sizes = [8, 16], strides = [1, 1]} : vector<8x256xf32> to vector<8x16xf32>
    %148 = vector.extract_strided_slice %143 {offsets = [0, 64], sizes = [8, 16], strides = [1, 1]} : vector<8x256xf32> to vector<8x16xf32>
    %149 = vector.extract_strided_slice %143 {offsets = [0, 80], sizes = [8, 16], strides = [1, 1]} : vector<8x256xf32> to vector<8x16xf32>
    %150 = vector.extract_strided_slice %143 {offsets = [0, 96], sizes = [8, 16], strides = [1, 1]} : vector<8x256xf32> to vector<8x16xf32>
    %151 = vector.extract_strided_slice %143 {offsets = [0, 112], sizes = [8, 16], strides = [1, 1]} : vector<8x256xf32> to vector<8x16xf32>
    %152 = vector.extract_strided_slice %143 {offsets = [0, 128], sizes = [8, 16], strides = [1, 1]} : vector<8x256xf32> to vector<8x16xf32>
    %153 = vector.extract_strided_slice %143 {offsets = [0, 144], sizes = [8, 16], strides = [1, 1]} : vector<8x256xf32> to vector<8x16xf32>
    %154 = vector.extract_strided_slice %143 {offsets = [0, 160], sizes = [8, 16], strides = [1, 1]} : vector<8x256xf32> to vector<8x16xf32>
    %155 = vector.extract_strided_slice %143 {offsets = [0, 176], sizes = [8, 16], strides = [1, 1]} : vector<8x256xf32> to vector<8x16xf32>
    %156 = vector.extract_strided_slice %143 {offsets = [0, 192], sizes = [8, 16], strides = [1, 1]} : vector<8x256xf32> to vector<8x16xf32>
    %157 = vector.extract_strided_slice %143 {offsets = [0, 208], sizes = [8, 16], strides = [1, 1]} : vector<8x256xf32> to vector<8x16xf32>
    %158 = vector.extract_strided_slice %143 {offsets = [0, 224], sizes = [8, 16], strides = [1, 1]} : vector<8x256xf32> to vector<8x16xf32>
    %159 = vector.extract_strided_slice %143 {offsets = [0, 240], sizes = [8, 16], strides = [1, 1]} : vector<8x256xf32> to vector<8x16xf32>
    %160 = tpu.concatenate %144, %145, %146, %147, %148, %149, %150, %151, %152, %153, %154, %155, %156, %157, %158, %159 in 0 : vector<8x16xf32>, vector<8x16xf32>, vector<8x16xf32>, vector<8x16xf32>, vector<8x16xf32>, vector<8x16xf32>, vector<8x16xf32>, vector<8x16xf32>, vector<8x16xf32>, vector<8x16xf32>, vector<8x16xf32>, vector<8x16xf32>, vector<8x16xf32>, vector<8x16xf32>, vector<8x16xf32>, vector<8x16xf32> -> vector<128x16xf32>
    %c0_47 = arith.constant 0 : index
    %c0_48 = arith.constant 0 : index
    %c0_49 = arith.constant 0 : index
    %161 = vector.load %arg8[%c0_47, %c0_48, %c0_49] : memref<2x384x128xbf16, #tpu.memory_space<vmem>>, vector<1x384x128xbf16>
    %162 = vector.shape_cast %161 : vector<1x384x128xbf16> to vector<384x128xbf16>
    %163 = vector.extract_strided_slice %2 {offsets = [0, 14], sizes = [1, 1], strides = [1, 1]} : vector<16x16xf32> to vector<1x1xf32>
    %164 = arith.truncf %160 : vector<128x16xf32> to vector<128x16xbf16>
    %cst_50 = arith.constant dense<0.000000e+00> : vector<384x16xf32>
    %165 = tpu.matmul %162, %164, %cst_50 {dimension_numbers = #tpu.dot_dimension_numbers<[1], [0], [0], [1], [0, 0, 1, 1], [], []>} : vector<384x128xbf16>, vector<128x16xbf16>, vector<384x16xf32> -> vector<384x16xf32>
    %166 = vector.extract_strided_slice %165 {offsets = [0, 0], sizes = [128, 16], strides = [1, 1]} : vector<384x16xf32> to vector<128x16xf32>
    %167 = vector.extract_strided_slice %165 {offsets = [128, 0], sizes = [128, 16], strides = [1, 1]} : vector<384x16xf32> to vector<128x16xf32>
    %168 = vector.extract_strided_slice %165 {offsets = [256, 0], sizes = [128, 16], strides = [1, 1]} : vector<384x16xf32> to vector<128x16xf32>
    %cst_51 = arith.constant dense<0.000000e+00> : vector<16x16xf32>
    %169 = tpu.matmul %166, %167, %cst_51 {dimension_numbers = #tpu.dot_dimension_numbers<[0], [0], [1], [1], [0, 1, 1, 1], [], []>} : vector<128x16xf32>, vector<128x16xf32>, vector<16x16xf32> -> vector<16x16xf32>
    %cst_52 = arith.constant dense<0xFF800000> : vector<16xf32>
    %170 = vector.multi_reduction <maximumf>, %169, %cst_52 [1] : vector<16x16xf32> to vector<16xf32>
    %171 = vector.shape_cast %170 : vector<16xf32> to vector<16x1xf32>
    %172 = vector.broadcast %171 : vector<16x1xf32> to vector<16x16xf32>
    %173 = arith.subf %169, %172 : vector<16x16xf32>
    %174 = math.exp %173 : vector<16x16xf32>
    %cst_53 = arith.constant dense<0.000000e+00> : vector<16xf32>
    %175 = vector.multi_reduction <add>, %174, %cst_53 [1] : vector<16x16xf32> to vector<16xf32>
    %176 = vector.shape_cast %175 : vector<16xf32> to vector<16x1xf32>
    %177 = vector.broadcast %176 : vector<16x1xf32> to vector<16x16xf32>
    %178 = arith.divf %174, %177 : vector<16x16xf32>
    %cst_54 = arith.constant dense<0.000000e+00> : vector<128x16xf32>
    %179 = tpu.matmul %168, %178, %cst_54 {dimension_numbers = #tpu.dot_dimension_numbers<[1], [1], [0], [0], [0, 0, 1, 0], [], []>} : vector<128x16xf32>, vector<16x16xf32>, vector<128x16xf32> -> vector<128x16xf32>
    %180 = vector.broadcast %163 : vector<1x1xf32> to vector<128x16xf32>
    %181 = arith.mulf %180, %179 : vector<128x16xf32>
    %182 = arith.addf %181, %160 : vector<128x16xf32>
    %c1_55 = arith.constant 1 : index
    %c0_56 = arith.constant 0 : index
    %c0_57 = arith.constant 0 : index
    %183 = vector.load %arg8[%c1_55, %c0_56, %c0_57] : memref<2x384x128xbf16, #tpu.memory_space<vmem>>, vector<1x384x128xbf16>
    %184 = vector.shape_cast %183 : vector<1x384x128xbf16> to vector<384x128xbf16>
    %185 = vector.extract_strided_slice %2 {offsets = [0, 15], sizes = [1, 1], strides = [1, 1]} : vector<16x16xf32> to vector<1x1xf32>
    %186 = arith.truncf %182 : vector<128x16xf32> to vector<128x16xbf16>
    %cst_58 = arith.constant dense<0.000000e+00> : vector<384x16xf32>
    %187 = tpu.matmul %184, %186, %cst_58 {dimension_numbers = #tpu.dot_dimension_numbers<[1], [0], [0], [1], [0, 0, 1, 1], [], []>} : vector<384x128xbf16>, vector<128x16xbf16>, vector<384x16xf32> -> vector<384x16xf32>
    %188 = vector.extract_strided_slice %187 {offsets = [0, 0], sizes = [128, 16], strides = [1, 1]} : vector<384x16xf32> to vector<128x16xf32>
    %189 = vector.extract_strided_slice %187 {offsets = [128, 0], sizes = [128, 16], strides = [1, 1]} : vector<384x16xf32> to vector<128x16xf32>
    %190 = vector.extract_strided_slice %187 {offsets = [256, 0], sizes = [128, 16], strides = [1, 1]} : vector<384x16xf32> to vector<128x16xf32>
    %cst_59 = arith.constant dense<0.000000e+00> : vector<16x16xf32>
    %191 = tpu.matmul %188, %189, %cst_59 {dimension_numbers = #tpu.dot_dimension_numbers<[0], [0], [1], [1], [0, 1, 1, 1], [], []>} : vector<128x16xf32>, vector<128x16xf32>, vector<16x16xf32> -> vector<16x16xf32>
    %cst_60 = arith.constant dense<0xFF800000> : vector<16xf32>
    %192 = vector.multi_reduction <maximumf>, %191, %cst_60 [1] : vector<16x16xf32> to vector<16xf32>
    %193 = vector.shape_cast %192 : vector<16xf32> to vector<16x1xf32>
    %194 = vector.broadcast %193 : vector<16x1xf32> to vector<16x16xf32>
    %195 = arith.subf %191, %194 : vector<16x16xf32>
    %196 = math.exp %195 : vector<16x16xf32>
    %cst_61 = arith.constant dense<0.000000e+00> : vector<16xf32>
    %197 = vector.multi_reduction <add>, %196, %cst_61 [1] : vector<16x16xf32> to vector<16xf32>
    %198 = vector.shape_cast %197 : vector<16xf32> to vector<16x1xf32>
    %199 = vector.broadcast %198 : vector<16x1xf32> to vector<16x16xf32>
    %200 = arith.divf %196, %199 : vector<16x16xf32>
    %cst_62 = arith.constant dense<0.000000e+00> : vector<128x16xf32>
    %201 = tpu.matmul %190, %200, %cst_62 {dimension_numbers = #tpu.dot_dimension_numbers<[1], [1], [0], [0], [0, 0, 1, 0], [], []>} : vector<128x16xf32>, vector<16x16xf32>, vector<128x16xf32> -> vector<128x16xf32>
    %202 = vector.broadcast %185 : vector<1x1xf32> to vector<128x16xf32>
    %203 = arith.mulf %202, %201 : vector<128x16xf32>
    %204 = arith.addf %203, %182 : vector<128x16xf32>
    %205 = vector.extract_strided_slice %204 {offsets = [0, 0], sizes = [8, 16], strides = [1, 1]} : vector<128x16xf32> to vector<8x16xf32>
    %206 = vector.extract_strided_slice %204 {offsets = [8, 0], sizes = [8, 16], strides = [1, 1]} : vector<128x16xf32> to vector<8x16xf32>
    %207 = vector.extract_strided_slice %204 {offsets = [16, 0], sizes = [8, 16], strides = [1, 1]} : vector<128x16xf32> to vector<8x16xf32>
    %208 = vector.extract_strided_slice %204 {offsets = [24, 0], sizes = [8, 16], strides = [1, 1]} : vector<128x16xf32> to vector<8x16xf32>
    %209 = vector.extract_strided_slice %204 {offsets = [32, 0], sizes = [8, 16], strides = [1, 1]} : vector<128x16xf32> to vector<8x16xf32>
    %210 = vector.extract_strided_slice %204 {offsets = [40, 0], sizes = [8, 16], strides = [1, 1]} : vector<128x16xf32> to vector<8x16xf32>
    %211 = vector.extract_strided_slice %204 {offsets = [48, 0], sizes = [8, 16], strides = [1, 1]} : vector<128x16xf32> to vector<8x16xf32>
    %212 = vector.extract_strided_slice %204 {offsets = [56, 0], sizes = [8, 16], strides = [1, 1]} : vector<128x16xf32> to vector<8x16xf32>
    %213 = vector.extract_strided_slice %204 {offsets = [64, 0], sizes = [8, 16], strides = [1, 1]} : vector<128x16xf32> to vector<8x16xf32>
    %214 = vector.extract_strided_slice %204 {offsets = [72, 0], sizes = [8, 16], strides = [1, 1]} : vector<128x16xf32> to vector<8x16xf32>
    %215 = vector.extract_strided_slice %204 {offsets = [80, 0], sizes = [8, 16], strides = [1, 1]} : vector<128x16xf32> to vector<8x16xf32>
    %216 = vector.extract_strided_slice %204 {offsets = [88, 0], sizes = [8, 16], strides = [1, 1]} : vector<128x16xf32> to vector<8x16xf32>
    %217 = vector.extract_strided_slice %204 {offsets = [96, 0], sizes = [8, 16], strides = [1, 1]} : vector<128x16xf32> to vector<8x16xf32>
    %218 = vector.extract_strided_slice %204 {offsets = [104, 0], sizes = [8, 16], strides = [1, 1]} : vector<128x16xf32> to vector<8x16xf32>
    %219 = vector.extract_strided_slice %204 {offsets = [112, 0], sizes = [8, 16], strides = [1, 1]} : vector<128x16xf32> to vector<8x16xf32>
    %220 = vector.extract_strided_slice %204 {offsets = [120, 0], sizes = [8, 16], strides = [1, 1]} : vector<128x16xf32> to vector<8x16xf32>
    %221 = tpu.concatenate %205, %206, %207, %208, %209, %210, %211, %212, %213, %214, %215, %216, %217, %218, %219, %220 in 1 : vector<8x16xf32>, vector<8x16xf32>, vector<8x16xf32>, vector<8x16xf32>, vector<8x16xf32>, vector<8x16xf32>, vector<8x16xf32>, vector<8x16xf32>, vector<8x16xf32>, vector<8x16xf32>, vector<8x16xf32>, vector<8x16xf32>, vector<8x16xf32>, vector<8x16xf32>, vector<8x16xf32>, vector<8x16xf32> -> vector<8x256xf32>
    %222 = vector.broadcast %118 : vector<1x256xf32> to vector<8x256xf32>
    %223 = arith.mulf %222, %221 : vector<8x256xf32>
    %c2 = arith.constant 2 : index
    %c0_63 = arith.constant 0 : index
    %c0_64 = arith.constant 0 : index
    %224 = vector.load %arg6[%c2, %c0_63, %c0_64] : memref<5x8x72xbf16, #tpu.memory_space<vmem>>, vector<1x8x72xbf16>
    %225 = vector.shape_cast %224 : vector<1x8x72xbf16> to vector<8x72xbf16>
    %c16_i32_65 = arith.constant 16 : i32
    %226 = tpu.dynamic_rotate %223 by %c16_i32_65 dim 1 : vector<8x256xf32>, i32 -> vector<8x256xf32>
    %227 = vector.extract_strided_slice %0 {offsets = [0, 0], sizes = [1, 256], strides = [1, 1]} : vector<4x256xf32> to vector<1x256xf32>
    %228 = vector.broadcast %227 : vector<1x256xf32> to vector<8x256xf32>
    %229 = arith.mulf %226, %228 : vector<8x256xf32>
    %c240_i32_66 = arith.constant 240 : i32
    %230 = tpu.dynamic_rotate %223 by %c240_i32_66 dim 1 : vector<8x256xf32>, i32 -> vector<8x256xf32>
    %231 = vector.extract_strided_slice %0 {offsets = [1, 0], sizes = [1, 256], strides = [1, 1]} : vector<4x256xf32> to vector<1x256xf32>
    %232 = vector.broadcast %231 : vector<1x256xf32> to vector<8x256xf32>
    %233 = arith.mulf %230, %232 : vector<8x256xf32>
    %234 = tpu.concatenate %229, %223, %233 in 0 : vector<8x256xf32>, vector<8x256xf32>, vector<8x256xf32> -> vector<24x256xf32>
    %c1_i32_67 = arith.constant 1 : i32
    %235 = tpu.dynamic_rotate %234 by %c1_i32_67 dim 1 : vector<24x256xf32>, i32 -> vector<24x256xf32>
    %236 = vector.extract_strided_slice %0 {offsets = [2, 0], sizes = [1, 256], strides = [1, 1]} : vector<4x256xf32> to vector<1x256xf32>
    %237 = vector.broadcast %236 : vector<1x256xf32> to vector<24x256xf32>
    %238 = arith.mulf %235, %237 : vector<24x256xf32>
    %c255_i32_68 = arith.constant 255 : i32
    %239 = tpu.dynamic_rotate %234 by %c255_i32_68 dim 1 : vector<24x256xf32>, i32 -> vector<24x256xf32>
    %240 = vector.extract_strided_slice %0 {offsets = [3, 0], sizes = [1, 256], strides = [1, 1]} : vector<4x256xf32> to vector<1x256xf32>
    %241 = vector.broadcast %240 : vector<1x256xf32> to vector<24x256xf32>
    %242 = arith.mulf %239, %241 : vector<24x256xf32>
    %243 = tpu.concatenate %238, %234, %242 in 0 : vector<24x256xf32>, vector<24x256xf32>, vector<24x256xf32> -> vector<72x256xf32>
    %244 = arith.truncf %243 : vector<72x256xf32> to vector<72x256xbf16>
    %cst_69 = arith.constant dense<0.000000e+00> : vector<8x256xf32>
    %245 = tpu.matmul %225, %244, %cst_69 {dimension_numbers = #tpu.dot_dimension_numbers<[1], [0], [0], [1], [0, 0, 1, 1], [], []>} : vector<8x72xbf16>, vector<72x256xbf16>, vector<8x256xf32> -> vector<8x256xf32>
    %246 = vector.extract_strided_slice %2 {offsets = [0, 7], sizes = [8, 1], strides = [1, 1]} : vector<16x16xf32> to vector<8x1xf32>
    %247 = vector.broadcast %246 : vector<8x1xf32> to vector<8x256xf32>
    %248 = arith.addf %245, %247 : vector<8x256xf32>
    %cst_70 = arith.constant 0.000000e+00 : f32
    %249 = vector.broadcast %cst_70 : f32 to vector<8x256xf32>
    %250 = arith.cmpf oge, %248, %249 : vector<8x256xf32>
    %251 = vector.extract_strided_slice %2 {offsets = [0, 8], sizes = [8, 1], strides = [1, 1]} : vector<16x16xf32> to vector<8x1xf32>
    %252 = vector.broadcast %251 : vector<8x1xf32> to vector<8x256xf32>
    %253 = arith.mulf %248, %252 : vector<8x256xf32>
    %254 = arith.select %250, %248, %253 : vector<8x256xi1>, vector<8x256xf32>
    %c3 = arith.constant 3 : index
    %c0_71 = arith.constant 0 : index
    %c0_72 = arith.constant 0 : index
    %255 = vector.load %arg6[%c3, %c0_71, %c0_72] : memref<5x8x72xbf16, #tpu.memory_space<vmem>>, vector<1x8x72xbf16>
    %256 = vector.shape_cast %255 : vector<1x8x72xbf16> to vector<8x72xbf16>
    %c16_i32_73 = arith.constant 16 : i32
    %257 = tpu.dynamic_rotate %254 by %c16_i32_73 dim 1 : vector<8x256xf32>, i32 -> vector<8x256xf32>
    %258 = vector.extract_strided_slice %0 {offsets = [0, 0], sizes = [1, 256], strides = [1, 1]} : vector<4x256xf32> to vector<1x256xf32>
    %259 = vector.broadcast %258 : vector<1x256xf32> to vector<8x256xf32>
    %260 = arith.mulf %257, %259 : vector<8x256xf32>
    %c240_i32_74 = arith.constant 240 : i32
    %261 = tpu.dynamic_rotate %254 by %c240_i32_74 dim 1 : vector<8x256xf32>, i32 -> vector<8x256xf32>
    %262 = vector.extract_strided_slice %0 {offsets = [1, 0], sizes = [1, 256], strides = [1, 1]} : vector<4x256xf32> to vector<1x256xf32>
    %263 = vector.broadcast %262 : vector<1x256xf32> to vector<8x256xf32>
    %264 = arith.mulf %261, %263 : vector<8x256xf32>
    %265 = tpu.concatenate %260, %254, %264 in 0 : vector<8x256xf32>, vector<8x256xf32>, vector<8x256xf32> -> vector<24x256xf32>
    %c1_i32_75 = arith.constant 1 : i32
    %266 = tpu.dynamic_rotate %265 by %c1_i32_75 dim 1 : vector<24x256xf32>, i32 -> vector<24x256xf32>
    %267 = vector.extract_strided_slice %0 {offsets = [2, 0], sizes = [1, 256], strides = [1, 1]} : vector<4x256xf32> to vector<1x256xf32>
    %268 = vector.broadcast %267 : vector<1x256xf32> to vector<24x256xf32>
    %269 = arith.mulf %266, %268 : vector<24x256xf32>
    %c255_i32_76 = arith.constant 255 : i32
    %270 = tpu.dynamic_rotate %265 by %c255_i32_76 dim 1 : vector<24x256xf32>, i32 -> vector<24x256xf32>
    %271 = vector.extract_strided_slice %0 {offsets = [3, 0], sizes = [1, 256], strides = [1, 1]} : vector<4x256xf32> to vector<1x256xf32>
    %272 = vector.broadcast %271 : vector<1x256xf32> to vector<24x256xf32>
    %273 = arith.mulf %270, %272 : vector<24x256xf32>
    %274 = tpu.concatenate %269, %265, %273 in 0 : vector<24x256xf32>, vector<24x256xf32>, vector<24x256xf32> -> vector<72x256xf32>
    %275 = arith.truncf %274 : vector<72x256xf32> to vector<72x256xbf16>
    %cst_77 = arith.constant dense<0.000000e+00> : vector<8x256xf32>
    %276 = tpu.matmul %256, %275, %cst_77 {dimension_numbers = #tpu.dot_dimension_numbers<[1], [0], [0], [1], [0, 0, 1, 1], [], []>} : vector<8x72xbf16>, vector<72x256xbf16>, vector<8x256xf32> -> vector<8x256xf32>
    %277 = vector.extract_strided_slice %2 {offsets = [0, 9], sizes = [8, 1], strides = [1, 1]} : vector<16x16xf32> to vector<8x1xf32>
    %278 = vector.broadcast %277 : vector<8x1xf32> to vector<8x256xf32>
    %279 = arith.addf %276, %278 : vector<8x256xf32>
    %cst_78 = arith.constant 0.000000e+00 : f32
    %280 = vector.broadcast %cst_78 : f32 to vector<8x256xf32>
    %281 = arith.cmpf oge, %279, %280 : vector<8x256xf32>
    %282 = vector.extract_strided_slice %2 {offsets = [0, 10], sizes = [8, 1], strides = [1, 1]} : vector<16x16xf32> to vector<8x1xf32>
    %283 = vector.broadcast %282 : vector<8x1xf32> to vector<8x256xf32>
    %284 = arith.mulf %279, %283 : vector<8x256xf32>
    %285 = arith.select %281, %279, %284 : vector<8x256xi1>, vector<8x256xf32>
    %c4 = arith.constant 4 : index
    %c0_79 = arith.constant 0 : index
    %c0_80 = arith.constant 0 : index
    %286 = vector.load %arg6[%c4, %c0_79, %c0_80] : memref<5x8x72xbf16, #tpu.memory_space<vmem>>, vector<1x8x72xbf16>
    %287 = vector.shape_cast %286 : vector<1x8x72xbf16> to vector<8x72xbf16>
    %c16_i32_81 = arith.constant 16 : i32
    %288 = tpu.dynamic_rotate %285 by %c16_i32_81 dim 1 : vector<8x256xf32>, i32 -> vector<8x256xf32>
    %289 = vector.extract_strided_slice %0 {offsets = [0, 0], sizes = [1, 256], strides = [1, 1]} : vector<4x256xf32> to vector<1x256xf32>
    %290 = vector.broadcast %289 : vector<1x256xf32> to vector<8x256xf32>
    %291 = arith.mulf %288, %290 : vector<8x256xf32>
    %c240_i32_82 = arith.constant 240 : i32
    %292 = tpu.dynamic_rotate %285 by %c240_i32_82 dim 1 : vector<8x256xf32>, i32 -> vector<8x256xf32>
    %293 = vector.extract_strided_slice %0 {offsets = [1, 0], sizes = [1, 256], strides = [1, 1]} : vector<4x256xf32> to vector<1x256xf32>
    %294 = vector.broadcast %293 : vector<1x256xf32> to vector<8x256xf32>
    %295 = arith.mulf %292, %294 : vector<8x256xf32>
    %296 = tpu.concatenate %291, %285, %295 in 0 : vector<8x256xf32>, vector<8x256xf32>, vector<8x256xf32> -> vector<24x256xf32>
    %c1_i32_83 = arith.constant 1 : i32
    %297 = tpu.dynamic_rotate %296 by %c1_i32_83 dim 1 : vector<24x256xf32>, i32 -> vector<24x256xf32>
    %298 = vector.extract_strided_slice %0 {offsets = [2, 0], sizes = [1, 256], strides = [1, 1]} : vector<4x256xf32> to vector<1x256xf32>
    %299 = vector.broadcast %298 : vector<1x256xf32> to vector<24x256xf32>
    %300 = arith.mulf %297, %299 : vector<24x256xf32>
    %c255_i32_84 = arith.constant 255 : i32
    %301 = tpu.dynamic_rotate %296 by %c255_i32_84 dim 1 : vector<24x256xf32>, i32 -> vector<24x256xf32>
    %302 = vector.extract_strided_slice %0 {offsets = [3, 0], sizes = [1, 256], strides = [1, 1]} : vector<4x256xf32> to vector<1x256xf32>
    %303 = vector.broadcast %302 : vector<1x256xf32> to vector<24x256xf32>
    %304 = arith.mulf %301, %303 : vector<24x256xf32>
    %305 = tpu.concatenate %300, %296, %304 in 0 : vector<24x256xf32>, vector<24x256xf32>, vector<24x256xf32> -> vector<72x256xf32>
    %306 = arith.truncf %305 : vector<72x256xf32> to vector<72x256xbf16>
    %cst_85 = arith.constant dense<0.000000e+00> : vector<8x256xf32>
    %307 = tpu.matmul %287, %306, %cst_85 {dimension_numbers = #tpu.dot_dimension_numbers<[1], [0], [0], [1], [0, 0, 1, 1], [], []>} : vector<8x72xbf16>, vector<72x256xbf16>, vector<8x256xf32> -> vector<8x256xf32>
    %308 = vector.extract_strided_slice %2 {offsets = [0, 11], sizes = [8, 1], strides = [1, 1]} : vector<16x16xf32> to vector<8x1xf32>
    %309 = vector.broadcast %308 : vector<8x1xf32> to vector<8x256xf32>
    %310 = arith.addf %307, %309 : vector<8x256xf32>
    %cst_86 = arith.constant 0.000000e+00 : f32
    %311 = vector.broadcast %cst_86 : f32 to vector<8x256xf32>
    %312 = arith.cmpf oge, %310, %311 : vector<8x256xf32>
    %313 = vector.extract_strided_slice %2 {offsets = [0, 12], sizes = [8, 1], strides = [1, 1]} : vector<16x16xf32> to vector<8x1xf32>
    %314 = vector.broadcast %313 : vector<8x1xf32> to vector<8x256xf32>
    %315 = arith.mulf %310, %314 : vector<8x256xf32>
    %316 = arith.select %312, %310, %315 : vector<8x256xi1>, vector<8x256xf32>
    %317 = vector.extract_strided_slice %316 {offsets = [0, 0], sizes = [1, 256], strides = [1, 1]} : vector<8x256xf32> to vector<1x256xf32>
    %318 = arith.addf %317, %111 : vector<1x256xf32>
    %c0_87 = arith.constant 0 : index
    %c0_88 = arith.constant 0 : index
    %c0_89 = arith.constant 0 : index
    %319 = vector.load %arg10[%c0_87, %c0_88, %c0_89] : memref<1x1x256xf32, #tpu.memory_space<vmem>>, vector<1x1x256xf32>
    %320 = vector.shape_cast %319 : vector<1x1x256xf32> to vector<1x256xf32>
    %321 = vector.shape_cast %318 : vector<1x256xf32> to vector<1x1x256xf32>
    tpu.vector_store %arg10[%c0_87, %c0_88, %c0_89], %321 {strides = array<i32>} : memref<1x1x256xf32, #tpu.memory_space<vmem>>, vector<1x1x256xf32>,
    return
  }
  func.func @transform_0(%arg0: i32) -> (i32, i32, i32) {
    %c0_i32 = arith.constant 0 : i32
    %c0_i32_0 = arith.constant 0 : i32
    %c0_i32_1 = arith.constant 0 : i32
    return %arg0, %c0_i32, %c0_i32_0 : i32, i32, i32
  }
  func.func @transform_1(%arg0: i32) -> (i32, i32, i32) {
    %c0_i32 = arith.constant 0 : i32
    %c0_i32_0 = arith.constant 0 : i32
    %c0_i32_1 = arith.constant 0 : i32
    return %arg0, %c0_i32, %c0_i32_0 : i32, i32, i32
  }
  func.func @transform_2(%arg0: i32) -> (i32, i32) {
    %c0_i32 = arith.constant 0 : i32
    %c0_i32_0 = arith.constant 0 : i32
    %c0_i32_1 = arith.constant 0 : i32
    return %c0_i32, %c0_i32_0 : i32, i32
  }
  func.func @transform_3(%arg0: i32) -> (i32, i32) {
    %c0_i32 = arith.constant 0 : i32
    %c0_i32_0 = arith.constant 0 : i32
    %c0_i32_1 = arith.constant 0 : i32
    return %c0_i32, %c0_i32_0 : i32, i32
  }
  func.func @transform_4(%arg0: i32) -> (i32, i32) {
    %c0_i32 = arith.constant 0 : i32
    %c0_i32_0 = arith.constant 0 : i32
    %c0_i32_1 = arith.constant 0 : i32
    return %c0_i32, %c0_i32_0 : i32, i32
  }
  func.func @transform_5(%arg0: i32) -> (i32, i32, i32) {
    %c0_i32 = arith.constant 0 : i32
    %c0_i32_0 = arith.constant 0 : i32
    %c0_i32_1 = arith.constant 0 : i32
    %c0_i32_2 = arith.constant 0 : i32
    return %c0_i32, %c0_i32_0, %c0_i32_1 : i32, i32, i32
  }
  func.func @transform_6(%arg0: i32) -> (i32, i32) {
    %c0_i32 = arith.constant 0 : i32
    %c0_i32_0 = arith.constant 0 : i32
    %c0_i32_1 = arith.constant 0 : i32
    return %c0_i32, %c0_i32_0 : i32, i32
  }
  func.func @transform_7(%arg0: i32) -> (i32, i32, i32) {
    %c0_i32 = arith.constant 0 : i32
    %c0_i32_0 = arith.constant 0 : i32
    %c0_i32_1 = arith.constant 0 : i32
    %c0_i32_2 = arith.constant 0 : i32
    return %c0_i32, %c0_i32_0, %c0_i32_1 : i32, i32, i32
  }
  func.func @transform_8(%arg0: i32) -> (i32, i32, i32) {
    %c0_i32 = arith.constant 0 : i32
    %c0_i32_0 = arith.constant 0 : i32
    %c0_i32_1 = arith.constant 0 : i32
    return %arg0, %c0_i32, %c0_i32_0 : i32, i32, i32
  }
  func.func @transform_9(%arg0: i32) -> (i32, i32, i32) {
    %c0_i32 = arith.constant 0 : i32
    %c0_i32_0 = arith.constant 0 : i32
    %c0_i32_1 = arith.constant 0 : i32
    return %arg0, %c0_i32, %c0_i32_0 : i32, i32, i32
  }
}

</mosaic_0001>

<bundles_post_ra>
// kernel: up_block_forward.1
= control target key start
LH: loop header
LB: loop body
LE: loop exit
PB: predicated region body
PF: predicated region fallthrough
CT: control target
= control target key end

     0   :  { %s4368_s30 = smov 0   ;;  %s5680_s0 = inlined_call_operand.vmem [shape: f32[2,8,256], index: 0, kind: input, shape index: {}]   ;;  %s5681_s1 = inlined_call_operand.vmem [shape: f32[2,8,64], index: 1, kind: input, shape index: {}]   ;;  %s5682_s2 = inlined_call_operand.vmem [shape: f32[72,256], index: 2, kind: input, shape index: {}]   ;;  %s5683_s3 = inlined_call_operand.vmem [shape: f32[16,16], index: 3, kind: input, shape index: {}]   ;;  %s5684_s4 = inlined_call_operand.vmem [shape: bf16[8,144], index: 4, kind: input, shape index: {}]   ;;  %s5685_s5 = inlined_call_operand.vmem [shape: bf16[5,8,72], index: 5, kind: input, shape index: {}]   ;;  %s5686_s6 = inlined_call_operand.vmem [shape: bf16[40,16], index: 6, kind: input, shape index: {}]   ;;  %s5687_s7 = inlined_call_operand.vmem [shape: bf16[2,384,128], index: 7, kind: input, shape index: {}]   ;;  %s5688_s8 = inlined_call_operand.vmem [shape: f32[2,4,256], index: 8, kind: output, shape index: {0}]   ;;  %s5689_s9 = inlined_call_operand.vmem [shape: f32[2,1,256], index: 9, kind: output, shape index: {1}]  }
   0x1 LB: > { %s3568_s10 = sadd.s32 4294967295, %s4288_s30   ;;  %p3572_p0 = scmp.ge.s32.totalorder %s4288_s30, 1  ;;  %s4288_s30 = sphi %s4368_s30, %s20_s30  }
   0x2   : > { %p299_p1 = scmp.lt.s32.totalorder %s4288_s30, 3 }
   0x4   : > { %p300_p2 = pnand %p3572_p0, %p299_p1 }
   0x5   : > { %p343_p3 = scmp.lt.s32.totalorder (!%p300_p2), %s3568_s10, 1  ;;  %s4293_s18 = smov (!%p300_p2), 16  }
   0x6   : > { %303 = sbr.rel (%p300_p2) target bundleno = 5821 (0x16bd), region = 52  ;;  %s4294_s19 = smov (!%p300_p2), 112  }
   0x7   : > { %s4295_s20 = smov (!%p300_p2), 127   ;;  %s4296_s21 = smov (!%p300_p2), 1  }
   0x8   : > { %s4301_s11 = smov (!%p300_p2), 123   ;;  %s4302_s29 = smov (!%p300_p2), 32  }
   0x9   : > { %s4304_s12 = smov (!%p300_p2), 64   ;;  %s4306_s15 = smov (!%p300_p2), 96  }
   0xb   : > { %v379_v0 = vld [vmem:[%s5682_s2 + $0x88] sm:$0xff]  ;;  %v4382_v1 = vld [vmem:[%s5683_s3] sm:$0xff]  ;;  %v4290_v3 = vmov 0   ;;  %v377_v4 = vld [vmem:[%s5682_s2 + $0x78] sm:$0xff]  ;;  %v4291_v7 = vmov 1   ;;  %s5693_s10 = smov (!%p343_p3, %s3568_s10), 1  ;;  %v504_v42 = vlaneseq }
   0xc   : > { %v378_v2 = vld [vmem:[%s5682_s2 + $0x80] sm:$0xff]  ;;  %4189 = vset.pattern.permute.xlu0 %v4290_v3  ;;  %408 = vmatprep.subr.mxu0 %v379_v0  ;;  %v376_v5 = vld [vmem:[%s5682_s2 + $0x70] sm:$0xff]  ;;  %v375_v6 = vld [vmem:[%s5682_s2 + $0x68] sm:$0xff]  ;;  %v4292_v13 = vmov 0.0   ;;  %s5690_s14 = sshll.u32 %s5693_s10, 3  ;;  %vm388_vm0 = vcmask 523264  }
   0xd   : > { %467 = vperm.xlu0 %4189, %v4382_v1   ;;  %409 = vmatpush1.msra.mxu0 %v378_v2  ;;  %v374_v8 = vld [vmem:[%s5682_s2 + $0x60] sm:$0xff]  ;;  %v373_v9 = vld [vmem:[%s5682_s2 + $0x58] sm:$0xff]  ;;  %v372_v10 = vld [vmem:[%s5682_s2 + $0x50] sm:$0xff]  ;;  %s351_s27 = scalar_lea.vmem %s5681_s1, %s5690_s14  ;;  %s3741_s13 = sshll.u32 %s5693_s10, 4  ;;  %v4503_v43 = vshrl.u32 %v504_v42, 7  ;;  %v4506_v44 = vand.u32 127, %v504_v42 }
   0xe   : > { %4190 = vset.pattern.permute.xlu1 %v4291_v7  ;;  %410 = vmatprep.subr.mxu0 %v377_v4  ;;  %v371_v11 = vld [vmem:[%s5682_s2 + $0x48] sm:$0xff]  ;;  %v370_v12 = vld [vmem:[%s5682_s2 + $0x40] sm:$0xff]  ;;  %v369_v15 = vld [vmem:[%s5682_s2 + $0x38] sm:$0xff]  ;;  %s347_s17 = scalar_lea.vmem %s5680_s0, %s3741_s13  ;;  %vm690_vm4 = vcmask 130048   ;;  %vm816_vm6 = vcmask 1043456   ;;  %vm812_vm7 = vcmask 588800  }
   0xf   : > { %480 = vperm.xlu1 %4190, %v4382_v1   ;;  %411 = vmatpush1.msra.mxu0 %v376_v5  ;;  %v4421_v14 = vld [vmem:[%s5683_s3 + $0x8] sm:$0xff]  ;;  %v368_v16 = vld [vmem:[%s5682_s2 + $0x30] sm:$0xff]  ;;  %v366_v18 = vld [vmem:[%s5682_s2 + $0x20] sm:$0xff]  ;;  %v4509_v45 = vsub.s32 0, %v4503_v43  ;;  %vm506_vm1 = vcmp.lt.s32.totalorder %v4506_v44, 16  ;;  %v538_v57 = vsub.s32 1, %v4503_v43 }
  0x10   : > { %412 = vmatprep.subr.mxu0 %v375_v6  ;;  %456 = vmatprep.mubr.f32.mxu0 %v4292_v13  ;;  %v367_v17 = vld [vmem:[%s5682_s2 + $0x28] sm:$0xff]  ;;  %v365_v19 = vld [vmem:[%s5682_s2 + $0x18] sm:$0xff]  ;;  %v364_v20 = vld [vmem:[%s5682_s2 + $0x10] sm:$0xff]  ;;  %vm531_vm2 = vcmp.lt.s32.totalorder %v4506_v44, 112  ;;  %vm629_vm3 = vcmp.lt.s32.totalorder %v4506_v44, 127  ;;  %vm572_vm5 = vcmp.lt.s32.totalorder %v4506_v44, 1 }
  0x11   : > { %413 = vmatpush1.msra.mxu0 %v374_v8  ;;  %472 = vperm.xlu0 %4189, %v4421_v14   ;;  %v387_v21 = vld [vmem:[%s351_s27] sm:$0xff]  ;;  %v4456_v23 = vld [vmem:[%s347_s17 + $0x8] sm:$0xff]  ;;  %vm4300_vm8 = vmmov 0   ;;  %vm873_vm9 = vcmask 64512   ;;  %s4305_s13 = smov 80   ;;  %vm2997_vm10 = vcmask 261120  }
  0x12   : > { %414 = vmatprep.subr.mxu0 %v373_v9  ;;  %v4454_v22 = vld [vmem:[%s347_s17] sm:$0xff]  ;;  %v4519_v48 = vld [vmem:[%s5682_s2 + $0x8] sm:$0xf]  ;;  %s4307_s17 = smov 114   ;;  %vm2999_vm11 = vcmask 392192   ;;  %vm3002_vm12 = vcmask 654336  }
  0x13   : > { %415 = vmatpush1.msra.mxu0 %v372_v10  ;;  %484 = vperm.xlu1 %4190, %v4421_v14   ;;  %v4514_v46 = vld [vmem:[%s5682_s2] sm:$0xf]  ;;  %v4528_v51 = vrot.slane %v4519_v48, %v4509_v45  ;;  %v4557_v62 = vrot.slane %v4519_v48, %v538_v57  ;;  %vm3004_vm13 = vcmask 785408   ;;  %vm3006_vm14 = vcmask 916480   ;;  %v3736_v44 = vld [vmem:[%s5685_s5 + $0x10] sm:$0xf] }
  0x14   : > { %416 = vmatprep.subr.mxu0 %v371_v11  ;;  %v4524_v49 = vrot.slane %v4514_v46, %v4509_v45  ;;  %v4547_v59 = vrot.slane %v4514_v46, %v538_v57  ;;  %s3578_s26 = sshll.u32 %s5693_s10, 1 }
  0x15   : > { %417 = vmatpush1.msra.mxu0 %v370_v12  ;;  %s360_s16 = scalar_lea.vmem %s5689_s9, %s3578_s26 }
  0x16   : > { %418 = vmatprep.subr.mxu0 %v369_v15 }
  0x17   : > { %419 = vmatpush1.msra.mxu0 %v368_v16  ;;  %v644_v16 = vsub.s32 3, %v4503_v43 }
  0x18   : > { %420 = vmatprep.subr.mxu0 %v367_v17 }
  0x19   : > { %421 = vmatpush1.msra.mxu0 %v366_v18 }
  0x1a   : > { %422 = vmatprep.subr.mxu0 %v365_v19 }
  0x1b   : > { %423 = vmatpush1.msra.mxu0 %v364_v20  ;;  %v4603_v20 = vrot.slane %v4514_v46, %v644_v16 }
  0x1c   : > { %3579 = vmatmul.mubr.msk.f32.vlgmr.msra.gmra.mxu0 %vm388_vm0, %v387_v21  ;;  %v4606_v21 = vrot.slane %v4519_v48, %v644_v16 }
  0x1d   : > { %855 = vmatprep.mubr.bf16.mxu0 %v4290_v3 }
  0x88   : > { %v468_v24 = vpop.permute.xlu0 %467 }
  0x89   : > { %v475_v25 = vmul.f32 %v468_v24, %v4454_v22  ;;  %v476_v26 = vmul.f32 %v468_v24, %v4456_v23 }
  0x8a   : > { %v481_v27 = vpop.permute.xlu1 %480 }
  0x8b   : > { %v487_v28 = vadd.f32 %v481_v27, %v475_v25  ;;  %v488_v29 = vadd.f32 %v481_v27, %v476_v26 }
  0x8c   : > { %v473_v32 = vpop.permute.xlu0 %472 }
  0x8d   : > { %v4460_v30 = vmax.f32 %v487_v28, 0.0  ;;  %v4462_v31 = vmax.f32 %v488_v29, 0.0 }
  0x8e   : > { %v485_v35 = vpop.permute.xlu1 %484 }
  0x8f   : > { %496 = vrot.lane.b32.xlu0 %v4460_v30, %s4293_s18 }
  0x93   : > { %500 = vrot.lane.b32.xlu0 %v4462_v31, %s4293_s18 }
  0x97   : > { %523 = vrot.lane.b32.xlu0 %v4460_v30, %s4294_s19 }
  0x9b   : > { %527 = vrot.lane.b32.xlu0 %v4462_v31, %s4294_s19 }
  0x9f   : > { %609 = vrot.lane.b32.xlu0 %v4460_v30, %s4295_s20 }
  0xa3   : > { %621 = vrot.lane.b32.xlu0 %v4462_v31, %s4295_s20 }
  0xa7   : > { %552 = vrot.lane.b32.xlu0 %v4460_v30, %s4296_s21 }
  0xdc   : > { %v4478_v33 = vpop.f32.mrf.mxu0 }
  0xdd   : > { %v477_v34 = vmul.f32 %v473_v32, %v4478_v33 }
  0xde   : > { %v4481_v36 = vpop.f32.mrf.mxu0 }
  0xdf   : > { %v489_v37 = vadd.f32 %v485_v35, %v477_v34  ;;  %v478_v38 = vmul.f32 %v473_v32, %v4481_v36 }
  0xe1   : > { %v4484_v39 = vmax.f32 %v489_v37, 0.0  ;;  %v490_v40 = vadd.f32 %v485_v35, %v478_v38 }
  0xe3   : > { %498 = vrot.lane.b32.xlu1 %v4484_v39, %s4293_s18  ;;  %v4488_v41 = vmax.f32 %v490_v40, 0.0 }
  0xe7   : > { %502 = vrot.lane.b32.xlu1 %v4488_v41, %s4293_s18 }
  0xeb   : > { %525 = vrot.lane.b32.xlu1 %v4484_v39, %s4294_s19 }
  0xef   : > { %529 = vrot.lane.b32.xlu1 %v4488_v41, %s4294_s19 }
  0xf3   : > { %611 = vrot.lane.b32.xlu1 %v4484_v39, %s4295_s20 }
  0xf7   : > { %554 = vrot.lane.b32.xlu1 %v4484_v39, %s4296_s21 }
  0xfb   : > { %623 = vrot.lane.b32.xlu1 %v4488_v41, %s4295_s20 }
 0x101   : > { %v497_v47 = vpop.permute.xlu0 %496 }
 0x105   : > { %v501_v50 = vpop.permute.xlu0 %500 }
 0x106   : > { %v507_v52 = vsel %vm506_vm1, %v497_v47, %v501_v50  ;;  %v509_v53 = vsel %vm506_vm1, %v501_v50, %v497_v47  ;;  %v4629_v50 = vld [vmem:[%s5684_s4] sm:$0xff] }
 0x107   : > { %v4535_v54 = vmul.f32 %v4524_v49, %v509_v53  ;;  %v4540_v55 = vmul.f32 %v4528_v51, %v507_v52  ;;  %v3581_v52 = vcombine.high %v4629_v50, %v4629_v50  ;;  %v4297_v53 = vmov 4  }
 0x108   : > { %4191 = vset.pattern.permute.xlu0 %v4297_v53 }
 0x109   : > { %605 = vrot.lane.b32.xlu0 %v4535_v54, %s4295_s20  ;;  %v524_v56 = vpop.permute.xlu0 %523  ;;  %3582 = vmatprep.mubr.msk.bf16.mxu1 %vm690_vm4, %v3581_v52 }
 0x10d   : > { %617 = vrot.lane.b32.xlu0 %v4540_v55, %s4295_s20  ;;  %v528_v58 = vpop.permute.xlu0 %527 }
 0x10e   : > { %v532_v60 = vsel %vm531_vm2, %v524_v56, %v528_v58  ;;  %v534_v63 = vsel %vm531_vm2, %v528_v58, %v524_v56 }
 0x10f   : > { %v4554_v61 = vmul.f32 %v4547_v59, %v532_v60  ;;  %v4564_v0 = vmul.f32 %v4557_v62, %v534_v63 }
 0x111   : > { %564 = vrot.lane.b32.xlu0 %v4462_v31, %s4296_s21  ;;  %v610_v12 = vpop.permute.xlu0 %609 }
 0x115   : > { %556 = vrot.lane.b32.xlu0 %v4554_v61, %s4296_s21  ;;  %v622_v24 = vpop.permute.xlu0 %621 }
 0x116   : > { %v632_v26 = vsel %vm629_vm3, %v610_v12, %v622_v24  ;;  %v638_v27 = vsel %vm629_vm3, %v622_v24, %v610_v12 }
 0x117   : > { %v655_v34 = vmul.f32 %v4606_v21, %v638_v27  ;;  %v654_v37 = vmul.f32 %v4603_v20, %v632_v26 }
 0x119   : > { %568 = vrot.lane.b32.xlu0 %v4564_v0, %s4296_s21  ;;  %v553_v56 = vpop.permute.xlu0 %552 }
 0x11d   : > { %548 = vrot.lane.b32.xlu0 %v4535_v54, %s4296_s21 }
 0x121   : > { %560 = vrot.lane.b32.xlu0 %v4540_v55, %s4296_s21 }
 0x125   : > { %613 = vrot.lane.b32.xlu0 %v4554_v61, %s4295_s20 }
 0x129   : > { %625 = vrot.lane.b32.xlu0 %v4564_v0, %s4295_s20 }
 0x12d   : > { %681 = vperm.xlu0 %4191, %v4382_v1  }
 0x155   : > { %v499_v2 = vpop.permute.xlu1 %498 }
 0x159   : > { %v503_v4 = vpop.permute.xlu1 %502 }
 0x15a   : > { %v510_v5 = vsel %vm506_vm1, %v503_v4, %v499_v2  ;;  %v508_v7 = vsel %vm506_vm1, %v499_v2, %v503_v4 }
 0x15b   : > { %v4579_v6 = vmul.f32 %v4524_v49, %v510_v5  ;;  %v4586_v9 = vmul.f32 %v4528_v51, %v508_v7 }
 0x15d   : > { %607 = vrot.lane.b32.xlu1 %v4579_v6, %s4295_s20  ;;  %v526_v8 = vpop.permute.xlu1 %525 }
 0x161   : > { %619 = vrot.lane.b32.xlu1 %v4586_v9, %s4295_s20  ;;  %v530_v10 = vpop.permute.xlu1 %529 }
 0x162   : > { %v533_v11 = vsel %vm531_vm2, %v526_v8, %v530_v10  ;;  %v535_v18 = vsel %vm531_vm2, %v530_v10, %v526_v8 }
 0x163   : > { %v546_v17 = vmul.f32 %v4547_v59, %v533_v11  ;;  %v547_v25 = vmul.f32 %v4557_v62, %v535_v18 }
 0x165   : > { %566 = vrot.lane.b32.xlu1 %v4488_v41, %s4296_s21  ;;  %v612_v15 = vpop.permute.xlu1 %611 }
 0x169   : > { %558 = vrot.lane.b32.xlu1 %v546_v17, %s4296_s21  ;;  %v4600_v19 = vpop.permute.xlu1 %554 }
 0x16d   : > { %570 = vrot.lane.b32.xlu1 %v547_v25, %s4296_s21  ;;  %v624_v28 = vpop.permute.xlu1 %623 }
 0x16e   : > { %v633_v29 = vsel %vm629_vm3, %v612_v15, %v624_v28  ;;  %v639_v32 = vsel %vm629_vm3, %v624_v28, %v612_v15 }
 0x16f   : > { %v657_v35 = vmul.f32 %v4606_v21, %v639_v32  ;;  %v656_v38 = vmul.f32 %v4603_v20, %v633_v29  ;;  %v673_v29 = vpack.c.bf16 %v547_v25, %v4564_v0  ;;  %v587_v32 = vsub.s32 2, %v4503_v43 }
 0x171   : > { %550 = vrot.lane.b32.xlu1 %v4579_v6, %s4296_s21  ;;  %v677_v40 = vpack.c.bf16 %v657_v35, %v655_v34  ;;  %v676_v47 = vpack.c.bf16 %v656_v38, %v654_v37  ;;  %v672_v35 = vpack.c.bf16 %v546_v17, %v4554_v61  ;;  %v671_v37 = vpack.c.bf16 %v4488_v41, %v4462_v31 }
 0x172   : > { %v4656_v38 = vrot.slane %v4519_v48, %v587_v32  ;;  %v670_v61 = vpack.c.bf16 %v4484_v39, %v4460_v30  ;;  %v669_v48 = vpack.c.bf16 %v4586_v9, %v4540_v55 }
 0x173   : > { %694 = vmatprep.subr.bf16.mxu1 %v677_v40 }
 0x174   : > { %695 = vmatpush1.bf16.msra.mxu1 %v676_v47 }
 0x175   : > { %562 = vrot.lane.b32.xlu1 %v4586_v9, %s4296_s21 }
 0x179   : > { %615 = vrot.lane.b32.xlu1 %v546_v17, %s4295_s20  ;;  %v4670_v17 = vrot.slane %v4514_v46, %v587_v32  ;;  %v668_v46 = vpack.c.bf16 %v4579_v6, %v4535_v54 }
 0x17b   : > { %v606_v57 = vpop.permute.xlu0 %605 }
 0x17d   : > { %627 = vrot.lane.b32.xlu1 %v547_v25, %s4295_s20 }
 0x17f   : > { %v618_v58 = vpop.permute.xlu0 %617 }
 0x180   : > { %v630_v4 = vsel %vm629_vm3, %v606_v57, %v618_v58  ;;  %v636_v5 = vsel %vm629_vm3, %v618_v58, %v606_v57 }
 0x181   : > { %v650_v12 = vmul.f32 %v4603_v20, %v630_v4  ;;  %v651_v15 = vmul.f32 %v4606_v21, %v636_v5 }
 0x183   : > { %v565_v60 = vpop.permute.xlu0 %564 }
 0x184   : > { %v575_v57 = vsel %vm572_vm5, %v553_v56, %v565_v60  ;;  %v581_v5 = vsel %vm572_vm5, %v565_v60, %v553_v56 }
 0x185   : > { %v597_v56 = vmul.f32 %v4670_v17, %v581_v5 }
 0x187   : > { %v557_v63 = vpop.permute.xlu0 %556 }
 0x18b   : > { %v569_v7 = vpop.permute.xlu0 %568 }
 0x18c   : > { %v577_v0 = vsel %vm572_vm5, %v557_v63, %v569_v7  ;;  %v583_v53 = vsel %vm572_vm5, %v569_v7, %v557_v63  ;;  %v598_v7 = vmul.f32 %v4656_v38, %v575_v57 }
 0x18d   : > { %v602_v30 = vmul.f32 %v4656_v38, %v577_v0  ;;  %v601_v4 = vmul.f32 %v4670_v17, %v583_v53 }
 0x18f   : > { %v549_v28 = vpop.permute.xlu0 %548 }
 0x193   : > { %v561_v40 = vpop.permute.xlu0 %560 }
 0x194   : > { %v573_v54 = vsel %vm572_vm5, %v549_v28, %v561_v40  ;;  %v579_v60 = vsel %vm572_vm5, %v561_v40, %v549_v28 }
 0x195   : > { %v593_v32 = vmul.f32 %v4670_v17, %v579_v60 }
 0x197   : > { %v614_v9 = vpop.permute.xlu0 %613 }
 0x1cf   : > { %v608_v2 = vpop.permute.xlu1 %607 }
 0x1d3   : > { %v620_v8 = vpop.permute.xlu1 %619 }
 0x1d4   : > { %v631_v10 = vsel %vm629_vm3, %v608_v2, %v620_v8  ;;  %v637_v11 = vsel %vm629_vm3, %v620_v8, %v608_v2 }
 0x1d5   : > { %v652_v16 = vmul.f32 %v4603_v20, %v631_v10  ;;  %v653_v18 = vmul.f32 %v4606_v21, %v637_v11 }
 0x1d7   : > { %v567_v24 = vpop.permute.xlu1 %566  ;;  %v675_v26 = vpack.c.bf16 %v653_v18, %v651_v15  ;;  %v674_v27 = vpack.c.bf16 %v652_v16, %v650_v12  ;;  %v594_v16 = vmul.f32 %v4656_v38, %v573_v54  ;;  %v626_v18 = vpop.permute.xlu0 %625 }
 0x1d8   : > { %v576_v52 = vsel %vm572_vm5, %v4600_v19, %v567_v24  ;;  %v582_v58 = vsel %vm572_vm5, %v567_v24, %v4600_v19 }
 0x1d9   : > { %696 = vmatprep.subr.bf16.mxu1 %v675_v26  ;;  %v600_v2 = vmul.f32 %v4656_v38, %v576_v52  ;;  %v599_v6 = vmul.f32 %v4670_v17, %v582_v58  ;;  %v3580_v52 = vcombine.low %v4629_v50, %v4629_v50 }
 0x1da   : > { %697 = vmatpush1.bf16.msra.mxu1 %v674_v27 }
 0x1db   : > { %v559_v34 = vpop.permute.xlu1 %558  ;;  %698 = vmatprep.subr.bf16.mxu1 %v673_v29  ;;  %v665_v15 = vpack.c.bf16 %v600_v2, %v598_v7  ;;  %v664_v27 = vpack.c.bf16 %v599_v6, %v597_v56  ;;  %v682_v53 = vpop.permute.xlu0 %681  ;;  %v4298_v2 = vmov 2   ;;  %v4299_v56 = vmov 3  }
 0x1dc   : > { %4192 = vset.pattern.permute.xlu1 %v4298_v2 }
 0x1de   : > { %699 = vmatpush1.bf16.msra.mxu1 %v672_v35  ;;  %v640_v35 = vsel %vm629_vm3, %v626_v18, %v614_v9 }
 0x1df   : > { %v571_v47 = vpop.permute.xlu1 %570  ;;  %700 = vmatprep.subr.bf16.mxu1 %v671_v37 }
 0x1e0   : > { %v578_v25 = vsel %vm572_vm5, %v559_v34, %v571_v47  ;;  %v584_v31 = vsel %vm572_vm5, %v571_v47, %v559_v34  ;;  %v634_v34 = vsel %vm629_vm3, %v614_v9, %v626_v18 }
 0x1e1   : > { %v604_v41 = vmul.f32 %v4656_v38, %v578_v25  ;;  %v603_v55 = vmul.f32 %v4670_v17, %v584_v31  ;;  %v658_v0 = vmul.f32 %v4603_v20, %v634_v34  ;;  %v659_v25 = vmul.f32 %v4606_v21, %v640_v35 }
 0x1e2   : > { %701 = vmatpush1.bf16.msra.mxu1 %v670_v61 }
 0x1e3   : > { %v551_v39 = vpop.permute.xlu1 %550  ;;  %702 = vmatprep.subr.bf16.mxu1 %v669_v48  ;;  %v667_v63 = vpack.c.bf16 %v604_v41, %v602_v30  ;;  %v666_v10 = vpack.c.bf16 %v603_v55, %v601_v4 }
 0x1e6   : > { %703 = vmatpush1.bf16.msra.mxu1 %v668_v46 }
 0x1e7   : > { %v563_v8 = vpop.permute.xlu1 %562  ;;  %704 = vmatprep.subr.bf16.mxu1 %v667_v63 }
 0x1e8   : > { %v574_v19 = vsel %vm572_vm5, %v551_v39, %v563_v8  ;;  %v580_v11 = vsel %vm572_vm5, %v563_v8, %v551_v39 }
 0x1e9   : > { %v596_v12 = vmul.f32 %v4656_v38, %v574_v19  ;;  %v595_v26 = vmul.f32 %v4670_v17, %v580_v11 }
 0x1ea   : > { %705 = vmatpush1.bf16.msra.mxu1 %v666_v10 }
 0x1eb   : > { %v616_v24 = vpop.permute.xlu1 %615  ;;  %706 = vmatprep.subr.bf16.mxu1 %v665_v15  ;;  %v663_v29 = vpack.c.bf16 %v596_v12, %v594_v16  ;;  %v662_v47 = vpack.c.bf16 %v595_v26, %v593_v32 }
 0x1ee   : > { %707 = vmatpush1.bf16.msra.mxu1 %v664_v27 }
 0x1ef   : > { %v628_v37 = vpop.permute.xlu1 %627  ;;  %708 = vmatprep.subr.bf16.mxu1 %v663_v29 }
 0x1f0   : > { %v635_v28 = vsel %vm629_vm3, %v616_v24, %v628_v37  ;;  %v641_v40 = vsel %vm629_vm3, %v628_v37, %v616_v24 }
 0x1f1   : > { %v660_v61 = vmul.f32 %v4603_v20, %v635_v28  ;;  %v661_v31 = vmul.f32 %v4606_v21, %v641_v40 }
 0x1f2   : > { %709 = vmatpush1.bf16.msra.mxu1 %v662_v47 }
 0x1f3   : > { %v679_v41 = vpack.c.bf16 %v661_v31, %v659_v25  ;;  %v678_v48 = vpack.c.bf16 %v660_v61, %v658_v0 }
 0x1f5   : > { %724 = vmatprep.subr.bf16.mxu1 %v679_v41 }
 0x1f6   : > { %725 = vmatpush2.bf16.msra.mxu1 %v678_v48 }
 0x1f7   : > { %3889 = vmatprep.subr.bf16.mxu1 %v4292_v13 }
 0x1f9   : > { %727 = vmatmul.mubr.bf16.vlgmr.msra.gmra.mxu1 %v3580_v52 }
 0x1fa   : > { %3891 = vmatprep.mubr.msk.bf16.mxu1 %vm4300_vm8, %v4292_v13 }
 0x2b9   : > { %v728_v30 = vpop.f32.mrf.mxu1 }
 0x2ba   : > { %v729_v39 = vadd.f32 %v728_v30, %v682_v53 }
 0x2bb   : > { %v730_v57 = vpop.f32.mrf.mxu1 }
 0x2bc   : > { %v4720_v55 = vmax.f32 %v729_v39, 0.0  ;;  %v731_v46 = vadd.f32 %v730_v57, %v682_v53 }
 0x2bd   : > { %v732_v9 = vpop.f32.mrf.mxu1 }
 0x2be   : > { %738 = vrot.lane.b32.xlu0 %v4720_v55, %s4293_s18  ;;  %746 = vrot.lane.b32.xlu1 %v4720_v55, %s4294_s19  ;;  %v4726_v50 = vmax.f32 %v731_v46, 0.0 }
 0x2bf   : > { %v733_v58 = vpop.f32.mrf.mxu1 }
 0x2c2   : > { %748 = vrot.lane.b32.xlu1 %v4726_v50, %s4294_s19 }
 0x2c6   : > { %740 = vrot.lane.b32.xlu1 %v4726_v50, %s4293_s18 }
 0x2ca   : > { %780 = vrot.lane.b32.xlu1 %v4720_v55, %s4295_s20 }
 0x330   : > { %v747_v63 = vpop.permute.xlu1 %746  ;;  %v739_v6 = vpop.permute.xlu0 %738 }
 0x334   : > { %v749_v4 = vpop.permute.xlu1 %748 }
 0x335   : > { %v750_v5 = vsel %vm531_vm2, %v747_v63, %v749_v4  ;;  %v751_v7 = vsel %vm531_vm2, %v749_v4, %v747_v63 }
 0x336   : > { %v753_v8 = vmul.f32 %v751_v7, %v4557_v62  ;;  %v4740_v54 = vmul.f32 %v750_v5, %v4547_v59 }
 0x338   : > { %788 = vrot.lane.b32.xlu1 %v753_v8, %s4295_s20  ;;  %782 = vrot.lane.b32.xlu0 %v4740_v54, %s4295_s20  ;;  %v741_v19 = vpop.permute.xlu1 %740  ;;  %v807_v2 = vpack.c.bf16 %v753_v8, %v4726_v50  ;;  %v806_v7 = vpack.c.bf16 %v4740_v54, %v4720_v55 }
 0x339   : > { %v743_v10 = vsel %vm506_vm1, %v741_v19, %v739_v6  ;;  %v742_v12 = vsel %vm506_vm1, %v739_v6, %v741_v19 }
 0x33a   : > { %v4748_v11 = vmul.f32 %v743_v10, %v4524_v49  ;;  %v745_v15 = vmul.f32 %v742_v12, %v4528_v51 }
 0x33c   : > { %786 = vrot.lane.b32.xlu1 %v4726_v50, %s4295_s20  ;;  %778 = vrot.lane.b32.xlu0 %v4748_v11, %s4295_s20  ;;  %v781_v60 = vpop.permute.xlu1 %780 }
 0x340   : > { %756 = vrot.lane.b32.xlu1 %v4720_v55, %s4296_s21  ;;  %784 = vrot.lane.b32.xlu0 %v745_v15, %s4295_s20 }
 0x344   : > { %764 = vrot.lane.b32.xlu1 %v753_v8, %s4296_s21  ;;  %758 = vrot.lane.b32.xlu0 %v4740_v54, %s4296_s21 }
 0x348   : > { %762 = vrot.lane.b32.xlu1 %v4726_v50, %s4296_s21  ;;  %754 = vrot.lane.b32.xlu0 %v4748_v11, %s4296_s21 }
 0x34c   : > { %985 = vperm.xlu1 %4192, %v4382_v1   ;;  %760 = vrot.lane.b32.xlu0 %v745_v15, %s4296_s21 }
 0x350   : > { %989 = vperm.xlu1 %4192, %v4421_v14  }
 0x354   : > { %4193 = vset.pattern.permute.xlu1 %v4299_v56 }
 0x355   : > { %997 = vperm.xlu1 %4193, %v4382_v1  }
 0x359   : > { %1001 = vperm.xlu1 %4193, %v4421_v14  }
 0x3aa   : > { %v783_v16 = vpop.permute.xlu0 %782  ;;  %v789_v18 = vpop.permute.xlu1 %788 }
 0x3ab   : > { %v792_v24 = vsel %vm629_vm3, %v783_v16, %v789_v18  ;;  %v795_v26 = vsel %vm629_vm3, %v789_v18, %v783_v16 }
 0x3ac   : > { %v800_v27 = vmul.f32 %v792_v24, %v4603_v20  ;;  %v801_v29 = vmul.f32 %v795_v26, %v4606_v21 }
 0x3ae   : > { %v810_v32 = vpack.c.bf16 %v800_v27, %v800_v27  ;;  %v811_v34 = vpack.c.bf16 %v801_v29, %v801_v29  ;;  %v779_v35 = vpop.permute.xlu0 %778  ;;  %v787_v37 = vpop.permute.xlu1 %786 }
 0x3af   : > { %v791_v28 = vsel %vm629_vm3, %v781_v60, %v787_v37  ;;  %v794_v40 = vsel %vm629_vm3, %v787_v37, %v781_v60 }
 0x3b0   : > { %3583 = vmatprep.subr.msk.bf16.mxu0 %vm816_vm6, %v811_v34  ;;  %v818_v14 = vsel %vm816_vm6, %v810_v32, 0  ;;  %v798_v31 = vmul.f32 %v791_v28, %v4603_v20  ;;  %v799_v41 = vmul.f32 %v794_v40, %v4606_v21 }
 0x3b1   : > { %830 = vmatpush1.bf16.msra.mxu0 %v818_v14 }
 0x3b2   : > { %v785_v47 = vpop.permute.xlu0 %784  ;;  %v757_v0 = vpop.permute.xlu1 %756 }
 0x3b3   : > { %v790_v25 = vsel %vm629_vm3, %v779_v35, %v785_v47  ;;  %v793_v61 = vsel %vm629_vm3, %v785_v47, %v779_v35 }
 0x3b4   : > { %v796_v48 = vmul.f32 %v790_v25, %v4603_v20  ;;  %v797_v52 = vmul.f32 %v793_v61, %v4606_v21 }
 0x3b6   : > { %v808_v53 = vpack.c.bf16 %v798_v31, %v796_v48  ;;  %v759_v30 = vpop.permute.xlu0 %758  ;;  %v765_v39 = vpop.permute.xlu1 %764  ;;  %v809_v57 = vpack.c.bf16 %v799_v41, %v797_v52 }
 0x3b7   : > { %v768_v46 = vsel %vm572_vm5, %v759_v30, %v765_v39  ;;  %v771_v9 = vsel %vm572_vm5, %v765_v39, %v759_v30 }
 0x3b8   : > { %v777_v58 = vmul.f32 %v768_v46, %v4656_v38  ;;  %831 = vmatprep.subr.bf16.mxu0 %v809_v57  ;;  %v776_v5 = vmul.f32 %v771_v9, %v4670_v17  ;;  %v383_v9 = vld [vmem:[%s5686_s6 + $0x4] sm:$0xf] }
 0x3b9   : > { %832 = vmatpush1.bf16.msra.mxu0 %v808_v53 }
 0x3ba   : > { %v755_v63 = vpop.permute.xlu0 %754  ;;  %833 = vmatprep.subr.bf16.mxu0 %v807_v2  ;;  %v763_v4 = vpop.permute.xlu1 %762  ;;  %v805_v6 = vpack.c.bf16 %v745_v15, %v777_v58  ;;  %v804_v50 = vpack.c.bf16 %v4748_v11, %v776_v5  ;;  %v737_v11 = vld [vmem:[%s5685_s5] sm:$0xf]  ;;  %v1138_v58 = vpack.c.bf16 %v4456_v23, %v4456_v23 }
 0x3bb   : > { %v767_v19 = vsel %vm572_vm5, %v757_v0, %v763_v4  ;;  %v770_v10 = vsel %vm572_vm5, %v763_v4, %v757_v0  ;;  %v382_v4 = vld [vmem:[%s5686_s6] sm:$0xf] }
 0x3bc   : > { %v774_v55 = vmul.f32 %v770_v10, %v4670_v17  ;;  %v775_v54 = vmul.f32 %v767_v19, %v4656_v38 }
 0x3bd   : > { %834 = vmatpush1.bf16.msra.mxu0 %v806_v7 }
 0x3be   : > { %v761_v12 = vpop.permute.xlu0 %760  ;;  %835 = vmatprep.subr.bf16.mxu0 %v805_v6 }
 0x3bf   : > { %v766_v8 = vsel %vm572_vm5, %v755_v63, %v761_v12  ;;  %v769_v56 = vsel %vm572_vm5, %v761_v12, %v755_v63  ;;  %v1137_v63 = vpack.c.bf16 %v4454_v22, %v4454_v22 }
 0x3c0   : > { %v772_v15 = vmul.f32 %v769_v56, %v4670_v17  ;;  %v773_v60 = vmul.f32 %v766_v8, %v4656_v38  ;;  %v1065_v56 = vpack.c.bf16 %v4478_v33, %v4478_v33 }
 0x3c1   : > { %836 = vmatpush1.bf16.msra.mxu0 %v804_v50  ;;  %v1143_v5 = vsel %vm816_vm6, %v1137_v63, 0 }
 0x3c2   : > { %v802_v16 = vpack.c.bf16 %v774_v55, %v772_v15  ;;  %v803_v18 = vpack.c.bf16 %v775_v54, %v773_v60  ;;  %v1066_v55 = vpack.c.bf16 %v4481_v36, %v4481_v36  ;;  %v384_v60 = vld [vmem:[%s5686_s6 + $0x8] sm:$0xf] }
 0x3c4   : > { %837 = vmatprep.subr.bf16.mxu0 %v803_v18 }
 0x3c5   : > { %838 = vmatpush1.bf16.msra.mxu0 %v802_v16 }
 0x3c6   : > { %3883 = vmatprep.subr.bf16.mxu0 %v4292_v13 }
 0x3c7   : > { %v986_v34 = vpop.permute.xlu1 %985 }
 0x3c8   : > { %3584 = vmatmul.mubr.msk.bf16.vlgmr.msra.gmra.mxu0 %vm812_vm7, %v737_v11  ;;  %v993_v14 = vmul.f32 %v986_v34, %v4456_v23  ;;  %v992_v47 = vmul.f32 %v986_v34, %v4454_v22  ;;  %v385_v23 = vld [vmem:[%s5686_s6 + $0xc] sm:$0xf] }
 0x3c9   : > { %3885 = vmatprep.mubr.msk.bf16.mxu0 %vm4300_vm8, %v4292_v13 }
 0x3cb   : > { %v990_v35 = vpop.permute.xlu1 %989 }
 0x3cc   : > { %v995_v40 = vmul.f32 %v990_v35, %v4481_v36  ;;  %v994_v61 = vmul.f32 %v990_v35, %v4478_v33  ;;  %v1071_v33 = vsel %vm816_vm6, %v1065_v56, 0 }
 0x3d0   : > { %v998_v37 = vpop.permute.xlu1 %997 }
 0x3d1   : > { %v1005_v0 = vadd.f32 %v998_v37, %v993_v14  ;;  %v1004_v31 = vadd.f32 %v998_v37, %v992_v47  ;;  %v386_v37 = vld [vmem:[%s5686_s6 + $0x10] sm:$0xf] }
 0x3d3   : > { %v1009_v48 = vmax.f32 %v1005_v0, 0.0  ;;  %v1008_v30 = vmax.f32 %v1004_v31, 0.0 }
 0x3d4   : > { %v1002_v28 = vpop.permute.xlu1 %1001 }
 0x3d5   : > { %v1007_v25 = vadd.f32 %v1002_v28, %v995_v40  ;;  %v1006_v41 = vadd.f32 %v1002_v28, %v994_v61 }
 0x3d7   : > { %v1011_v52 = vmax.f32 %v1007_v25, 0.0  ;;  %v1010_v39 = vmax.f32 %v1006_v41, 0.0 }
 0x3d9   : > { %v1013_v46 = vpack.c.bf16 %v1011_v52, %v1009_v48  ;;  %v1012_v2 = vpack.c.bf16 %v1010_v39, %v1008_v30 }
 0x488   : > { %v4819_v24 = vpop.f32.mrf.mxu0 }
 0x48a   : > { %v4821_v26 = vpop.f32.mrf.mxu0 }
 0x48b   : > { %v864_v27 = vadd.f32 %v4821_v26, %v4819_v24 }
 0x48c   : > { %v861_v29 = vpop.f32.mrf.mxu0 }
 0x48d   : > { %865 = vadd.xlane.f32.xlu0 %v864_v27 }
 0x48e   : > { %v862_v32 = vpop.f32.mrf.mxu0 }
 0x4a3   : > { %870 = vrot.lane.b32.xlu0 %v4382_v1, %s4301_s11  ;;  %s4303_s11 = smov 48  }
 0x516   : > { %v866_v13 = vpop.xlane.xlu0 %865 }
 0x517   : > { %v868_v1 = vmul.f32 0.00390625, %v866_v13 }
 0x519   : > { %v869_v53 = vpack.c.bf16 %v868_v1, %v868_v1 }
 0x51a   : > { %v871_v7 = vpop.permute.xlu0 %870 }
 0x51b   : > { %v878_v57 = vsel %vm816_vm6, %v869_v53, 0 }
 0x51c   : > { %3884 = vmatpush3.bf16.msra.mxu0 %v878_v57 }
 0x51d   : > { %1031 = vmatprep.subr.bf16.mxu0 %v1013_v46 }
 0x51f   : > { %3886 = vmatmul.mubr.msk.bf16.vlgmr.msra.gmra.mxu0 %vm873_vm9, %v383_v9 }
 0x520   : > { %1032 = vmatpush1.bf16.msra.mxu0 %v1012_v2  ;;  %1049 = vmatprep.mubr.bf16.mxu0 %v4290_v3 }
 0x521   : > { %3593 = vmatprep.subr.msk.bf16.mxu0 %vm816_vm6, %v1138_v58 }
 0x527   : > { %3588 = vmatmul.mubr.msk.bf16.vlgmr.msra.gmra.mxu0 %vm690_vm4, %v382_v4 }
 0x528   : > { %1163 = vmatpush1.bf16.msra.mxu0 %v1143_v5  ;;  %1180 = vmatprep.mubr.bf16.mxu0 %v4290_v3 }
 0x52f   : > { %3594 = vmatmul.mubr.msk.bf16.vlgmr.msra.gmra.mxu0 %vm873_vm9, %v385_v23 }
 0x5df   : > { %v914_v6 = vpop.f32.mrf.mxu0 }
 0x5e0   : > { %v915_v22 = vadd.f32 %v914_v6, %v871_v7 }
 0x5e1   : > { %v3887_v19 = vpop.f32.mrf.mxu0 }
 0x5e2   : > { %v920_v10 = vmax.f32 %v915_v22, 0.0 }
 0x5e3   : > { %v917_v12 = vpop.f32.mrf.mxu0 }
 0x5e4   : > { %v921_v50 = vpack.c.bf16 %v920_v10, %v920_v10 }
 0x5e5   : > { %v3888_v8 = vpop.f32.mrf.mxu0 }
 0x5e6   : > { %v929_v54 = vsel %vm816_vm6, %v921_v50, 0 }
 0x5e7   : > { %3890 = vmatpush3.bf16.msra.mxu1 %v929_v54  ;;  %v4858_v15 = vpop.f32.mrf.mxu0 }
 0x5e8   : > { %3589 = vmatprep.subr.msk.bf16.mxu1 %vm816_vm6, %v1066_v55 }
 0x5e9   : > { %v4864_v16 = vpop.f32.mrf.mxu0 }
 0x5ea   : > { %3892 = vmatmul.mubr.msk.bf16.vlgmr.msra.gmra.mxu1 %vm873_vm9, %v384_v60 }
 0x5eb   : > { %v1055_v18 = vpop.f32.mrf.mxu0  ;;  %1091 = vmatpush1.bf16.msra.mxu1 %v1071_v33  ;;  %1108 = vmatprep.mubr.bf16.mxu1 %v4290_v3 }
 0x5ed   : > { %v1056_v36 = vpop.f32.mrf.mxu0 }
 0x5ef   : > { %v4869_v11 = vpop.f32.mrf.mxu0 }
 0x5f0   : > { %1199 = vrot.lane.b32.xlu1 %v4869_v11, %s4294_s19 }
 0x5f1   : > { %v4873_v27 = vpop.f32.mrf.mxu0 }
 0x5f2   : > { %3590 = vmatmul.mubr.msk.bf16.vlgmr.msra.gmra.mxu1 %vm873_vm9, %v386_v37 }
 0x5f3   : > { %v1186_v29 = vpop.f32.mrf.mxu0  ;;  %1306 = vmatprep.mubr.bf16.mxu1 %v4290_v3 }
 0x5f4   : > { %1191 = vrot.lane.b32.xlu1 %v4869_v11, %s4293_s18 }
 0x5f5   : > { %v1187_v32 = vpop.f32.mrf.mxu0 }
 0x5f8   : > { %1201 = vrot.lane.b32.xlu1 %v4873_v27, %s4294_s19 }
 0x5fc   : > { %1193 = vrot.lane.b32.xlu1 %v4873_v27, %s4293_s18 }
 0x600   : > { %1233 = vrot.lane.b32.xlu1 %v4869_v11, %s4295_s20 }
 0x604   : > { %1239 = vrot.lane.b32.xlu1 %v4873_v27, %s4295_s20 }
 0x662   : > { %v1200_v34 = vpop.permute.xlu1 %1199 }
 0x666   : > { %v1192_v35 = vpop.permute.xlu1 %1191 }
 0x66a   : > { %v1202_v14 = vpop.permute.xlu1 %1201 }
 0x66b   : > { %v1203_v28 = vsel %vm531_vm2, %v1200_v34, %v1202_v14  ;;  %v1204_v47 = vsel %vm531_vm2, %v1202_v14, %v1200_v34 }
 0x66c   : > { %v4893_v40 = vmul.f32 %v1203_v28, %v4547_v59  ;;  %v1206_v61 = vmul.f32 %v1204_v47, %v4557_v62 }
 0x66e   : > { %1211 = vrot.lane.b32.xlu0 %v4893_v40, %s4296_s21  ;;  %1235 = vrot.lane.b32.xlu1 %v4893_v40, %s4295_s20  ;;  %v1194_v0 = vpop.permute.xlu1 %1193  ;;  %v1260_v29 = vpack.c.bf16 %v1206_v61, %v4873_v27  ;;  %v1259_v14 = vpack.c.bf16 %v4893_v40, %v4869_v11 }
 0x66f   : > { %v1196_v25 = vsel %vm506_vm1, %v1194_v0, %v1192_v35  ;;  %v1195_v41 = vsel %vm506_vm1, %v1192_v35, %v1194_v0 }
 0x670   : > { %v4905_v31 = vmul.f32 %v1196_v25, %v4524_v49  ;;  %v1198_v13 = vmul.f32 %v1195_v41, %v4528_v51 }
 0x672   : > { %1241 = vrot.lane.b32.xlu1 %v1206_v61, %s4295_s20  ;;  %1207 = vrot.lane.b32.xlu0 %v4905_v31, %s4296_s21  ;;  %v1234_v30 = vpop.permute.xlu1 %1233 }
 0x676   : > { %1231 = vrot.lane.b32.xlu1 %v4905_v31, %s4295_s20  ;;  %1213 = vrot.lane.b32.xlu0 %v1198_v13, %s4296_s21  ;;  %v1240_v39 = vpop.permute.xlu1 %1239 }
 0x677   : > { %v1244_v22 = vsel %vm629_vm3, %v1234_v30, %v1240_v39  ;;  %v1247_v19 = vsel %vm629_vm3, %v1240_v39, %v1234_v30 }
 0x678   : > { %v1251_v8 = vmul.f32 %v1244_v22, %v4603_v20  ;;  %v1252_v56 = vmul.f32 %v1247_v19, %v4606_v21 }
 0x67a   : > { %1237 = vrot.lane.b32.xlu1 %v1198_v13, %s4295_s20 }
 0x67e   : > { %1209 = vrot.lane.b32.xlu1 %v4869_v11, %s4296_s21 }
 0x682   : > { %1217 = vrot.lane.b32.xlu1 %v1206_v61, %s4296_s21 }
 0x686   : > { %1215 = vrot.lane.b32.xlu1 %v4873_v27, %s4296_s21 }
 0x6aa   : > { %v4922_v48 = vpop.f32.mrf.mxu1 }
 0x6ac   : > { %v3893_v52 = vpop.f32.mrf.mxu1 }
 0x6ae   : > { %v968_v1 = vpop.f32.mrf.mxu1 }
 0x6b0   : > { %v3894_v53 = vpop.f32.mrf.mxu1 }
 0x6e0   : > { %v1236_v57 = vpop.permute.xlu1 %1235  ;;  %v1212_v4 = vpop.permute.xlu0 %1211 }
 0x6e4   : > { %v1242_v46 = vpop.permute.xlu1 %1241  ;;  %v1208_v55 = vpop.permute.xlu0 %1207 }
 0x6e5   : > { %v1245_v9 = vsel %vm629_vm3, %v1236_v57, %v1242_v46  ;;  %v1248_v58 = vsel %vm629_vm3, %v1242_v46, %v1236_v57  ;;  %v4970_v57 = vpop.f32.mrf.mxu1 }
 0x6e6   : > { %v1253_v2 = vmul.f32 %v1245_v9, %v4603_v20  ;;  %v1254_v63 = vmul.f32 %v1248_v58, %v4606_v21 }
 0x6e7   : > { %v4972_v46 = vpop.f32.mrf.mxu1 }
 0x6e8   : > { %v1263_v5 = vpack.c.bf16 %v1253_v2, %v1253_v2  ;;  %v1264_v23 = vpack.c.bf16 %v1254_v63, %v1254_v63  ;;  %v1232_v7 = vpop.permute.xlu1 %1231  ;;  %v1214_v32 = vpop.permute.xlu0 %1213 }
 0x6e9   : > { %v1219_v27 = vsel %vm572_vm5, %v1208_v55, %v1214_v32  ;;  %v1222_v0 = vsel %vm572_vm5, %v1214_v32, %v1208_v55  ;;  %v1114_v9 = vpop.f32.mrf.mxu1 }
 0x6ea   : > { %3596 = vmatprep.subr.msk.bf16.mxu1 %vm816_vm6, %v1264_v23  ;;  %v1269_v6 = vsel %vm816_vm6, %v1263_v5, 0  ;;  %v1225_v40 = vmul.f32 %v1222_v0, %v4670_v17  ;;  %v1226_v1 = vmul.f32 %v1219_v27, %v4656_v38  ;;  %v4204_v23 = vld [vmem:[%s5687_s7] sm:$0xff]   ;;  %v4206_v27 = vld [vmem:[%s5687_s7 + $0x10] sm:$0xff]   ;;  %v4207_v0 = vld [vmem:[%s5687_s7 + $0x18] sm:$0xff]  }
 0x6eb   : > { %1281 = vmatpush1.bf16.msra.mxu1 %v1269_v6  ;;  %v1115_v58 = vpop.f32.mrf.mxu1  ;;  %3911 = vmatprep.mubr.bf16.mxu0 %v4204_v23 }
 0x6ec   : > { %v1238_v10 = vpop.permute.xlu1 %1237 }
 0x6ed   : > { %v1243_v12 = vsel %vm629_vm3, %v1232_v7, %v1238_v10  ;;  %v1246_v50 = vsel %vm629_vm3, %v1238_v10, %v1232_v7 }
 0x6ee   : > { %v1249_v54 = vmul.f32 %v1243_v12, %v4603_v20  ;;  %v1250_v60 = vmul.f32 %v1246_v50, %v4606_v21 }
 0x6f0   : > { %v1261_v33 = vpack.c.bf16 %v1251_v8, %v1249_v54  ;;  %v1210_v18 = vpop.permute.xlu1 %1209  ;;  %v1262_v36 = vpack.c.bf16 %v1252_v56, %v1250_v60 }
 0x6f2   : > { %1282 = vmatprep.subr.bf16.mxu1 %v1262_v36 }
 0x6f3   : > { %1283 = vmatpush1.bf16.msra.mxu1 %v1261_v33 }
 0x6f4   : > { %1284 = vmatprep.subr.bf16.mxu1 %v1260_v29  ;;  %v1218_v34 = vpop.permute.xlu1 %1217 }
 0x6f5   : > { %v1221_v35 = vsel %vm572_vm5, %v1212_v4, %v1218_v34  ;;  %v1224_v37 = vsel %vm572_vm5, %v1218_v34, %v1212_v4 }
 0x6f6   : > { %v1229_v28 = vmul.f32 %v1224_v37, %v4670_v17  ;;  %v1230_v47 = vmul.f32 %v1221_v35, %v4656_v38 }
 0x6f7   : > { %1285 = vmatpush1.bf16.msra.mxu1 %v1259_v14 }
 0x6f8   : > { %v1257_v25 = vpack.c.bf16 %v4905_v31, %v1229_v28  ;;  %v1216_v61 = vpop.permute.xlu1 %1215  ;;  %v1258_v41 = vpack.c.bf16 %v1198_v13, %v1230_v47  ;;  %v3595_v13 = vld [vmem:[%s5685_s5 + $0x4] sm:$0xf]  ;;  %v4205_v47 = vld [vmem:[%s5687_s7 + $0x8] sm:$0xff]  }
 0x6f9   : > { %v1220_v52 = vsel %vm572_vm5, %v1210_v18, %v1216_v61  ;;  %v1223_v11 = vsel %vm572_vm5, %v1216_v61, %v1210_v18  ;;  %v4209_v61 = vld [vmem:[%s5687_s7 + $0x28] sm:$0xff]  }
 0x6fa   : > { %v1227_v53 = vmul.f32 %v1223_v11, %v4670_v17  ;;  %v1228_v30 = vmul.f32 %v1220_v52, %v4656_v38  ;;  %1286 = vmatprep.subr.bf16.mxu1 %v1258_v41  ;;  %v4210_v41 = vld [vmem:[%s5687_s7 + $0x30] sm:$0xff]   ;;  %v4211_v52 = vld [vmem:[%s5687_s7 + $0x38] sm:$0xff]   ;;  %v4212_v11 = vld [vmem:[%s5687_s7 + $0x40] sm:$0xff]  }
 0x6fb   : > { %1287 = vmatpush1.bf16.msra.mxu1 %v1257_v25  ;;  %v4208_v25 = vld [vmem:[%s5687_s7 + $0x20] sm:$0xff]  }
 0x6fc   : > { %v1255_v39 = vpack.c.bf16 %v1227_v53, %v1225_v40  ;;  %v1256_v31 = vpack.c.bf16 %v1228_v30, %v1226_v1  ;;  %v4213_v40 = vld [vmem:[%s5687_s7 + $0x48] sm:$0xff]   ;;  %v4214_v1 = vld [vmem:[%s5687_s7 + $0x50] sm:$0xff]   ;;  %v4215_v53 = vld [vmem:[%s5687_s7 + $0x58] sm:$0xff]  }
 0x6fd   : > { %v4216_v30 = vld [vmem:[%s5687_s7 + $0x60] sm:$0xff]  }
 0x6fe   : > { %1288 = vmatprep.subr.bf16.mxu1 %v1256_v31  ;;  %v4218_v31 = vld [vmem:[%s5687_s7 + $0x70] sm:$0xff]  }
 0x6ff   : > { %1289 = vmatpush1.bf16.msra.mxu1 %v1255_v39  ;;  %v4217_v39 = vld [vmem:[%s5687_s7 + $0x68] sm:$0xff]  }
 0x702   : > { %3597 = vmatmul.mubr.msk.bf16.vlgmr.msra.gmra.mxu1 %vm812_vm7, %v3595_v13  ;;  %v4219_v13 = vld [vmem:[%s5687_s7 + $0x78] sm:$0xff]  }
 0x7c2   : > { %v4974_v2 = vpop.f32.mrf.mxu1 }
 0x7c4   : > { %v4976_v63 = vpop.f32.mrf.mxu1 }
 0x7c5   : > { %1356 = vrot.lane.b32.xlu1 %v4976_v63, %s4293_s18  ;;  %1353 = vrot.lane.b32.xlu0 %v4976_v63, %s4302_s29 }
 0x7c6   : > { %v1312_v4 = vpop.f32.mrf.mxu1 }
 0x7c8   : > { %v1313_v5 = vpop.f32.mrf.mxu1 }
 0x7c9   : > { %1350 = vrot.lane.b32.xlu1 %v4976_v63, %s4303_s11  ;;  %1347 = vrot.lane.b32.xlu0 %v4976_v63, %s4304_s12 }
 0x7cd   : > { %1344 = vrot.lane.b32.xlu1 %v4976_v63, %s4305_s13  ;;  %1341 = vrot.lane.b32.xlu0 %v4976_v63, %s4306_s15 }
 0x7d1   : > { %1331 = vrot.lane.b32.xlu1 %v4974_v2, %s4302_s29  ;;  %1338 = vrot.lane.b32.xlu0 %v4976_v63, %s4294_s19 }
 0x7d5   : > { %1325 = vrot.lane.b32.xlu1 %v4974_v2, %s4304_s12  ;;  %1334 = vrot.lane.b32.xlu0 %v4974_v2, %s4293_s18 }
 0x7d9   : > { %1319 = vrot.lane.b32.xlu1 %v4974_v2, %s4306_s15  ;;  %1328 = vrot.lane.b32.xlu0 %v4974_v2, %s4303_s11 }
 0x7dd   : > { %1316 = vrot.lane.b32.xlu1 %v4974_v2, %s4294_s19  ;;  %1322 = vrot.lane.b32.xlu0 %v4974_v2, %s4305_s13 }
 0x837   : > { %v5009_v7 = vpop.permute.xlu1 %1356  ;;  %v5011_v6 = vpop.permute.xlu0 %1353 }
 0x838   : > { %v1414_v22 = vpack.c.bf16 %v5009_v7, %v5011_v6 }
 0x83a   : > { %3895 = vmatprep.subr.bf16.mxu0 %v1414_v22 }
 0x83b   : > { %v5015_v19 = vpop.permute.xlu1 %1350  ;;  %3896 = vmatpush3.bf16.msra.mxu0 %v1414_v22  ;;  %v5017_v10 = vpop.permute.xlu0 %1347 }
 0x83c   : > { %v1413_v12 = vpack.c.bf16 %v5015_v19, %v5017_v10 }
 0x83e   : > { %3897 = vmatprep.subr.bf16.mxu0 %v1413_v12 }
 0x83f   : > { %v5021_v50 = vpop.permute.xlu1 %1344  ;;  %3898 = vmatpush3.bf16.msra.mxu0 %v1413_v12  ;;  %v5023_v8 = vpop.permute.xlu0 %1341 }
 0x840   : > { %v1412_v56 = vpack.c.bf16 %v5021_v50, %v5023_v8 }
 0x842   : > { %3899 = vmatprep.subr.bf16.mxu0 %v1412_v56 }
 0x843   : > { %v5027_v55 = vpop.permute.xlu1 %1331  ;;  %3900 = vmatpush3.bf16.msra.mxu0 %v1412_v56  ;;  %v5029_v54 = vpop.permute.xlu0 %1338 }
 0x844   : > { %v1411_v60 = vpack.c.bf16 %v5029_v54, %v4976_v63 }
 0x846   : > { %3901 = vmatprep.subr.bf16.mxu0 %v1411_v60 }
 0x847   : > { %v5033_v33 = vpop.permute.xlu1 %1325  ;;  %3902 = vmatpush3.bf16.msra.mxu0 %v1411_v60  ;;  %v5035_v18 = vpop.permute.xlu0 %1334 }
 0x848   : > { %v1410_v36 = vpack.c.bf16 %v5035_v18, %v5027_v55 }
 0x84a   : > { %3903 = vmatprep.subr.bf16.mxu0 %v1410_v36 }
 0x84b   : > { %v5039_v29 = vpop.permute.xlu1 %1319  ;;  %3904 = vmatpush3.bf16.msra.mxu0 %v1410_v36  ;;  %v5041_v32 = vpop.permute.xlu0 %1328 }
 0x84c   : > { %v1409_v34 = vpack.c.bf16 %v5041_v32, %v5033_v33 }
 0x84e   : > { %3905 = vmatprep.subr.bf16.mxu0 %v1409_v34 }
 0x84f   : > { %v5045_v35 = vpop.permute.xlu1 %1316  ;;  %3906 = vmatpush3.bf16.msra.mxu0 %v1409_v34  ;;  %v5047_v37 = vpop.permute.xlu0 %1322 }
 0x850   : > { %v1408_v14 = vpack.c.bf16 %v5047_v37, %v5039_v29  ;;  %v1407_v28 = vpack.c.bf16 %v5045_v35, %v4974_v2 }
 0x852   : > { %3907 = vmatprep.subr.bf16.mxu0 %v1408_v14 }
 0x853   : > { %3908 = vmatpush3.bf16.msra.mxu0 %v1408_v14 }
 0x854   : > { %3909 = vmatprep.subr.bf16.mxu0 %v1407_v28 }
 0x857   : > { %3910 = vmatpush3.bf16.msra.mxu0 %v1407_v28 }
 0x85a   : > { %3912 = vmatmul.mubr.bf16.vlgmr.msra.gmra.mxu0 %v4205_v47 }
 0x85b   : > { %3915 = vmatprep.mubr.bf16.mxu0 %v4206_v27 }
 0x862   : > { %3916 = vmatmul.mubr.bf16.gmra.mxu0 %v4207_v0 }
 0x863   : > { %3919 = vmatprep.mubr.bf16.mxu0 %v4208_v25 }
 0x86a   : > { %3920 = vmatmul.mubr.bf16.gmra.mxu0 %v4209_v61 }
 0x86b   : > { %3923 = vmatprep.mubr.bf16.mxu0 %v4210_v41 }
 0x872   : > { %3924 = vmatmul.mubr.bf16.gmra.mxu0 %v4211_v52 }
 0x873   : > { %3927 = vmatprep.mubr.bf16.mxu0 %v4212_v11 }
 0x87a   : > { %3928 = vmatmul.mubr.bf16.gmra.mxu0 %v4213_v40 }
 0x87b   : > { %3931 = vmatprep.mubr.bf16.mxu0 %v4214_v1 }
 0x882   : > { %3932 = vmatmul.mubr.bf16.gmra.mxu0 %v4215_v53 }
 0x883   : > { %3935 = vmatprep.mubr.bf16.mxu0 %v4216_v30 }
 0x88a   : > { %3936 = vmatmul.mubr.bf16.gmra.mxu0 %v4217_v39 }
 0x88b   : > { %3939 = vmatprep.mubr.bf16.mxu0 %v4218_v31 }
 0x892   : > { %3940 = vmatmul.mubr.bf16.gmra.mxu0 %v4219_v13 }
 0x91a   : > { %v3913_v9 = vpop.f32.mrf.mxu0 }
 0x91c   : > { %v1593_v58 = vpop.f32.mrf.mxu0 }
 0x91d   : > { %1784 = vxpose.xlu0.b32.start [1/16] (narrow) %v1593_v58, 16 }
 0x91e   : > { %v3914_v4 = vpop.f32.mrf.mxu0 }
 0x920   : > { %v1596_v5 = vpop.f32.mrf.mxu0 }
 0x921   : > { %1785 = vxpose.xlu0.b32.cont [2/16] (narrow) %v1596_v5, 16 }
 0x922   : > { %v3917_v23 = vpop.f32.mrf.mxu0 }
 0x924   : > { %v1609_v22 = vpop.f32.mrf.mxu0 }
 0x925   : > { %1786 = vxpose.xlu0.b32.cont [3/16] (narrow) %v3913_v9, 16 }
 0x926   : > { %v3918_v12 = vpop.f32.mrf.mxu0 }
 0x928   : > { %v1612_v56 = vpop.f32.mrf.mxu0 }
 0x929   : > { %1787 = vxpose.xlu0.b32.cont [4/16] (narrow) %v3914_v4, 16 }
 0x92a   : > { %v3921_v60 = vpop.f32.mrf.mxu0 }
 0x92c   : > { %v1625_v36 = vpop.f32.mrf.mxu0 }
 0x92d   : > { %1788 = vxpose.xlu0.b32.cont [5/16] (narrow) %v1609_v22, 16 }
 0x92e   : > { %v3922_v34 = vpop.f32.mrf.mxu0 }
 0x930   : > { %v1628_v14 = vpop.f32.mrf.mxu0 }
 0x931   : > { %1789 = vxpose.xlu0.b32.cont [6/16] (narrow) %v1612_v56, 16  ;;  %v4221_v56 = vld [vmem:[%s5687_s7 + $0x88] sm:$0xff]  }
 0x932   : > { %v3925_v28 = vpop.f32.mrf.mxu0 }
 0x934   : > { %v1641_v47 = vpop.f32.mrf.mxu0 }
 0x935   : > { %1790 = vxpose.xlu0.b32.cont [7/16] (narrow) %v3917_v23, 16 }
 0x936   : > { %v3926_v27 = vpop.f32.mrf.mxu0 }
 0x938   : > { %v1644_v0 = vpop.f32.mrf.mxu0 }
 0x939   : > { %1791 = vxpose.xlu0.b32.cont [8/16] (narrow) %v3918_v12, 16  ;;  %v4220_v12 = vld [vmem:[%s5687_s7 + $0x80] sm:$0xff]  }
 0x93a   : > { %v3929_v25 = vpop.f32.mrf.mxu0  ;;  %3943 = vmatprep.mubr.bf16.mxu0 %v4220_v12 }
 0x93b   : > { %3944 = vmatmul.mubr.bf16.gmra.mxu0 %v4221_v56 }
 0x93c   : > { %v1657_v61 = vpop.f32.mrf.mxu0 }
 0x93d   : > { %1792 = vxpose.xlu0.b32.cont [9/16] (narrow) %v1625_v36, 16  ;;  %v4223_v36 = vld [vmem:[%s5687_s7 + $0x98] sm:$0xff]  }
 0x93e   : > { %v3930_v41 = vpop.f32.mrf.mxu0 }
 0x940   : > { %v1660_v52 = vpop.f32.mrf.mxu0 }
 0x941   : > { %1793 = vxpose.xlu0.b32.cont [10/16] (narrow) %v1628_v14, 16  ;;  %v4225_v14 = vld [vmem:[%s5687_s7 + $0xa8] sm:$0xff]  }
 0x942   : > { %v3933_v11 = vpop.f32.mrf.mxu0 }
 0x944   : > { %v1673_v40 = vpop.f32.mrf.mxu0 }
 0x945   : > { %1794 = vxpose.xlu0.b32.cont [11/16] (narrow) %v3921_v60, 16  ;;  %v4222_v60 = vld [vmem:[%s5687_s7 + $0x90] sm:$0xff]  }
 0x946   : > { %v3934_v1 = vpop.f32.mrf.mxu0  ;;  %3947 = vmatprep.mubr.bf16.mxu0 %v4222_v60 }
 0x947   : > { %3948 = vmatmul.mubr.bf16.gmra.mxu0 %v4223_v36 }
 0x948   : > { %v1676_v53 = vpop.f32.mrf.mxu0 }
 0x949   : > { %1795 = vxpose.xlu0.b32.cont [12/16] (narrow) %v3922_v34, 16  ;;  %v4224_v34 = vld [vmem:[%s5687_s7 + $0xa0] sm:$0xff]  }
 0x94a   : > { %v3937_v30 = vpop.f32.mrf.mxu0  ;;  %3951 = vmatprep.mubr.bf16.mxu0 %v4224_v34 }
 0x94c   : > { %v1689_v39 = vpop.f32.mrf.mxu0 }
 0x94d   : > { %1796 = vxpose.xlu0.b32.cont [13/16] (narrow) %v1641_v47, 16 }
 0x94e   : > { %v3938_v31 = vpop.f32.mrf.mxu0 }
 0x94f   : > { %3952 = vmatmul.mubr.bf16.gmra.mxu0 %v4225_v14 }
 0x950   : > { %v1692_v13 = vpop.f32.mrf.mxu0 }
 0x951   : > { %1797 = vxpose.xlu0.b32.cont [14/16] (narrow) %v1644_v0, 16 }
 0x952   : > { %v3941_v9 = vpop.f32.mrf.mxu0 }
 0x954   : > { %v1705_v58 = vpop.f32.mrf.mxu0 }
 0x955   : > { %1798 = vxpose.xlu0.b32.cont [15/16] (narrow) %v3925_v28, 16  ;;  %v4226_v28 = vld [vmem:[%s5687_s7 + $0xb0] sm:$0xff]  }
 0x956   : > { %v3942_v4 = vpop.f32.mrf.mxu0  ;;  %3955 = vmatprep.mubr.bf16.mxu0 %v4226_v28 }
 0x957   : > { %3959 = vmatprep.subr.mxu1 %v3942_v4 }
 0x958   : > { %3960 = vmatpush3.msra.mxu1 %v3942_v4  ;;  %v1708_v5 = vpop.f32.mrf.mxu0  ;;  %v5130_v4 = vld [vmem:[%s5683_s3] sm:$0xff] }
 0x959   : > { %1799 = vxpose.xlu0.b32.end [16/16] (narrow) %v3926_v27, 16  ;;  %3961 = vmatprep.subr.mxu1 %v3941_v9 }
 0x95a   : > { %3962 = vmatpush3.msra.mxu1 %v3941_v9 }
 0x95b   : > { %3963 = vmatprep.subr.mxu1 %v1708_v5 }
 0x95c   : > { %3964 = vmatpush3.msra.mxu1 %v1708_v5 }
 0x95d   : > { %3965 = vmatprep.subr.mxu1 %v1705_v58 }
 0x95e   : > { %3966 = vmatpush3.msra.mxu1 %v1705_v58 }
 0x95f   : > { %3967 = vmatprep.subr.mxu1 %v3938_v31 }
 0x960   : > { %3968 = vmatpush3.msra.mxu1 %v3938_v31 }
 0x961   : > { %3969 = vmatprep.subr.mxu1 %v3937_v30 }
 0x962   : > { %3970 = vmatpush3.msra.mxu1 %v3937_v30 }
 0x963   : > { %3971 = vmatprep.subr.mxu1 %v1692_v13 }
 0x964   : > { %3972 = vmatpush3.msra.mxu1 %v1692_v13 }
 0x965   : > { %3973 = vmatprep.subr.mxu1 %v1689_v39 }
 0x966   : > { %3974 = vmatpush3.msra.mxu1 %v1689_v39 }
 0x967   : > { %3975 = vmatprep.subr.mxu1 %v3934_v1 }
 0x968   : > { %3976 = vmatpush3.msra.mxu1 %v3934_v1 }
 0x969   : > { %3977 = vmatprep.subr.mxu1 %v3933_v11 }
 0x96a   : > { %3978 = vmatpush3.msra.mxu1 %v3933_v11 }
 0x96b   : > { %3979 = vmatprep.subr.mxu1 %v1676_v53 }
 0x96c   : > { %3980 = vmatpush3.msra.mxu1 %v1676_v53 }
 0x96d   : > { %3981 = vmatprep.subr.mxu1 %v1673_v40 }
 0x96e   : > { %3982 = vmatpush3.msra.mxu1 %v1673_v40 }
 0x96f   : > { %3983 = vmatprep.subr.mxu1 %v3930_v41 }
 0x970   : > { %3984 = vmatpush3.msra.mxu1 %v3930_v41 }
 0x971   : > { %3985 = vmatprep.subr.mxu1 %v3929_v25 }
 0x972   : > { %3986 = vmatpush3.msra.mxu1 %v3929_v25 }
 0x973   : > { %3987 = vmatprep.subr.mxu1 %v1660_v52 }
 0x974   : > { %3988 = vmatpush3.msra.mxu1 %v1660_v52 }
 0x975   : > { %3989 = vmatprep.subr.mxu1 %v1657_v61 }
 0x976   : > { %3990 = vmatpush3.msra.mxu1 %v1657_v61  ;;  %v4227_v61 = vld [vmem:[%s5687_s7 + $0xb8] sm:$0xff]  }
 0x977   : > { %3956 = vmatmul.mubr.bf16.gmra.mxu0 %v4227_v61 }
 0x999   : > { %v1800_v23 = vpop.trf.xlu0 }
 0x99a   : > { %3991 = vmatprep.mubr.f32.mxu1 %v1800_v23 }
 0x99d   : > { %v1801_v22 = vpop.trf.xlu0 }
 0x99e   : > { %3992 = vmatmul.mubr.f32.vlgmr.msra.gmra.mxu1 %v1801_v22 }
 0x9fb   : > { %v3945_v9 = vpop.f32.mrf.mxu0 }
 0x9fd   : > { %v1721_v58 = vpop.f32.mrf.mxu0 }
 0x9fe   : > { %3998 = vmatprep.mubr.msk.f32.mxu1 %vm690_vm4, %v1721_v58 }
 0x9ff   : > { %v3946_v5 = vpop.f32.mrf.mxu0 }
 0xa01   : > { %v1724_v22 = vpop.f32.mrf.mxu0 }
 0xa07   : > { %v3949_v56 = vpop.f32.mrf.mxu0 }
 0xa09   : > { %v1737_v60 = vpop.f32.mrf.mxu0 }
 0xa0b   : > { %v3950_v36 = vpop.f32.mrf.mxu0 }
 0xa0d   : > { %v1740_v28 = vpop.f32.mrf.mxu0 }
 0xa5e   : > { %v3993_v47 = vpop.f32.mrf.mxu1 }
 0xa5f   : > { %v1894_v27 = vsel %vm690_vm4, %v3993_v47, -inf }
 0xa60   : > { %1895 = vmax.xlane.f32.xlu1 %v1894_v27  ;;  %v1882_v0 = vpop.f32.mrf.mxu1 }
 0xa61   : > { %v1891_v25 = vsel %vm690_vm4, %v1882_v0, -inf }
 0xa64   : > { %1892 = vmax.xlane.f32.xlu1 %v1891_v25 }
 0xae9   : > { %v1896_v41 = vpop.xlane.xlu1 %1895 }
 0xaea   : > { %v1898_v52 = vsub.f32 %v3993_v47, %v1896_v41 }
 0xaec   : > { %v1901_v11 = vmul.f32 1.442695, %v1898_v52 }
 0xaed   : > { %v1893_v40 = vpop.xlane.xlu1 %1892 }
 0xaee   : > { %4252 = vpow2.f32 %v1901_v11  ;;  %v1897_v1 = vsub.f32 %v1882_v0, %v1893_v40  ;;  %v3953_v0 = vpop.f32.mrf.mxu0 }
 0xaf0   : > { %v1899_v53 = vmul.f32 1.442695, %v1897_v1  ;;  %v1753_v25 = vpop.f32.mrf.mxu0 }
 0xaf2   : > { %4254 = vpow2.f32 %v1899_v53  ;;  %v3954_v61 = vpop.f32.mrf.mxu0 }
 0xaf4   : > { %v1756_v41 = vpop.f32.mrf.mxu0 }
 0xaf6   : > { %v3957_v52 = vpop.f32.mrf.mxu0 }
 0xaf8   : > { %v1769_v40 = vpop.f32.mrf.mxu0 }
 0xafa   : > { %v3958_v1 = vpop.f32.mrf.mxu0 }
 0xafb   : > { %v4253_v30 = vpop.eup %4252 }
 0xafc   : > { %v1906_v39 = vsel %vm690_vm4, %v4253_v30, 0.0  ;;  %v1772_v53 = vpop.f32.mrf.mxu0 }
 0xafd   : > { %1907 = vadd.xlane.f32.xlu1 %v1906_v39 }
 0xaff   : > { %v4255_v31 = vpop.eup %4254 }
 0xb00   : > { %v1903_v13 = vsel %vm690_vm4, %v4255_v31, 0.0 }
 0xb01   : > { %1904 = vadd.xlane.f32.xlu1 %v1903_v13 }
 0xb12   : > { %2112 = vrot.lane.b32.xlu1 %v5130_v4, %s4307_s17  ;;  %s4309_s17 = smov 113  }
 0xb86   : > { %v1908_v23 = vpop.xlane.xlu1 %1907 }
 0xb87   : > { %4256 = vrcp.f32 %v1908_v23 }
 0xb8a   : > { %v1905_v12 = vpop.xlane.xlu1 %1904 }
 0xb8b   : > { %4258 = vrcp.f32 %v1905_v12 }
 0xb8e   : > { %v2113_v11 = vpop.permute.xlu1 %2112 }
 0xb8f   : > { %4149 = vpush %v2113_v11 }
 0xb94   : > { %v4257_v34 = vpop.eup %4256 }
 0xb95   : > { %v1912_v14 = vmul.f32 %v4257_v34, %v4253_v30  ;;  %v4228_v30 = vld [vmem:[%s5687_s7 + $0xc0] sm:$0xff]  }
 0xb97   : > { %3994 = vmatprep.subr.msk.mxu1 %vm690_vm4, %v1912_v14 }
 0xb98   : > { %v4259_v47 = vpop.eup %4258  ;;  %3995 = vmatpush3.xpose.msk.msra.mxu1 %vm690_vm4, %v1912_v14 }
 0xb99   : > { %v1910_v27 = vmul.f32 %v4259_v47, %v4255_v31 }
 0xb9b   : > { %3996 = vmatprep.subr.msk.mxu1 %vm690_vm4, %v1910_v27 }
 0xb9c   : > { %3997 = vmatpush3.xpose.msk.msra.mxu1 %vm690_vm4, %v1910_v27 }
 0xb9f   : > { %3999 = vmatmul.mubr.msk.f32.vlgmr.msra.gmra.mxu1 %vm690_vm4, %v1724_v22 }
 0xba0   : > { %4001 = vmatprep.mubr.msk.f32.mxu1 %vm690_vm4, %v3945_v9 }
 0xba3   : > { %4002 = vmatmul.mubr.msk.f32.gmra.mxu1 %vm690_vm4, %v3946_v5 }
 0xba4   : > { %4004 = vmatprep.mubr.msk.f32.mxu1 %vm690_vm4, %v1737_v60 }
 0xba7   : > { %4005 = vmatmul.mubr.msk.f32.gmra.mxu1 %vm690_vm4, %v1740_v28 }
 0xba8   : > { %4007 = vmatprep.mubr.msk.f32.mxu1 %vm690_vm4, %v3949_v56 }
 0xbab   : > { %4008 = vmatmul.mubr.msk.f32.gmra.mxu1 %vm690_vm4, %v3950_v36 }
 0xbac   : > { %4010 = vmatprep.mubr.msk.f32.mxu1 %vm690_vm4, %v1753_v25 }
 0xbaf   : > { %4011 = vmatmul.mubr.msk.f32.gmra.mxu1 %vm690_vm4, %v1756_v41 }
 0xbb0   : > { %4013 = vmatprep.mubr.msk.f32.mxu1 %vm690_vm4, %v3953_v0 }
 0xbb3   : > { %4014 = vmatmul.mubr.msk.f32.gmra.mxu1 %vm690_vm4, %v3954_v61 }
 0xbb4   : > { %4016 = vmatprep.mubr.msk.f32.mxu1 %vm690_vm4, %v1769_v40 }
 0xbb7   : > { %4017 = vmatmul.mubr.msk.f32.gmra.mxu1 %vm690_vm4, %v1772_v53 }
 0xbb8   : > { %4019 = vmatprep.mubr.msk.f32.mxu1 %vm690_vm4, %v3957_v52 }
 0xbbb   : > { %4020 = vmatmul.mubr.msk.f32.gmra.mxu1 %vm690_vm4, %v3958_v1 }
 0xbbc   : > { %4038 = vmatprep.mubr.bf16.mxu1 %v4228_v30 }
 0xbc0   : > { %s4150_s23 = spop %4149 }
 0xbc1   : > { %v2115_v28 = vstv %s4150_s23 }
 0xc5f   : > { %v4000_v39 = vpop.f32.mrf.mxu1 }
 0xc61   : > { %v2033_v31 = vpop.f32.mrf.mxu1 }
 0xc63   : > { %v4003_v13 = vpop.f32.mrf.mxu1 }
 0xc65   : > { %v2043_v9 = vpop.f32.mrf.mxu1 }
 0xc67   : > { %v4006_v58 = vpop.f32.mrf.mxu1 }
 0xc69   : > { %v2053_v5 = vpop.f32.mrf.mxu1 }
 0xc6b   : > { %v4009_v23 = vpop.f32.mrf.mxu1 }
 0xc6d   : > { %v2063_v22 = vpop.f32.mrf.mxu1 }
 0xc6f   : > { %v4012_v12 = vpop.f32.mrf.mxu1 }
 0xc71   : > { %v2073_v56 = vpop.f32.mrf.mxu1 }
 0xc73   : > { %v4015_v60 = vpop.f32.mrf.mxu1 }
 0xc74   : > { %v2128_v53 = vmul.f32 %v4015_v60, %v2115_v28  ;;  %v2123_v60 = vmul.f32 %v2115_v28, %v2063_v22  ;;  %v2122_v22 = vmul.f32 %v4006_v58, %v2115_v28 }
 0xc75   : > { %v2083_v36 = vpop.f32.mrf.mxu1 }
 0xc76   : > { %v2127_v52 = vmul.f32 %v2115_v28, %v2083_v36 }
 0xc77   : > { %v4018_v34 = vpop.f32.mrf.mxu1 }
 0xc78   : > { %v2130_v61 = vmul.f32 %v4018_v34, %v2115_v28  ;;  %v5170_v34 = vadd.f32 %v2127_v52, %v5023_v8  ;;  %v2124_v8 = vmul.f32 %v4009_v23, %v2115_v28  ;;  %v4236_v52 = vld [vmem:[%s5687_s7 + $0x100] sm:$0xff]  }
 0xc79   : > { %v2093_v14 = vpop.f32.mrf.mxu1 }
 0xc7a   : > { %v2129_v27 = vmul.f32 %v2115_v28, %v2093_v14  ;;  %v5165_v30 = vadd.f32 %v2130_v61, %v5015_v19 }
 0xc7b   : > { %v4021_v47 = vpop.f32.mrf.mxu1 }
 0xc7c   : > { %v2132_v0 = vmul.f32 %v4021_v47, %v2115_v28  ;;  %v5156_v11 = vadd.f32 %v2129_v27, %v5017_v10  ;;  %v2125_v47 = vmul.f32 %v2115_v28, %v2073_v56  ;;  %v2121_v27 = vmul.f32 %v2115_v28, %v2053_v5 }
 0xc7d   : > { %v2103_v25 = vpop.f32.mrf.mxu1  ;;  %v2120_v5 = vmul.f32 %v4003_v13, %v2115_v28  ;;  %v4233_v13 = vld [vmem:[%s5687_s7 + $0xe8] sm:$0xff]  }
 0xc7e   : > { %v2131_v41 = vmul.f32 %v2115_v28, %v2103_v25  ;;  %v5159_v40 = vadd.f32 %v2132_v0, %v5009_v7  ;;  %v2204_v10 = vpack.c.bf16 %v5165_v30, %v5156_v11  ;;  %v2126_v7 = vmul.f32 %v4012_v12, %v2115_v28 }
 0xc7f   : > { %v5178_v19 = vadd.f32 %v2125_v47, %v4976_v63  ;;  %v5186_v12 = vadd.f32 %v2123_v60, %v5027_v55  ;;  %v5191_v63 = vadd.f32 %v2124_v8, %v5035_v18  ;;  %v2119_v0 = vmul.f32 %v2115_v28, %v2043_v9  ;;  %v4239_v47 = vld [vmem:[%s5687_s7 + $0x118] sm:$0xff]   ;;  %v4242_v60 = vld [vmem:[%s5687_s7 + $0x130] sm:$0xff]  }
 0xc80   : > { %v5162_v1 = vadd.f32 %v2131_v41, %v5011_v6  ;;  %v5175_v6 = vadd.f32 %v2128_v53, %v5021_v50  ;;  %v5183_v36 = vadd.f32 %v2126_v7, %v5029_v54  ;;  %v5194_v23 = vadd.f32 %v2121_v27, %v5033_v33  ;;  %v4235_v41 = vld [vmem:[%s5687_s7 + $0xf8] sm:$0xff]   ;;  %v4237_v53 = vld [vmem:[%s5687_s7 + $0x108] sm:$0xff]  }
 0xc81   : > { %v2201_v54 = vpack.c.bf16 %v5191_v63, %v5186_v12  ;;  %v5199_v55 = vadd.f32 %v2122_v22, %v5041_v32  ;;  %v2117_v25 = vmul.f32 %v2115_v28, %v2033_v31  ;;  %v5202_v58 = vadd.f32 %v2119_v0, %v5039_v29  ;;  %v4241_v7 = vld [vmem:[%s5687_s7 + $0x128] sm:$0xff]  }
 0xc82   : > { %v2205_v14 = vpack.c.bf16 %v5159_v40, %v5162_v1  ;;  %v2203_v56 = vpack.c.bf16 %v5175_v6, %v5170_v34  ;;  %v2202_v50 = vpack.c.bf16 %v5183_v36, %v5178_v19  ;;  %v2118_v9 = vmul.f32 %v4000_v39, %v2115_v28  ;;  %v4232_v39 = vld [vmem:[%s5687_s7 + $0xe0] sm:$0xff]   ;;  %v4234_v28 = vld [vmem:[%s5687_s7 + $0xf0] sm:$0xff]  }
 0xc83   : > { %v2200_v18 = vpack.c.bf16 %v5199_v55, %v5194_v23  ;;  %v5207_v33 = vadd.f32 %v2120_v5, %v5047_v37  ;;  %v5210_v61 = vadd.f32 %v2117_v25, %v4974_v2  ;;  %v4229_v37 = vld [vmem:[%s5687_s7 + $0xc8] sm:$0xff]   ;;  %v4230_v2 = vld [vmem:[%s5687_s7 + $0xd0] sm:$0xff]  }
 0xc84   : > { %4022 = vmatprep.subr.bf16.mxu1 %v2205_v14  ;;  %v5215_v31 = vadd.f32 %v2118_v9, %v5045_v35  ;;  %v4231_v35 = vld [vmem:[%s5687_s7 + $0xd8] sm:$0xff]  }
 0xc85   : > { %4023 = vmatpush3.bf16.msra.mxu1 %v2205_v14  ;;  %v2199_v32 = vpack.c.bf16 %v5207_v33, %v5202_v58  ;;  %v4238_v14 = vld [vmem:[%s5687_s7 + $0x110] sm:$0xff]  }
 0xc86   : > { %4024 = vmatprep.subr.bf16.mxu1 %v2204_v10  ;;  %v2198_v29 = vpack.c.bf16 %v5215_v31, %v5210_v61 }
 0xc89   : > { %4025 = vmatpush3.bf16.msra.mxu1 %v2204_v10  ;;  %v4240_v10 = vld [vmem:[%s5687_s7 + $0x120] sm:$0xff]  }
 0xc8a   : > { %4026 = vmatprep.subr.bf16.mxu1 %v2203_v56 }
 0xc8d   : > { %4027 = vmatpush3.bf16.msra.mxu1 %v2203_v56  ;;  %v4243_v56 = vld [vmem:[%s5687_s7 + $0x138] sm:$0xff]  }
 0xc8e   : > { %4028 = vmatprep.subr.bf16.mxu1 %v2202_v50 }
 0xc91   : > { %4029 = vmatpush3.bf16.msra.mxu1 %v2202_v50 }
 0xc92   : > { %4030 = vmatprep.subr.bf16.mxu1 %v2201_v54 }
 0xc95   : > { %4031 = vmatpush3.bf16.msra.mxu1 %v2201_v54 }
 0xc96   : > { %4032 = vmatprep.subr.bf16.mxu1 %v2200_v18 }
 0xc99   : > { %4033 = vmatpush3.bf16.msra.mxu1 %v2200_v18 }
 0xc9a   : > { %4034 = vmatprep.subr.bf16.mxu1 %v2199_v32 }
 0xc9d   : > { %4035 = vmatpush3.bf16.msra.mxu1 %v2199_v32 }
 0xc9e   : > { %4036 = vmatprep.subr.bf16.mxu1 %v2198_v29 }
 0xca1   : > { %4037 = vmatpush3.bf16.msra.mxu1 %v2198_v29 }
 0xca4   : > { %4039 = vmatmul.mubr.bf16.vlgmr.msra.gmra.mxu1 %v4229_v37 }
 0xca5   : > { %4042 = vmatprep.mubr.bf16.mxu1 %v4230_v2 }
 0xcac   : > { %4043 = vmatmul.mubr.bf16.gmra.mxu1 %v4231_v35 }
 0xcad   : > { %4046 = vmatprep.mubr.bf16.mxu1 %v4232_v39 }
 0xcb4   : > { %4047 = vmatmul.mubr.bf16.gmra.mxu1 %v4233_v13 }
 0xcb5   : > { %4050 = vmatprep.mubr.bf16.mxu1 %v4234_v28 }
 0xcbc   : > { %4051 = vmatmul.mubr.bf16.gmra.mxu1 %v4235_v41 }
 0xcbd   : > { %4054 = vmatprep.mubr.bf16.mxu1 %v4236_v52 }
 0xcc4   : > { %4055 = vmatmul.mubr.bf16.gmra.mxu1 %v4237_v53 }
 0xcc5   : > { %4058 = vmatprep.mubr.bf16.mxu1 %v4238_v14 }
 0xccc   : > { %4059 = vmatmul.mubr.bf16.gmra.mxu1 %v4239_v47 }
 0xccd   : > { %4062 = vmatprep.mubr.bf16.mxu1 %v4240_v10 }
 0xcd4   : > { %4063 = vmatmul.mubr.bf16.gmra.mxu1 %v4241_v7 }
 0xcd5   : > { %4066 = vmatprep.mubr.bf16.mxu1 %v4242_v60 }
 0xcdc   : > { %4067 = vmatmul.mubr.bf16.gmra.mxu1 %v4243_v56 }
 0xd64   : > { %v4040_v8 = vpop.f32.mrf.mxu1 }
 0xd66   : > { %v2384_v27 = vpop.f32.mrf.mxu1 }
 0xd67   : > { %2575 = vxpose.xlu1.b32.start [1/16] (narrow) %v2384_v27, 16 }
 0xd68   : > { %v4041_v50 = vpop.f32.mrf.mxu1 }
 0xd6a   : > { %v2387_v22 = vpop.f32.mrf.mxu1 }
 0xd6b   : > { %2576 = vxpose.xlu1.b32.cont [2/16] (narrow) %v2387_v22, 16 }
 0xd6c   : > { %v4044_v0 = vpop.f32.mrf.mxu1 }
 0xd6e   : > { %v2400_v54 = vpop.f32.mrf.mxu1 }
 0xd6f   : > { %2577 = vxpose.xlu1.b32.cont [3/16] (narrow) %v4040_v8, 16 }
 0xd70   : > { %v4045_v5 = vpop.f32.mrf.mxu1 }
 0xd72   : > { %v2403_v25 = vpop.f32.mrf.mxu1 }
 0xd73   : > { %2578 = vxpose.xlu1.b32.cont [4/16] (narrow) %v4041_v50, 16 }
 0xd74   : > { %v4048_v18 = vpop.f32.mrf.mxu1 }
 0xd76   : > { %v2416_v9 = vpop.f32.mrf.mxu1 }
 0xd77   : > { %2579 = vxpose.xlu1.b32.cont [5/16] (narrow) %v2400_v54, 16 }
 0xd78   : > { %v4049_v32 = vpop.f32.mrf.mxu1 }
 0xd7a   : > { %v2419_v29 = vpop.f32.mrf.mxu1 }
 0xd7b   : > { %2580 = vxpose.xlu1.b32.cont [6/16] (narrow) %v2403_v25, 16  ;;  %v4244_v25 = vld [vmem:[%s5687_s7 + $0x140] sm:$0xff]  }
 0xd7c   : > { %v4052_v37 = vpop.f32.mrf.mxu1  ;;  %4070 = vmatprep.mubr.bf16.mxu1 %v4244_v25 }
 0xd7e   : > { %v2432_v2 = vpop.f32.mrf.mxu1 }
 0xd7f   : > { %2581 = vxpose.xlu1.b32.cont [7/16] (narrow) %v4044_v0, 16 }
 0xd80   : > { %v4053_v35 = vpop.f32.mrf.mxu1 }
 0xd82   : > { %v2435_v39 = vpop.f32.mrf.mxu1 }
 0xd83   : > { %2582 = vxpose.xlu1.b32.cont [8/16] (narrow) %v4045_v5, 16 }
 0xd84   : > { %v4056_v13 = vpop.f32.mrf.mxu1 }
 0xd86   : > { %v2448_v28 = vpop.f32.mrf.mxu1 }
 0xd87   : > { %2583 = vxpose.xlu1.b32.cont [9/16] (narrow) %v2416_v9, 16  ;;  %v4246_v9 = vld [vmem:[%s5687_s7 + $0x150] sm:$0xff]  }
 0xd88   : > { %v4057_v41 = vpop.f32.mrf.mxu1 }
 0xd8a   : > { %v2451_v52 = vpop.f32.mrf.mxu1 }
 0xd8b   : > { %2584 = vxpose.xlu1.b32.cont [10/16] (narrow) %v2419_v29, 16  ;;  %v4248_v29 = vld [vmem:[%s5687_s7 + $0x160] sm:$0xff]  }
 0xd8c   : > { %v4060_v53 = vpop.f32.mrf.mxu1 }
 0xd8e   : > { %v2464_v14 = vpop.f32.mrf.mxu1 }
 0xd8f   : > { %2585 = vxpose.xlu1.b32.cont [11/16] (narrow) %v4048_v18, 16  ;;  %v4245_v18 = vld [vmem:[%s5687_s7 + $0x148] sm:$0xff]  }
 0xd90   : > { %v4061_v47 = vpop.f32.mrf.mxu1  ;;  %4071 = vmatmul.mubr.bf16.gmra.mxu1 %v4245_v18 }
 0xd91   : > { %4074 = vmatprep.mubr.bf16.mxu1 %v4246_v9 }
 0xd92   : > { %v2467_v10 = vpop.f32.mrf.mxu1 }
 0xd93   : > { %2586 = vxpose.xlu1.b32.cont [12/16] (narrow) %v4049_v32, 16  ;;  %v4247_v32 = vld [vmem:[%s5687_s7 + $0x158] sm:$0xff]  }
 0xd94   : > { %v4064_v7 = vpop.f32.mrf.mxu1 }
 0xd96   : > { %v2480_v60 = vpop.f32.mrf.mxu1 }
 0xd97   : > { %2587 = vxpose.xlu1.b32.cont [13/16] (narrow) %v2432_v2, 16  ;;  %v4250_v2 = vld [vmem:[%s5687_s7 + $0x170] sm:$0xff]  }
 0xd98   : > { %v4065_v56 = vpop.f32.mrf.mxu1  ;;  %4075 = vmatmul.mubr.bf16.gmra.mxu1 %v4247_v32 }
 0xd99   : > { %4078 = vmatprep.mubr.bf16.mxu1 %v4248_v29 }
 0xd9a   : > { %v2483_v8 = vpop.f32.mrf.mxu1 }
 0xd9b   : > { %2588 = vxpose.xlu1.b32.cont [14/16] (narrow) %v2435_v39, 16 }
 0xd9c   : > { %v4068_v27 = vpop.f32.mrf.mxu1 }
 0xd9e   : > { %v2496_v50 = vpop.f32.mrf.mxu1 }
 0xd9f   : > { %2589 = vxpose.xlu1.b32.cont [15/16] (narrow) %v4052_v37, 16  ;;  %v4249_v37 = vld [vmem:[%s5687_s7 + $0x168] sm:$0xff]  }
 0xda0   : > { %v4069_v22 = vpop.f32.mrf.mxu1  ;;  %4079 = vmatmul.mubr.bf16.gmra.mxu1 %v4249_v37 }
 0xda1   : > { %4086 = vmatprep.subr.mxu0 %v4069_v22  ;;  %4082 = vmatprep.mubr.bf16.mxu1 %v4250_v2 }
 0xda2   : > { %4087 = vmatpush3.msra.mxu0 %v4069_v22  ;;  %v2499_v0 = vpop.f32.mrf.mxu1 }
 0xda3   : > { %2590 = vxpose.xlu1.b32.end [16/16] (narrow) %v4053_v35, 16  ;;  %4088 = vmatprep.subr.mxu0 %v4068_v27 }
 0xda4   : > { %4089 = vmatpush3.msra.mxu0 %v4068_v27 }
 0xda5   : > { %4090 = vmatprep.subr.mxu0 %v2499_v0 }
 0xda6   : > { %4091 = vmatpush3.msra.mxu0 %v2499_v0 }
 0xda7   : > { %4092 = vmatprep.subr.mxu0 %v2496_v50 }
 0xda8   : > { %4093 = vmatpush3.msra.mxu0 %v2496_v50 }
 0xda9   : > { %4094 = vmatprep.subr.mxu0 %v4065_v56 }
 0xdaa   : > { %4095 = vmatpush3.msra.mxu0 %v4065_v56 }
 0xdab   : > { %4096 = vmatprep.subr.mxu0 %v4064_v7 }
 0xdac   : > { %4097 = vmatpush3.msra.mxu0 %v4064_v7 }
 0xdad   : > { %4098 = vmatprep.subr.mxu0 %v2483_v8 }
 0xdae   : > { %4099 = vmatpush3.msra.mxu0 %v2483_v8 }
 0xdaf   : > { %4100 = vmatprep.subr.mxu0 %v2480_v60 }
 0xdb0   : > { %4101 = vmatpush3.msra.mxu0 %v2480_v60 }
 0xdb1   : > { %4102 = vmatprep.subr.mxu0 %v4061_v47 }
 0xdb2   : > { %4103 = vmatpush3.msra.mxu0 %v4061_v47 }
 0xdb3   : > { %4104 = vmatprep.subr.mxu0 %v4060_v53 }
 0xdb4   : > { %4105 = vmatpush3.msra.mxu0 %v4060_v53 }
 0xdb5   : > { %4106 = vmatprep.subr.mxu0 %v2467_v10 }
 0xdb6   : > { %4107 = vmatpush3.msra.mxu0 %v2467_v10 }
 0xdb7   : > { %4108 = vmatprep.subr.mxu0 %v2464_v14 }
 0xdb8   : > { %4109 = vmatpush3.msra.mxu0 %v2464_v14 }
 0xdb9   : > { %4110 = vmatprep.subr.mxu0 %v4057_v41 }
 0xdba   : > { %4111 = vmatpush3.msra.mxu0 %v4057_v41  ;;  %v4251_v41 = vld [vmem:[%s5687_s7 + $0x178] sm:$0xff]  }
 0xdbb   : > { %4112 = vmatprep.subr.mxu0 %v4056_v13  ;;  %4083 = vmatmul.mubr.bf16.gmra.mxu1 %v4251_v41 }
 0xdbc   : > { %4113 = vmatpush3.msra.mxu0 %v4056_v13  ;;  %3286 = vmatprep.mubr.bf16.mxu1 %v4290_v3 }
 0xdbd   : > { %4114 = vmatprep.subr.mxu0 %v2451_v52 }
 0xdbe   : > { %4115 = vmatpush3.msra.mxu0 %v2451_v52  ;;  %v4308_v52 = vmov 13  }
 0xdbf   : > { %4116 = vmatprep.subr.mxu0 %v2448_v28  ;;  %4194 = vset.pattern.permute.xlu0 %v4308_v52 }
 0xdc0   : > { %4117 = vmatpush3.msra.mxu0 %v2448_v28 }
 0xde3   : > { %v2591_v54 = vpop.trf.xlu1 }
 0xde4   : > { %4118 = vmatprep.mubr.f32.mxu0 %v2591_v54 }
 0xde7   : > { %v2592_v5 = vpop.trf.xlu1 }
 0xde8   : > { %4119 = vmatmul.mubr.f32.vlgmr.msra.gmra.mxu0 %v2592_v5 }
 0xe50   : > { %v4072_v22 = vpop.f32.mrf.mxu1 }
 0xe52   : > { %v2512_v0 = vpop.f32.mrf.mxu1 }
 0xe53   : > { %4125 = vmatprep.mubr.msk.f32.mxu0 %vm690_vm4, %v2512_v0 }
 0xe54   : > { %v4073_v54 = vpop.f32.mrf.mxu1 }
 0xe56   : > { %v2515_v25 = vpop.f32.mrf.mxu1 }
 0xe58   : > { %v4076_v9 = vpop.f32.mrf.mxu1 }
 0xe5a   : > { %v2528_v29 = vpop.f32.mrf.mxu1 }
 0xe5c   : > { %v4077_v37 = vpop.f32.mrf.mxu1 }
 0xea8   : > { %v4120_v35 = vpop.f32.mrf.mxu0 }
 0xea9   : > { %v2685_v39 = vsel %vm690_vm4, %v4120_v35, -inf }
 0xeaa   : > { %2686 = vmax.xlane.f32.xlu0 %v2685_v39  ;;  %v2673_v13 = vpop.f32.mrf.mxu0  ;;  %v2531_v39 = vpop.f32.mrf.mxu1 }
 0xeab   : > { %v2682_v28 = vsel %vm690_vm4, %v2673_v13, -inf }
 0xeac   : > { %v4080_v41 = vpop.f32.mrf.mxu1 }
 0xeae   : > { %2683 = vmax.xlane.f32.xlu0 %v2682_v28  ;;  %v2544_v52 = vpop.f32.mrf.mxu1 }
 0xf33   : > { %v2687_v53 = vpop.xlane.xlu0 %2686 }
 0xf34   : > { %v2689_v14 = vsub.f32 %v4120_v35, %v2687_v53  ;;  %v4081_v53 = vpop.f32.mrf.mxu1 }
 0xf36   : > { %v2692_v47 = vmul.f32 1.442695, %v2689_v14  ;;  %v2547_v14 = vpop.f32.mrf.mxu1 }
 0xf37   : > { %v2684_v10 = vpop.xlane.xlu0 %2683 }
 0xf38   : > { %4260 = vpow2.f32 %v2692_v47  ;;  %v2688_v7 = vsub.f32 %v2673_v13, %v2684_v10  ;;  %v4084_v47 = vpop.f32.mrf.mxu1 }
 0xf3a   : > { %v2690_v60 = vmul.f32 1.442695, %v2688_v7  ;;  %v2560_v10 = vpop.f32.mrf.mxu1 }
 0xf3c   : > { %4262 = vpow2.f32 %v2690_v60  ;;  %v4085_v7 = vpop.f32.mrf.mxu1 }
 0xf3e   : > { %v2563_v60 = vpop.f32.mrf.mxu1 }
 0xf45   : > { %v4261_v56 = vpop.eup %4260 }
 0xf46   : > { %v2697_v8 = vsel %vm690_vm4, %v4261_v56, 0.0 }
 0xf47   : > { %2698 = vadd.xlane.f32.xlu0 %v2697_v8 }
 0xf49   : > { %v4263_v27 = vpop.eup %4262 }
 0xf4a   : > { %v2694_v50 = vsel %vm690_vm4, %v4263_v27, 0.0 }
 0xf4b   : > { %2695 = vadd.xlane.f32.xlu0 %v2694_v50 }
 0xf61   : > { %2903 = vrot.lane.b32.xlu0 %v5130_v4, %s4309_s17 }
 0xf65   : > { %1118 = vperm.xlu0 %4194, %v5130_v4  }
 0xfd0   : > { %v2699_v5 = vpop.xlane.xlu0 %2698 }
 0xfd1   : > { %4264 = vrcp.f32 %v2699_v5 }
 0xfd4   : > { %v2696_v18 = vpop.xlane.xlu0 %2695 }
 0xfd5   : > { %4266 = vrcp.f32 %v2696_v18 }
 0xfd8   : > { %v2904_v32 = vpop.permute.xlu0 %2903 }
 0xfd9   : > { %4151 = vpush %v2904_v32 }
 0xfde   : > { %v4265_v2 = vpop.eup %4264 }
 0xfdf   : > { %v2703_v35 = vmul.f32 %v4265_v2, %v4261_v56 }
 0xfe1   : > { %4121 = vmatprep.subr.msk.mxu0 %vm690_vm4, %v2703_v35 }
 0xfe2   : > { %v4267_v13 = vpop.eup %4266  ;;  %4122 = vmatpush3.xpose.msk.msra.mxu0 %vm690_vm4, %v2703_v35 }
 0xfe3   : > { %v2701_v28 = vmul.f32 %v4267_v13, %v4263_v27 }
 0xfe5   : > { %4123 = vmatprep.subr.msk.mxu0 %vm690_vm4, %v2701_v28 }
 0xfe6   : > { %4124 = vmatpush3.xpose.msk.msra.mxu0 %vm690_vm4, %v2701_v28 }
 0xfe9   : > { %4126 = vmatmul.mubr.msk.f32.vlgmr.msra.gmra.mxu0 %vm690_vm4, %v2515_v25 }
 0xfea   : > { %4128 = vmatprep.mubr.msk.f32.mxu0 %vm690_vm4, %v4072_v22 }
 0xfed   : > { %4129 = vmatmul.mubr.msk.f32.gmra.mxu0 %vm690_vm4, %v4073_v54 }
 0xfee   : > { %4131 = vmatprep.mubr.msk.f32.mxu0 %vm690_vm4, %v2528_v29 }
 0xff1   : > { %4132 = vmatmul.mubr.msk.f32.gmra.mxu0 %vm690_vm4, %v2531_v39 }
 0xff2   : > { %4134 = vmatprep.mubr.msk.f32.mxu0 %vm690_vm4, %v4076_v9 }
 0xff5   : > { %4135 = vmatmul.mubr.msk.f32.gmra.mxu0 %vm690_vm4, %v4077_v37 }
 0xff6   : > { %4137 = vmatprep.mubr.msk.f32.mxu0 %vm690_vm4, %v2544_v52 }
 0xff9   : > { %4138 = vmatmul.mubr.msk.f32.gmra.mxu0 %vm690_vm4, %v2547_v14 }
 0xffa   : > { %4140 = vmatprep.mubr.msk.f32.mxu0 %vm690_vm4, %v4080_v41 }
 0xffd   : > { %4141 = vmatmul.mubr.msk.f32.gmra.mxu0 %vm690_vm4, %v4081_v53 }
 0xffe   : > { %4143 = vmatprep.mubr.msk.f32.mxu0 %vm690_vm4, %v2560_v10 }
0x1001   : > { %4144 = vmatmul.mubr.msk.f32.gmra.mxu0 %vm690_vm4, %v2563_v60 }
0x1002   : > { %4146 = vmatprep.mubr.msk.f32.mxu0 %vm690_vm4, %v4084_v47 }
0x1005   : > { %4147 = vmatmul.mubr.msk.f32.gmra.mxu0 %vm690_vm4, %v4085_v7 }
0x1006   : > { %3146 = vmatprep.mubr.bf16.mxu0 %v4290_v3 }
0x100a   : > { %s4152_s22 = spop %4151 }
0x100b   : > { %v2906_v56 = vstv %s4152_s22 }
0x10a9   : > { %v4127_v8 = vpop.f32.mrf.mxu0 }
0x10aa   : > { %v2909_v27 = vmul.f32 %v4127_v8, %v2906_v56 }
0x10ab   : > { %v2824_v50 = vpop.f32.mrf.mxu0 }
0x10ac   : > { %v2925_v22 = vadd.f32 %v2909_v27, %v5215_v31  ;;  %v5317_v0 = vmul.f32 %v2906_v56, %v2824_v50 }
0x10ad   : > { %v4130_v54 = vpop.f32.mrf.mxu0 }
0x10ae   : > { %v2911_v5 = vmul.f32 %v4130_v54, %v2906_v56  ;;  %2941 = vrot.lane.b32.xlu1 %v2925_v22, %s4293_s18 }
0x10af   : > { %v2834_v25 = vpop.f32.mrf.mxu0 }
0x10b0   : > { %v2927_v18 = vadd.f32 %v2911_v5, %v5207_v33  ;;  %v2910_v9 = vmul.f32 %v2906_v56, %v2834_v25 }
0x10b1   : > { %v4133_v32 = vpop.f32.mrf.mxu0 }
0x10b2   : > { %2949 = vrot.lane.b32.xlu0 %v2927_v18, %s4303_s11  ;;  %v2926_v37 = vadd.f32 %v2910_v9, %v5202_v58  ;;  %v2913_v2 = vmul.f32 %v4133_v32, %v2906_v56 }
0x10b3   : > { %v2844_v29 = vpop.f32.mrf.mxu0 }
0x10b4   : > { %v2929_v39 = vadd.f32 %v2913_v2, %v5199_v55  ;;  %v2912_v13 = vmul.f32 %v2906_v56, %v2844_v29 }
0x10b5   : > { %v4136_v35 = vpop.f32.mrf.mxu0 }
0x10b6   : > { %2945 = vrot.lane.b32.xlu0 %v2926_v37, %s4302_s29  ;;  %v2928_v33 = vadd.f32 %v2912_v13, %v5194_v23 }
0x10b7   : > { %v2854_v31 = vpop.f32.mrf.mxu0 }
0x10b8   : > { %v2914_v5 = vmul.f32 %v2906_v56, %v2854_v31 }
0x10b9   : > { %v4139_v28 = vpop.f32.mrf.mxu0 }
0x10ba   : > { %2957 = vrot.lane.b32.xlu0 %v2929_v39, %s4305_s13  ;;  %v2917_v52 = vmul.f32 %v4139_v28, %v2906_v56 }
0x10bb   : > { %v2864_v41 = vpop.f32.mrf.mxu0 }
0x10bc   : > { %v2916_v53 = vmul.f32 %v2906_v56, %v2864_v41  ;;  %v2933_v47 = vadd.f32 %v2917_v52, %v5183_v36 }
0x10bd   : > { %v4142_v14 = vpop.f32.mrf.mxu0 }
0x10be   : > { %2953 = vrot.lane.b32.xlu0 %v2928_v33, %s4304_s12  ;;  %v2919_v10 = vmul.f32 %v4142_v14, %v2906_v56 }
0x10bf   : > { %v2874_v58 = vpop.f32.mrf.mxu0 }
0x10c0   : > { %v2935_v8 = vadd.f32 %v2919_v10, %v5175_v6  ;;  %v2918_v27 = vmul.f32 %v2906_v56, %v2874_v58  ;;  %v2915_v6 = vmul.f32 %v4136_v35, %v2906_v56  ;;  %v2924_v58 = vadd.f32 %v5317_v0, %v5210_v61 }
0x10c1   : > { %v4145_v7 = vpop.f32.mrf.mxu0 }
0x10c2   : > { %v2921_v60 = vmul.f32 %v4145_v7, %v2906_v56  ;;  %2969 = vrot.lane.b32.xlu0 %v2933_v47, %s4293_s18  ;;  %v2934_v36 = vadd.f32 %v2918_v27, %v5170_v34  ;;  %v2931_v29 = vadd.f32 %v2915_v6, %v5191_v63  ;;  %v2932_v47 = vadd.f32 %v2916_v53, %v5178_v19 }
0x10c3   : > { %v2884_v55 = vpop.f32.mrf.mxu0 }
0x10c4   : > { %v2937_v50 = vadd.f32 %v2921_v60, %v5165_v30  ;;  %v2920_v23 = vmul.f32 %v2906_v56, %v2884_v55  ;;  %v2930_v30 = vadd.f32 %v2914_v5, %v5186_v12 }
0x10c5   : > { %v4148_v22 = vpop.f32.mrf.mxu0 }
0x10c6   : > { %2977 = vrot.lane.b32.xlu0 %v2935_v8, %s4303_s11  ;;  %2985 = vrot.lane.b32.xlu1 %v2937_v50, %s4305_s13  ;;  %v2936_v25 = vadd.f32 %v2920_v23, %v5156_v11  ;;  %v2923_v9 = vmul.f32 %v4148_v22, %v2906_v56  ;;  %v1119_v11 = vpop.permute.xlu0 %1118 }
0x10c7   : > { %v2894_v54 = vpop.f32.mrf.mxu0  ;;  %v5347_v37 = vadd.f32 %v1119_v11, %v4970_v57  ;;  %v5350_v12 = vadd.f32 %v1119_v11, %v4972_v46 }
0x10c8   : > { %v2922_v18 = vmul.f32 %v2906_v56, %v2894_v54  ;;  %v2939_v34 = vadd.f32 %v2923_v9, %v5159_v40 }
0x10c9   : > { %v1124_v56 = vsub.f32 0.0, %v5350_v12 }
0x10ca   : > { %2973 = vrot.lane.b32.xlu0 %v2934_v36, %s4302_s29  ;;  %2981 = vrot.lane.b32.xlu1 %v2936_v25, %s4304_s12  ;;  %v2938_v32 = vadd.f32 %v2922_v18, %v5162_v1  ;;  %v1123_v1 = vsub.f32 0.0, %v5347_v37 }
0x10cb   : > { %v3592_v35 = vmul.f32 -1.442695, %v1124_v56 }
0x10cc   : > { %v3591_v2 = vmul.f32 -1.442695, %v1123_v1 }
0x10ce   : > { %2961 = vrot.lane.b32.xlu0 %v2930_v30, %s4306_s15  ;;  %2989 = vrot.lane.b32.xlu1 %v2938_v32, %s4306_s15  ;;  %4268 = vpow2.f32 %v3591_v2 }
0x10cf   : > { %4270 = vpow2.f32 %v3592_v35 }
0x10d2   : > { %2965 = vrot.lane.b32.xlu0 %v2931_v29, %s4294_s19  ;;  %2993 = vrot.lane.b32.xlu1 %v2939_v34, %s4294_s19 }
0x10db   : > { %v4269_v31 = vpop.eup %4268 }
0x10dc   : > { %v4271_v13 = vpop.eup %4270  ;;  %v1131_v28 = vadd.f32 1.0, %v4269_v31 }
0x10dd   : > { %v1132_v41 = vadd.f32 1.0, %v4271_v13 }
0x10de   : > { %4272 = vrcp.f32 %v1131_v28 }
0x10df   : > { %4274 = vrcp.f32 %v1132_v41 }
0x10eb   : > { %v4273_v54 = vpop.eup %4272 }
0x10ec   : > { %v4275_v19 = vpop.eup %4274  ;;  %v3018_v6 = vrot.slane %v4273_v54, %v4509_v45 }
0x10ed   : > { %v3022_v9 = vrot.slane %v4275_v19, %v4509_v45 }
0x1120   : > { %v2942_v46 = vpop.permute.xlu1 %2941 }
0x1121   : > { %v2996_v10 = vsel %vm690_vm4, %v2924_v58, %v2942_v46  ;;  %v4310_v46 = vmov 7  }
0x1122   : > { %4195 = vset.pattern.permute.xlu0 %v4310_v46 }
0x1124   : > { %v2950_v40 = vpop.permute.xlu0 %2949 }
0x1128   : > { %v2946_v63 = vpop.permute.xlu0 %2945 }
0x1129   : > { %v2998_v7 = vsel %vm2997_vm10, %v2996_v10, %v2946_v63 }
0x112a   : > { %v3000_v23 = vsel %vm2999_vm11, %v2998_v7, %v2950_v40 }
0x112c   : > { %v2958_v39 = vpop.permute.xlu0 %2957 }
0x1130   : > { %v2954_v57 = vpop.permute.xlu0 %2953 }
0x1131   : > { %v3001_v5 = vsel %vm388_vm0, %v3000_v23, %v2954_v57 }
0x1132   : > { %v3003_v36 = vsel %vm3002_vm12, %v3001_v5, %v2958_v39 }
0x1134   : > { %v2970_v33 = vpop.permute.xlu0 %2969 }
0x1135   : > { %v3008_v60 = vsel %vm690_vm4, %v2932_v47, %v2970_v33  ;;  %v4311_v33 = vmov 8  }
0x1136   : > { %4196 = vset.pattern.permute.xlu1 %v4311_v33 }
0x1138   : > { %v2978_v52 = vpop.permute.xlu0 %2977  ;;  %v2986_v14 = vpop.permute.xlu1 %2985 }
0x113c   : > { %v2974_v55 = vpop.permute.xlu0 %2973  ;;  %v2982_v8 = vpop.permute.xlu1 %2981 }
0x113d   : > { %v3009_v27 = vsel %vm2997_vm10, %v3008_v60, %v2974_v55 }
0x113e   : > { %v3010_v50 = vsel %vm2999_vm11, %v3009_v27, %v2978_v52 }
0x113f   : > { %v3011_v22 = vsel %vm388_vm0, %v3010_v50, %v2982_v8 }
0x1140   : > { %v2962_v61 = vpop.permute.xlu0 %2961  ;;  %v2990_v0 = vpop.permute.xlu1 %2989  ;;  %v3012_v53 = vsel %vm3002_vm12, %v3011_v22, %v2986_v14 }
0x1141   : > { %v3005_v25 = vsel %vm3004_vm13, %v3003_v36, %v2962_v61  ;;  %v3013_v18 = vsel %vm3004_vm13, %v3012_v53, %v2990_v0 }
0x1144   : > { %v2966_v30 = vpop.permute.xlu0 %2965  ;;  %v2994_v32 = vpop.permute.xlu1 %2993 }
0x1145   : > { %v3007_v29 = vsel %vm3006_vm14, %v3005_v25, %v2966_v30  ;;  %v3014_v34 = vsel %vm3006_vm14, %v3013_v18, %v2994_v32 }
0x1146   : > { %v5363_v11 = vmul.f32 %v3018_v6, %v3007_v29  ;;  %v5365_v1 = vmul.f32 %v3022_v9, %v3014_v34 }
0x1148   : > { %3035 = vrot.lane.b32.xlu0 %v5363_v11, %s4294_s19  ;;  %3037 = vrot.lane.b32.xlu1 %v5365_v1, %s4294_s19 }
0x114c   : > { %3027 = vrot.lane.b32.xlu0 %v5363_v11, %s4293_s18  ;;  %3029 = vrot.lane.b32.xlu1 %v5365_v1, %s4293_s18 }
0x1150   : > { %3069 = vrot.lane.b32.xlu1 %v5363_v11, %s4295_s20 }
0x11ba   : > { %v3036_v45 = vpop.permute.xlu0 %3035  ;;  %v3038_v56 = vpop.permute.xlu1 %3037 }
0x11bb   : > { %v3039_v2 = vsel %vm531_vm2, %v3036_v45, %v3038_v56  ;;  %v3040_v35 = vsel %vm531_vm2, %v3038_v56, %v3036_v45 }
0x11bc   : > { %v5382_v40 = vmul.f32 %v3039_v2, %v4547_v59  ;;  %v3042_v63 = vmul.f32 %v3040_v35, %v4557_v62 }
0x11be   : > { %v3028_v31 = vpop.permute.xlu0 %3027  ;;  %3077 = vrot.lane.b32.xlu1 %v3042_v63, %s4295_s20  ;;  %3071 = vrot.lane.b32.xlu0 %v5382_v40, %s4295_s20  ;;  %v3030_v39 = vpop.permute.xlu1 %3029  ;;  %v3096_v45 = vpack.c.bf16 %v3042_v63, %v5365_v1  ;;  %v3095_v35 = vpack.c.bf16 %v5382_v40, %v5363_v11 }
0x11bf   : > { %v3032_v13 = vsel %vm506_vm1, %v3030_v39, %v3028_v31  ;;  %v3031_v41 = vsel %vm506_vm1, %v3028_v31, %v3030_v39 }
0x11c0   : > { %v5391_v28 = vmul.f32 %v3032_v13, %v4524_v49  ;;  %v3034_v57 = vmul.f32 %v3031_v41, %v4528_v51 }
0x11c2   : > { %3075 = vrot.lane.b32.xlu1 %v5365_v1, %s4295_s20  ;;  %3067 = vrot.lane.b32.xlu0 %v5391_v28, %s4295_s20  ;;  %v3070_v52 = vpop.permute.xlu1 %3069 }
0x11c6   : > { %3045 = vrot.lane.b32.xlu1 %v5363_v11, %s4296_s21  ;;  %3073 = vrot.lane.b32.xlu0 %v3034_v57, %s4295_s20 }
0x11ca   : > { %3053 = vrot.lane.b32.xlu1 %v3042_v63, %s4296_s21  ;;  %3047 = vrot.lane.b32.xlu0 %v5382_v40, %s4296_s21 }
0x11ce   : > { %3051 = vrot.lane.b32.xlu1 %v5365_v1, %s4296_s21  ;;  %3043 = vrot.lane.b32.xlu0 %v5391_v28, %s4296_s21 }
0x11d2   : > { %3049 = vrot.lane.b32.xlu0 %v3034_v57, %s4296_s21  ;;  %3158 = vperm.xlu1 %4196, %v5130_v4  }
0x11d6   : > { %3102 = vperm.xlu0 %4195, %v5130_v4  }
0x1230   : > { %v3072_v14 = vpop.permute.xlu0 %3071  ;;  %v3078_v58 = vpop.permute.xlu1 %3077 }
0x1231   : > { %v3081_v47 = vsel %vm629_vm3, %v3072_v14, %v3078_v58  ;;  %v3084_v10 = vsel %vm629_vm3, %v3078_v58, %v3072_v14 }
0x1232   : > { %v3089_v7 = vmul.f32 %v3081_v47, %v4603_v20  ;;  %v3090_v60 = vmul.f32 %v3084_v10, %v4606_v21 }
0x1234   : > { %v3099_v55 = vpack.c.bf16 %v3089_v7, %v3089_v7  ;;  %v3100_v8 = vpack.c.bf16 %v3090_v60, %v3090_v60  ;;  %v3068_v27 = vpop.permute.xlu0 %3067  ;;  %v3076_v50 = vpop.permute.xlu1 %3075 }
0x1235   : > { %v3080_v23 = vsel %vm629_vm3, %v3070_v52, %v3076_v50  ;;  %v3083_v22 = vsel %vm629_vm3, %v3076_v50, %v3070_v52 }
0x1236   : > { %3731 = vmatprep.subr.msk.bf16.mxu0 %vm816_vm6, %v3100_v8  ;;  %v3109_v4 = vsel %vm816_vm6, %v3099_v55, 0  ;;  %v3087_v19 = vmul.f32 %v3080_v23, %v4603_v20  ;;  %v3088_v53 = vmul.f32 %v3083_v22, %v4606_v21 }
0x1237   : > { %3121 = vmatpush1.bf16.msra.mxu0 %v3109_v4 }
0x1238   : > { %v3074_v54 = vpop.permute.xlu0 %3073  ;;  %v3046_v5 = vpop.permute.xlu1 %3045 }
0x1239   : > { %v3079_v61 = vsel %vm629_vm3, %v3068_v27, %v3074_v54  ;;  %v3082_v0 = vsel %vm629_vm3, %v3074_v54, %v3068_v27 }
0x123a   : > { %v3085_v36 = vmul.f32 %v3079_v61, %v4603_v20  ;;  %v3086_v25 = vmul.f32 %v3082_v0, %v4606_v21 }
0x123c   : > { %v3097_v18 = vpack.c.bf16 %v3087_v19, %v3085_v36  ;;  %v3048_v6 = vpop.permute.xlu0 %3047  ;;  %v3054_v30 = vpop.permute.xlu1 %3053  ;;  %v3098_v9 = vpack.c.bf16 %v3088_v53, %v3086_v25 }
0x123d   : > { %v3057_v32 = vsel %vm572_vm5, %v3048_v6, %v3054_v30  ;;  %v3060_v29 = vsel %vm572_vm5, %v3054_v30, %v3048_v6 }
0x123e   : > { %v3066_v34 = vmul.f32 %v3057_v32, %v4656_v38  ;;  %3122 = vmatprep.subr.bf16.mxu0 %v3098_v9  ;;  %v3065_v31 = vmul.f32 %v3060_v29, %v4670_v17  ;;  %v4312_v29 = vmov 9  }
0x123f   : > { %3123 = vmatpush1.bf16.msra.mxu0 %v3097_v18  ;;  %4197 = vset.pattern.permute.xlu1 %v4312_v29 }
0x1240   : > { %v3044_v56 = vpop.permute.xlu0 %3043  ;;  %3124 = vmatprep.subr.bf16.mxu0 %v3096_v45  ;;  %v3052_v2 = vpop.permute.xlu1 %3051  ;;  %v3094_v39 = vpack.c.bf16 %v3034_v57, %v3066_v34  ;;  %v3093_v1 = vpack.c.bf16 %v5391_v28, %v3065_v31  ;;  %v3730_v28 = vld [vmem:[%s5685_s5 + $0x8] sm:$0xf]  ;;  %v4313_v34 = vmov 10   ;;  %v5511_v45 = vld [vmem:[%s5683_s3] sm:$0xff] }
0x1241   : > { %v3056_v13 = vsel %vm572_vm5, %v3046_v5, %v3052_v2  ;;  %v3059_v41 = vsel %vm572_vm5, %v3052_v2, %v3046_v5  ;;  %4198 = vset.pattern.permute.xlu0 %v4313_v34 }
0x1242   : > { %v3063_v40 = vmul.f32 %v3059_v41, %v4670_v17  ;;  %v3064_v57 = vmul.f32 %v3056_v13, %v4656_v38 }
0x1243   : > { %3125 = vmatpush1.bf16.msra.mxu0 %v3095_v35 }
0x1244   : > { %v3050_v46 = vpop.permute.xlu0 %3049  ;;  %3126 = vmatprep.subr.bf16.mxu0 %v3094_v39 }
0x1245   : > { %v3055_v63 = vsel %vm572_vm5, %v3044_v56, %v3050_v46  ;;  %v3058_v11 = vsel %vm572_vm5, %v3050_v46, %v3044_v56 }
0x1246   : > { %v3061_v33 = vmul.f32 %v3058_v11, %v4670_v17  ;;  %v3062_v52 = vmul.f32 %v3055_v63, %v4656_v38 }
0x1247   : > { %3127 = vmatpush1.bf16.msra.mxu0 %v3093_v1 }
0x1248   : > { %v3091_v14 = vpack.c.bf16 %v3063_v40, %v3061_v33  ;;  %v3092_v58 = vpack.c.bf16 %v3064_v57, %v3062_v52 }
0x124a   : > { %3128 = vmatprep.subr.bf16.mxu0 %v3092_v58 }
0x124b   : > { %3129 = vmatpush1.bf16.msra.mxu0 %v3091_v14 }
0x124d   : > { %v3159_v7 = vpop.permute.xlu1 %3158 }
0x124e   : > { %3732 = vmatmul.mubr.msk.bf16.vlgmr.msra.gmra.mxu0 %vm812_vm7, %v3730_v28 }
0x124f   : > { %3426 = vmatprep.mubr.bf16.mxu0 %v4290_v3 }
0x1251   : > { %v3103_v47 = vpop.permute.xlu0 %3102 }
0x130e   : > { %v3148_v10 = vpop.f32.mrf.mxu0 }
0x130f   : > { %v3149_v60 = vadd.f32 %v3148_v10, %v3103_v47 }
0x1310   : > { %v3150_v55 = vpop.f32.mrf.mxu0 }
0x1311   : > { %vm3155_vm15 = vcmp.ge.f32.partialorder %v3149_v60, 0.0  ;;  %v3151_v8 = vadd.f32 %v3150_v55, %v3103_v47  ;;  %v3161_v27 = vmul.f32 %v3159_v7, %v3149_v60 }
0x1312   : > { %v3152_v50 = vpop.f32.mrf.mxu0 }
0x1313   : > { %vm3156_vm0 = vcmp.ge.f32.partialorder %v3151_v8, 0.0  ;;  %v3162_v4 = vmul.f32 %v3159_v7, %v3151_v8  ;;  %v5460_v23 = vsel %vm3155_vm15, %v3149_v60, %v3161_v27 }
0x1314   : > { %v3153_v22 = vpop.f32.mrf.mxu0  ;;  %3175 = vrot.lane.b32.xlu1 %v5460_v23, %s4294_s19 }
0x1315   : > { %v5464_v54 = vsel %vm3156_vm0, %v3151_v8, %v3162_v4 }
0x1316   : > { %3177 = vrot.lane.b32.xlu0 %v5464_v54, %s4294_s19 }
0x1318   : > { %3167 = vrot.lane.b32.xlu1 %v5460_v23, %s4293_s18 }
0x131a   : > { %3169 = vrot.lane.b32.xlu0 %v5464_v54, %s4293_s18 }
0x131e   : > { %3209 = vrot.lane.b32.xlu0 %v5460_v23, %s4295_s20 }
0x1386   : > { %v3176_v5 = vpop.permute.xlu1 %3175 }
0x1388   : > { %v3178_v61 = vpop.permute.xlu0 %3177 }
0x1389   : > { %v3179_v0 = vsel %vm531_vm2, %v3176_v5, %v3178_v61  ;;  %v3180_v19 = vsel %vm531_vm2, %v3178_v61, %v3176_v5 }
0x138a   : > { %v5479_v53 = vmul.f32 %v3179_v0, %v4547_v59  ;;  %v3182_v36 = vmul.f32 %v3180_v19, %v4557_v62  ;;  %v3168_v25 = vpop.permute.xlu1 %3167 }
0x138c   : > { %v3170_v18 = vpop.permute.xlu0 %3169  ;;  %3217 = vrot.lane.b32.xlu0 %v3182_v36, %s4295_s20  ;;  %3211 = vrot.lane.b32.xlu1 %v5479_v53, %s4295_s20  ;;  %v3236_v61 = vpack.c.bf16 %v3182_v36, %v5464_v54 }
0x138d   : > { %v3172_v6 = vsel %vm506_vm1, %v3170_v18, %v3168_v25  ;;  %v3171_v9 = vsel %vm506_vm1, %v3168_v25, %v3170_v18  ;;  %v3235_v25 = vpack.c.bf16 %v5479_v53, %v5460_v23 }
0x138e   : > { %v5488_v30 = vmul.f32 %v3172_v6, %v4524_v49  ;;  %v3174_v32 = vmul.f32 %v3171_v9, %v4528_v51 }
0x1390   : > { %3215 = vrot.lane.b32.xlu0 %v5464_v54, %s4295_s20  ;;  %3207 = vrot.lane.b32.xlu1 %v5488_v30, %s4295_s20  ;;  %v3210_v56 = vpop.permute.xlu0 %3209 }
0x1394   : > { %3185 = vrot.lane.b32.xlu0 %v5460_v23, %s4296_s21  ;;  %3213 = vrot.lane.b32.xlu1 %v3174_v32, %s4295_s20 }
0x1398   : > { %3193 = vrot.lane.b32.xlu0 %v3182_v36, %s4296_s21  ;;  %3187 = vrot.lane.b32.xlu1 %v5479_v53, %s4296_s21 }
0x139c   : > { %3191 = vrot.lane.b32.xlu0 %v5464_v54, %s4296_s21  ;;  %3183 = vrot.lane.b32.xlu1 %v5488_v30, %s4296_s21 }
0x13a0   : > { %3189 = vrot.lane.b32.xlu1 %v3174_v32, %s4296_s21  ;;  %3298 = vperm.xlu0 %4198, %v5511_v45  }
0x13a4   : > { %3242 = vperm.xlu1 %4197, %v5511_v45  }
0x13fe   : > { %v3218_v2 = vpop.permute.xlu0 %3217  ;;  %v3212_v35 = vpop.permute.xlu1 %3211 }
0x13ff   : > { %v3221_v31 = vsel %vm629_vm3, %v3212_v35, %v3218_v2  ;;  %v3224_v39 = vsel %vm629_vm3, %v3218_v2, %v3212_v35 }
0x1400   : > { %v3229_v13 = vmul.f32 %v3221_v31, %v4603_v20  ;;  %v3230_v41 = vmul.f32 %v3224_v39, %v4606_v21 }
0x1402   : > { %v3239_v46 = vpack.c.bf16 %v3229_v13, %v3229_v13  ;;  %v3240_v1 = vpack.c.bf16 %v3230_v41, %v3230_v41  ;;  %v3216_v63 = vpop.permute.xlu0 %3215  ;;  %v3208_v11 = vpop.permute.xlu1 %3207 }
0x1403   : > { %v3220_v57 = vsel %vm629_vm3, %v3210_v56, %v3216_v63  ;;  %v3223_v33 = vsel %vm629_vm3, %v3216_v63, %v3210_v56 }
0x1404   : > { %3734 = vmatprep.subr.msk.bf16.mxu1 %vm816_vm6, %v3240_v1  ;;  %v3249_v40 = vsel %vm816_vm6, %v3239_v46, 0  ;;  %v3227_v47 = vmul.f32 %v3220_v57, %v4603_v20  ;;  %v3228_v10 = vmul.f32 %v3223_v33, %v4606_v21 }
0x1405   : > { %3261 = vmatpush1.bf16.msra.mxu1 %v3249_v40 }
0x1406   : > { %v3186_v52 = vpop.permute.xlu0 %3185  ;;  %v3214_v14 = vpop.permute.xlu1 %3213 }
0x1407   : > { %v3219_v58 = vsel %vm629_vm3, %v3208_v11, %v3214_v14  ;;  %v3222_v28 = vsel %vm629_vm3, %v3214_v14, %v3208_v11 }
0x1408   : > { %v3225_v7 = vmul.f32 %v3219_v58, %v4603_v20  ;;  %v3226_v60 = vmul.f32 %v3222_v28, %v4606_v21 }
0x140a   : > { %v3237_v55 = vpack.c.bf16 %v3227_v47, %v3225_v7  ;;  %v3194_v8 = vpop.permute.xlu0 %3193  ;;  %v3188_v27 = vpop.permute.xlu1 %3187  ;;  %v3238_v50 = vpack.c.bf16 %v3228_v10, %v3226_v60 }
0x140b   : > { %v3197_v4 = vsel %vm572_vm5, %v3188_v27, %v3194_v8  ;;  %v3200_v22 = vsel %vm572_vm5, %v3194_v8, %v3188_v27 }
0x140c   : > { %v3206_v5 = vmul.f32 %v3197_v4, %v4656_v38  ;;  %3262 = vmatprep.subr.bf16.mxu1 %v3238_v50  ;;  %v3205_v18 = vmul.f32 %v3200_v22, %v4670_v17 }
0x140d   : > { %3263 = vmatpush1.bf16.msra.mxu1 %v3237_v55 }
0x140e   : > { %v3192_v0 = vpop.permute.xlu0 %3191  ;;  %3264 = vmatprep.subr.bf16.mxu1 %v3236_v61  ;;  %v3184_v19 = vpop.permute.xlu1 %3183  ;;  %v3234_v6 = vpack.c.bf16 %v3174_v32, %v3206_v5  ;;  %v3233_v54 = vpack.c.bf16 %v5488_v30, %v3205_v18  ;;  %v3733_v30 = vld [vmem:[%s5685_s5 + $0xc] sm:$0xf] }
0x140f   : > { %v3196_v9 = vsel %vm572_vm5, %v3186_v52, %v3192_v0  ;;  %v3199_v29 = vsel %vm572_vm5, %v3192_v0, %v3186_v52 }
0x1410   : > { %v3203_v53 = vmul.f32 %v3199_v29, %v4670_v17  ;;  %v3204_v32 = vmul.f32 %v3196_v9, %v4656_v38 }
0x1411   : > { %3265 = vmatpush1.bf16.msra.mxu1 %v3235_v25 }
0x1412   : > { %3266 = vmatprep.subr.bf16.mxu1 %v3234_v6  ;;  %v3190_v34 = vpop.permute.xlu1 %3189 }
0x1413   : > { %v3195_v36 = vsel %vm572_vm5, %v3184_v19, %v3190_v34  ;;  %v3198_v23 = vsel %vm572_vm5, %v3190_v34, %v3184_v19 }
0x1414   : > { %v3201_v56 = vmul.f32 %v3198_v23, %v4670_v17  ;;  %v3202_v2 = vmul.f32 %v3195_v36, %v4656_v38 }
0x1415   : > { %3267 = vmatpush1.bf16.msra.mxu1 %v3233_v54 }
0x1416   : > { %v3231_v35 = vpack.c.bf16 %v3203_v53, %v3201_v56  ;;  %v3232_v31 = vpack.c.bf16 %v3204_v32, %v3202_v2 }
0x1418   : > { %3268 = vmatprep.subr.bf16.mxu1 %v3232_v31 }
0x1419   : > { %3269 = vmatpush1.bf16.msra.mxu1 %v3231_v35 }
0x141b   : > { %v3299_v41 = vpop.permute.xlu0 %3298 }
0x141c   : > { %3735 = vmatmul.mubr.msk.bf16.vlgmr.msra.gmra.mxu1 %vm812_vm7, %v3733_v30 }
0x141f   : > { %v3243_v39 = vpop.permute.xlu1 %3242 }
0x14dc   : > { %v3288_v13 = vpop.f32.mrf.mxu1 }
0x14dd   : > { %v3289_v46 = vadd.f32 %v3288_v13, %v3243_v39 }
0x14de   : > { %v3290_v1 = vpop.f32.mrf.mxu1 }
0x14df   : > { %vm3295_vm4 = vcmp.ge.f32.partialorder %v3289_v46, 0.0  ;;  %v3301_v63 = vmul.f32 %v3299_v41, %v3289_v46  ;;  %v3291_v11 = vadd.f32 %v3290_v1, %v3243_v39 }
0x14e0   : > { %v3292_v40 = vpop.f32.mrf.mxu1 }
0x14e1   : > { %v3302_v57 = vmul.f32 %v3299_v41, %v3291_v11  ;;  %v5561_v33 = vsel %vm3295_vm4, %v3289_v46, %v3301_v63  ;;  %vm3296_vm8 = vcmp.ge.f32.partialorder %v3291_v11, 0.0 }
0x14e2   : > { %3315 = vrot.lane.b32.xlu1 %v5561_v33, %s4294_s19  ;;  %3307 = vrot.lane.b32.xlu0 %v5561_v33, %s4293_s18  ;;  %v3293_v52 = vpop.f32.mrf.mxu1 }
0x14e3   : > { %v5567_v14 = vsel %vm3296_vm8, %v3291_v11, %v3302_v57 }
0x14e6   : > { %3317 = vrot.lane.b32.xlu1 %v5567_v14, %s4294_s19 }
0x14ea   : > { %3309 = vrot.lane.b32.xlu1 %v5567_v14, %s4293_s18  ;;  %s4314_s18 = smov 122  }
0x14ee   : > { %3349 = vrot.lane.b32.xlu1 %v5561_v33, %s4295_s20 }
0x1554   : > { %v3316_v58 = vpop.permute.xlu1 %3315  ;;  %v3308_v55 = vpop.permute.xlu0 %3307 }
0x1558   : > { %v3318_v28 = vpop.permute.xlu1 %3317 }
0x1559   : > { %v3319_v47 = vsel %vm531_vm2, %v3316_v58, %v3318_v28  ;;  %v3320_v10 = vsel %vm531_vm2, %v3318_v28, %v3316_v58 }
0x155a   : > { %v5580_v7 = vmul.f32 %v3319_v47, %v4547_v59  ;;  %v3322_v60 = vmul.f32 %v3320_v10, %v4557_v62 }
0x155c   : > { %3357 = vrot.lane.b32.xlu1 %v3322_v60, %s4295_s20  ;;  %3351 = vrot.lane.b32.xlu0 %v5580_v7, %s4295_s20  ;;  %v3310_v8 = vpop.permute.xlu1 %3309  ;;  %v3376_v63 = vpack.c.bf16 %v3322_v60, %v5567_v14 }
0x155d   : > { %v3312_v27 = vsel %vm506_vm1, %v3310_v8, %v3308_v55  ;;  %v3311_v4 = vsel %vm506_vm1, %v3308_v55, %v3310_v8 }
0x155e   : > { %v5589_v50 = vmul.f32 %v3312_v27, %v4524_v49  ;;  %v3314_v59 = vmul.f32 %v3311_v4, %v4528_v51  ;;  %v4315_v49 = vmov 11   ;;  %v4316_v51 = vmov 12  }
0x155f   : > { %4199 = vset.pattern.permute.xlu1 %v4315_v49  ;;  %4200 = vset.pattern.permute.xlu0 %v4316_v51 }
0x1560   : > { %3355 = vrot.lane.b32.xlu1 %v5567_v14, %s4295_s20  ;;  %3347 = vrot.lane.b32.xlu0 %v5589_v50, %s4295_s20  ;;  %v3350_v62 = vpop.permute.xlu1 %3349 }
0x1564   : > { %3325 = vrot.lane.b32.xlu1 %v5561_v33, %s4296_s21  ;;  %3353 = vrot.lane.b32.xlu0 %v3314_v59, %s4295_s20 }
0x1568   : > { %3333 = vrot.lane.b32.xlu1 %v3322_v60, %s4296_s21  ;;  %3327 = vrot.lane.b32.xlu0 %v5580_v7, %s4296_s21 }
0x156c   : > { %3331 = vrot.lane.b32.xlu1 %v5567_v14, %s4296_s21  ;;  %3323 = vrot.lane.b32.xlu0 %v5589_v50, %s4296_s21 }
0x1570   : > { %3329 = vrot.lane.b32.xlu0 %v3314_v59, %s4296_s21  ;;  %3382 = vperm.xlu1 %4199, %v5511_v45   ;;  %s5691_s21 = sshll.u32 %s5693_s10, 3 }
0x1571   : > { %s356_s25 = scalar_lea.vmem %s5688_s8, %s5691_s21 }
0x1574   : > { %922 = vrot.lane.b32.xlu0 %v5511_v45, %s4314_s18  ;;  %4201 = vset.pattern.permute.xlu1 %v4290_v3 }
0x1578   : > { %3438 = vperm.xlu0 %4200, %v5511_v45  }
0x15ce   : > { %v3352_v22 = vpop.permute.xlu0 %3351  ;;  %v3358_v5 = vpop.permute.xlu1 %3357 }
0x15cf   : > { %v3361_v61 = vsel %vm629_vm3, %v3352_v22, %v3358_v5  ;;  %v3364_v0 = vsel %vm629_vm3, %v3358_v5, %v3352_v22 }
0x15d0   : > { %v3369_v19 = vmul.f32 %v3361_v61, %v4603_v20  ;;  %v3370_v25 = vmul.f32 %v3364_v0, %v4606_v21 }
0x15d2   : > { %v3379_v18 = vpack.c.bf16 %v3369_v19, %v3369_v19  ;;  %v3380_v6 = vpack.c.bf16 %v3370_v25, %v3370_v25  ;;  %v3348_v3 = vpop.permute.xlu0 %3347  ;;  %v3356_v9 = vpop.permute.xlu1 %3355 }
0x15d3   : > { %v3360_v29 = vsel %vm629_vm3, %v3350_v62, %v3356_v9  ;;  %v3363_v34 = vsel %vm629_vm3, %v3356_v9, %v3350_v62 }
0x15d4   : > { %3737 = vmatprep.subr.msk.bf16.mxu0 %vm816_vm6, %v3380_v6  ;;  %v3389_v45 = vsel %vm816_vm6, %v3379_v18, 0  ;;  %v3367_v32 = vmul.f32 %v3360_v29, %v4603_v20  ;;  %v3368_v56 = vmul.f32 %v3363_v34, %v4606_v21  ;;  %v4317_v18 = vmov 1966171168  }
0x15d5   : > { %3401 = vmatpush1.bf16.msra.mxu0 %v3389_v45  ;;  %v3451_v6 = vunpack.c.l.s4 %v4317_v18 }
0x15d6   : > { %v3354_v54 = vpop.permute.xlu0 %3353  ;;  %v3326_v36 = vpop.permute.xlu1 %3325 }
0x15d7   : > { %v3359_v23 = vsel %vm629_vm3, %v3348_v3, %v3354_v54  ;;  %v3362_v53 = vsel %vm629_vm3, %v3354_v54, %v3348_v3  ;;  %vm3467_vm3 = vcmp.lt.s32.totalorder %v504_v42, 256 }
0x15d8   : > { %v3365_v2 = vmul.f32 %v3359_v23, %v4603_v20  ;;  %v3366_v35 = vmul.f32 %v3362_v53, %v4606_v21  ;;  %v3375_v21 = vpack.c.bf16 %v5580_v7, %v5561_v33 }
0x15da   : > { %v3377_v31 = vpack.c.bf16 %v3367_v32, %v3365_v2  ;;  %v3328_v30 = vpop.permute.xlu0 %3327  ;;  %v3334_v39 = vpop.permute.xlu1 %3333  ;;  %v3378_v13 = vpack.c.bf16 %v3368_v56, %v3366_v35 }
0x15db   : > { %v3337_v41 = vsel %vm572_vm5, %v3328_v30, %v3334_v39  ;;  %v3340_v46 = vsel %vm572_vm5, %v3334_v39, %v3328_v30 }
0x15dc   : > { %v3346_v1 = vmul.f32 %v3337_v41, %v4656_v38  ;;  %3402 = vmatprep.subr.bf16.mxu0 %v3378_v13  ;;  %v3345_v40 = vmul.f32 %v3340_v46, %v4670_v17 }
0x15dd   : > { %3403 = vmatpush1.bf16.msra.mxu0 %v3377_v31 }
0x15de   : > { %v3324_v11 = vpop.permute.xlu0 %3323  ;;  %3404 = vmatprep.subr.bf16.mxu0 %v3376_v63  ;;  %v3332_v20 = vpop.permute.xlu1 %3331  ;;  %v3374_v57 = vpack.c.bf16 %v3314_v59, %v3346_v1  ;;  %v3373_v14 = vpack.c.bf16 %v5589_v50, %v3345_v40 }
0x15df   : > { %v3336_v52 = vsel %vm572_vm5, %v3326_v36, %v3332_v20  ;;  %v3339_v58 = vsel %vm572_vm5, %v3332_v20, %v3326_v36 }
0x15e0   : > { %v3343_v10 = vmul.f32 %v3339_v58, %v4670_v17  ;;  %v3344_v7 = vmul.f32 %v3336_v52, %v4656_v38 }
0x15e1   : > { %3405 = vmatpush1.bf16.msra.mxu0 %v3375_v21 }
0x15e2   : > { %v3330_v28 = vpop.permute.xlu0 %3329  ;;  %3406 = vmatprep.subr.bf16.mxu0 %v3374_v57 }
0x15e3   : > { %v3335_v47 = vsel %vm572_vm5, %v3324_v11, %v3330_v28  ;;  %v3338_v33 = vsel %vm572_vm5, %v3330_v28, %v3324_v11 }
0x15e4   : > { %v3341_v60 = vmul.f32 %v3338_v33, %v4670_v17  ;;  %v3342_v55 = vmul.f32 %v3335_v47, %v4656_v38 }
0x15e5   : > { %3407 = vmatpush1.bf16.msra.mxu0 %v3373_v14 }
0x15e6   : > { %v3371_v8 = vpack.c.bf16 %v3343_v10, %v3341_v60  ;;  %v923_v27 = vpop.permute.xlu0 %922  ;;  %v3372_v4 = vpack.c.bf16 %v3344_v7, %v3342_v55 }
0x15e7   : > { %v966_v50 = vadd.f32 %v4922_v48, %v923_v27 }
0x15e8   : > { %3408 = vmatprep.subr.bf16.mxu0 %v3372_v4 }
0x15e9   : > { %v3587_v59 = vmul.f32 -1.442695, %v966_v50  ;;  %3409 = vmatpush1.bf16.msra.mxu0 %v3371_v8 }
0x15eb   : > { %4276 = vpow2.f32 %v3587_v59  ;;  %v3383_v51 = vpop.permute.xlu1 %3382 }
0x15ec   : > { %3738 = vmatmul.mubr.msk.bf16.vlgmr.msra.gmra.mxu0 %vm812_vm7, %v3736_v44 }
0x15f3   : > { %v3439_v25 = vpop.permute.xlu0 %3438 }
0x15f8   : > { %v4277_v17 = vpop.eup %4276 }
0x15f9   : > { %v974_v49 = vadd.f32 1.0, %v4277_v17 }
0x15fb   : > { %4278 = vrcp.f32 %v974_v49 }
0x1608   : > { %v4279_v38 = vpop.eup %4278 }
0x1609   : > { %979 = vperm.xlu1 %4201, %v4279_v38  }
0x1684   : > { %v980_v62 = vpop.permute.xlu1 %979 }
0x1685   : > { %v982_v48 = vmul.f32 %v980_v62, %v4819_v24  ;;  %v983_v22 = vmul.f32 %v980_v62, %v4821_v26 }
0x1687   : > { %v1058_v5 = vadd.f32 %v4858_v15, %v982_v48  ;;  %v1059_v61 = vadd.f32 %v4864_v16, %v983_v22  ;;  %v3452_v15 = vunpack.c.0.s8 %v3451_v6 }
0x1689   : > { %v1062_v0 = vcombine.low %v1058_v5, %v1059_v61  ;;  %v3455_v53 = vsub.s32 %v3452_v15, %v4503_v43 }
0x168b   : > { %1064 = vst [vmem:[%s356_s25] sm:$0xff] %v1062_v0 }
0x16ac   : > { %v3428_v19 = vpop.f32.mrf.mxu0 }
0x16ad   : > { %v3429_v3 = vadd.f32 %v3428_v19, %v3383_v51 }
0x16ae   : > { %v3430_v24 = vpop.f32.mrf.mxu0 }
0x16af   : > { %vm3435_vm1 = vcmp.ge.f32.partialorder %v3429_v3, 0.0  ;;  %v3441_v26 = vmul.f32 %v3439_v25, %v3429_v3  ;;  %v3431_v9 = vadd.f32 %v3430_v24, %v3383_v51 }
0x16b0   : > { %v3432_v45 = vpop.f32.mrf.mxu0 }
0x16b1   : > { %v3443_v16 = vsel %vm3435_vm1, %v3429_v3, %v3441_v26  ;;  %vm3436_vm2 = vcmp.ge.f32.partialorder %v3431_v9, 0.0  ;;  %v3442_v29 = vmul.f32 %v3439_v25, %v3431_v9 }
0x16b2   : > { %v3433_v34 = vpop.f32.mrf.mxu0  ;;  %v3445_v36 = vadd.f32 %v3443_v16, %v5347_v37 }
0x16b3   : > { %v3444_v54 = vsel %vm3436_vm2, %v3431_v9, %v3442_v29 }
0x16b4   : > { %v3446_v23 = vadd.f32 %v3444_v54, %v5350_v12 }
0x16b6   : > { %v3449_v32 = vcombine.low %v3445_v36, %v3446_v23 }
0x16b8   : > { %v3456_v56 = vrot.slane %v3449_v32, %v3455_v53 }
0x16ba   : > { %v3463_v2 = vrot.slane %v3456_v56, %v3455_v53 }
0x16bc   : > { %3469 = vst.msk [vmem:[%s360_s16] sm:$0x3] %vm3467_vm3, %v3463_v2 }
0x16bd PF: > { %s20_s30 = sadd.s32 1, %s4288_s30  }
0x16be   : > { %p17_p4 = scmp.ge.s32.totalorder %s20_s30, 4  }
0x16c0   :  { %19 = sbr.rel (!%p17_p4) target bundleno = 1 (0x1), region = 102 }

</bundles_post_ra>
